<compile_context>
chip_gen: v5e
topology: v5e:2x2
jax: 0.10.0
libtpu: 0.0.40
codegen_flags: <defaults>
</compile_context>

<pallas_src>
import functools
import math

import jax
import jax.numpy as jnp
from jax.experimental import pallas as pl
from jax.experimental.pallas import tpu as pltpu


def _mmconv_kernel(adj_ref, xcat_ref, h0_ref, w_ref, watt_ref, out_ref,
                   *, theta, alpha, beta, f):
    adj = adj_ref[...]          # (TN, N)   row tile of adjacency (mxu dtype)
    xcat = xcat_ref[...]        # (N, 5F)   [x | h0 | h0^2 | h0^3 | h0^4] (mxu dtype)
    h0_blk = h0_ref[...]        # (TN, F)   f32 rows of h0 for this tile
    w = w_ref[...]              # (F, F)
    watt = watt_ref[...]        # (2F, F)

    # --- single fused adjacency contraction: (TN,N) @ (N,5F) -> (TN,5F) f32 ---
    agg = jnp.dot(adj, xcat, preferred_element_type=jnp.float32)

    # Lane-aligned slices (F should be a multiple of 128 for best layout).
    ax = agg[:, 0 * f:1 * f]    # adj @ x
    mu = agg[:, 1 * f:2 * f]    # adj @ h0
    s2 = agg[:, 2 * f:3 * f]    # adj @ h0^2
    m3 = agg[:, 3 * f:4 * f]    # adj @ h0^3
    m4 = agg[:, 4 * f:5 * f]    # adj @ h0^4

    # h_agg = (1-alpha) * adj@x + alpha * h0 ;  h_i = theta*(h_agg@W) + (1-theta)*h_agg
    h_agg = (1.0 - alpha) * ax + alpha * h0_blk
    h_i = theta * jnp.dot(h_agg.astype(w.dtype), w,
                          preferred_element_type=jnp.float32) \
          + (1.0 - theta) * h_agg

    # --- moment normalization (moment=4, use_center_moment=False) ---
    sig = jnp.sqrt(jnp.maximum(s2, 1e-16))                 # 2nd moment (non-neg)

    m3s = jnp.where(m3 == 0.0, 1e-16, m3)                  # signed cube root
    g3 = jnp.where(m3s < 0.0, -1.0, 1.0) * (jnp.abs(m3s) ** (1.0 / 3.0))

    # adj >= 0 and h0^4 >= 0  =>  4th raw moment non-negative: sqrt(sqrt(.))
    g4 = jnp.sqrt(jnp.sqrt(jnp.maximum(m4, 1e-16)))

    # --- attention over moments: e_k = elu(m_k @ Wk + h_i @ Wq) ---
    wk = watt[:f, :]
    wq = watt[f:, :]
    q_part = jnp.dot(h_i.astype(wq.dtype), wq, preferred_element_type=jnp.float32)

    # one (4*TN, F) x (F, F) matmul for all moment keys
    kcat = jnp.concatenate([mu, sig, g3, g4], axis=0).astype(wk.dtype)
    kall = jnp.dot(kcat, wk, preferred_element_type=jnp.float32)
    tn = mu.shape[0]

    def elu(z):
        # exp(z)-1 (expm1 would be marginally more precise; negligible here)
        return jnp.where(z > 0.0, z, jnp.exp(z) - 1.0)

    e0 = elu(kall[0 * tn:1 * tn, :] + q_part)
    e1 = elu(kall[1 * tn:2 * tn, :] + q_part)
    e2 = elu(kall[2 * tn:3 * tn, :] + q_part)
    e3 = elu(kall[3 * tn:4 * tn, :] + q_part)

    # softmax over the 4 moments, done with 2-D elementwise ops (no stacks)
    e_max = jnp.maximum(jnp.maximum(e0, e1), jnp.maximum(e2, e3))
    p0 = jnp.exp(e0 - e_max)
    p1 = jnp.exp(e1 - e_max)
    p2 = jnp.exp(e2 - e_max)
    p3 = jnp.exp(e3 - e_max)
    inv_den = pl.reciprocal(p0 + p1 + p2 + p3, approx=True)

    h_moment = (p0 * mu + p1 * sig + p2 * g3 + p3 * g4) * inv_den

    out_ref[...] = ((1.0 - beta) * h_i + beta * h_moment).astype(out_ref.dtype)


def mmconv_forward(x, adj, h0, weight, w_att, *, lamda, alpha, l, beta=0.9,
                   tn=128, mxu_dtype=jnp.bfloat16):
    n, f = x.shape
    tn = min(tn, n)
    assert n % tn == 0, "N must be divisible by the row tile"
    theta = math.log(lamda / l + 1.0)

    # Precompute the fused adjacency-RHS once (powers of h0 computed a single
    # time, not per grid step): (N, 5F).
    xcat = jnp.concatenate([x, h0, h0 * h0, h0 * h0 * h0, h0 * h0 * h0 * h0],
                           axis=1)

    # bf16 MXU operands (f32 accumulation); keep the residual h0 rows in f32.
    adj_c = adj.astype(mxu_dtype)
    xcat_c = xcat.astype(mxu_dtype)
    w_c = weight.astype(mxu_dtype)
    watt_c = w_att.astype(mxu_dtype)

    kernel = functools.partial(_mmconv_kernel, theta=theta, alpha=alpha,
                               beta=beta, f=f)
    return pl.pallas_call(
        kernel,
        out_shape=jax.ShapeDtypeStruct((n, f), x.dtype),
        grid_spec=pltpu.PrefetchScalarGridSpec(
            num_scalar_prefetch=0,
            grid=(n // tn,),
            in_specs=[
                pl.BlockSpec((tn, n), lambda i: (i, 0)),        # adj row tile
                pl.BlockSpec((n, 5 * f), lambda i: (0, 0)),     # xcat (resident)
                pl.BlockSpec((tn, f), lambda i: (i, 0)),        # h0 row tile (f32)
                pl.BlockSpec((f, f), lambda i: (0, 0)),         # weight
                pl.BlockSpec((2 * f, f), lambda i: (0, 0)),     # w_att
            ],
            out_specs=pl.BlockSpec((tn, f), lambda i: (i, 0)),
        ),
        compiler_params=pltpu.CompilerParams(
            dimension_semantics=("parallel",),
            vmem_limit_bytes=64 * 1024 * 1024,
        ),
    )(adj_c, xcat_c, h0, w_c, watt_c)


def mmconv_reference(x, adj, h0, weight, w_att, *, lamda, alpha, l, beta=0.9):
    """Pure-JAX f32 reference mirroring the PyTorch forward (eval mode)."""
    theta = math.log(lamda / l + 1.0)
    f = x.shape[1]
    h_agg = (1.0 - alpha) * (adj @ x) + alpha * h0
    h_i = theta * (h_agg @ weight) + (1.0 - theta) * h_agg

    mu = adj @ h0
    sig = adj @ (h0 ** 2)
    sig = jnp.sqrt(jnp.where(sig == 0.0, 1e-16, sig))

    def sroot(raw, order):
        raw = jnp.where(raw == 0.0, 1e-16, raw)
        return jnp.sign(raw) * jnp.abs(raw) ** (1.0 / order)

    g3 = sroot(adj @ (h0 ** 3), 3.0)
    g4 = sroot(adj @ (h0 ** 4), 4.0)
    moments = [mu, sig, g3, g4]

    wk, wq = w_att[:f], w_att[f:]
    qp = h_i @ wq
    e = jnp.stack([jax.nn.elu(m @ wk + qp) for m in moments], axis=0)
    att = jax.nn.softmax(e, axis=0)
    h_moment = jnp.sum(jnp.stack(moments, axis=0) * att, axis=0)
    return (1.0 - beta) * h_i + beta * h_moment


if __name__ == "__main__":
    N, F = 256, 128            # N nodes, in_features == out_features == 128
    lamda, alpha, l, beta = 0.5, 0.1, 1, 0.9

    key = jax.random.PRNGKey(0)
    k_x, k_h0, k_adj, k_w, k_watt = jax.random.split(key, 5)

    x = jax.random.normal(k_x, (N, F), dtype=jnp.float32)
    h0 = jax.random.normal(k_h0, (N, F), dtype=jnp.float32)

    # random adjacency with self loops, row-normalized (dense spmm)
    a = (jax.random.uniform(k_adj, (N, N)) < 0.1).astype(jnp.float32)
    a = jnp.maximum(a, jnp.eye(N, dtype=jnp.float32))
    adj = a / jnp.sum(a, axis=1, keepdims=True)

    # parameter init: uniform(-stdv, stdv), stdv = 1/sqrt(out_features)
    stdv = 1.0 / math.sqrt(F)
    weight = jax.random.uniform(k_w, (F, F), minval=-stdv, maxval=stdv,
                                dtype=jnp.float32)
    w_att = jax.random.uniform(k_watt, (2 * F, F), minval=-stdv, maxval=stdv,
                               dtype=jnp.float32)

    ref = mmconv_reference(x, adj, h0, weight, w_att,
                           lamda=lamda, alpha=alpha, l=l, beta=beta)

    # f32-MXU path (tight check)
    out_f32 = mmconv_forward(x, adj, h0, weight, w_att,
                             lamda=lamda, alpha=alpha, l=l, beta=beta,
                             tn=128, mxu_dtype=jnp.float32)
    out_f32 = jax.block_until_ready(out_f32)
    assert out_f32.shape == (N, F) and out_f32.dtype == jnp.float32
    assert jnp.allclose(out_f32, ref, rtol=2e-2, atol=2e-2), \
        "f32 kernel mismatch vs reference"

    # bf16-MXU path (default; production setting for v6e/v7x)
    out_bf16 = mmconv_forward(x, adj, h0, weight, w_att,
                              lamda=lamda, alpha=alpha, l=l, beta=beta,
                              tn=128, mxu_dtype=jnp.bfloat16)
    out_bf16 = jax.block_until_ready(out_bf16)
    assert out_bf16.shape == (N, F) and out_bf16.dtype == jnp.float32
    assert jnp.allclose(out_bf16, ref, rtol=5e-2, atol=5e-2), \
        "bf16 kernel mismatch vs reference"

    print("KERNEL_OK")
</pallas_src>

<mosaic_0001>
module attributes {stable_mosaic.version = 11 : i64} {
  func.func @_mmconv_kernel(%arg0: i32, %arg1: memref<128x256xf32, #tpu.memory_space<vmem>>, %arg2: memref<256x640xf32, #tpu.memory_space<vmem>>, %arg3: memref<128x128xf32, #tpu.memory_space<vmem>>, %arg4: memref<128x128xf32, #tpu.memory_space<vmem>>, %arg5: memref<256x128xf32, #tpu.memory_space<vmem>>, %arg6: memref<128x128xf32, #tpu.memory_space<vmem>>) attributes {dimension_semantics = [#tpu.dimension_semantics<parallel>], iteration_bounds = array<i64: 2>, scalar_prefetch = 0 : i64, scratch_operands = 0 : i64, tpu.core_type = #tpu.core_type<tc>, window_params = [{transform_indices = @transform_0, window_bounds = array<i64: 128, 256>}, {pipeline_mode = #tpu.pipeline_mode<synchronous>, transform_indices = @transform_1, window_bounds = array<i64: 256, 640>}, {transform_indices = @transform_2, window_bounds = array<i64: 128, 128>}, {pipeline_mode = #tpu.pipeline_mode<synchronous>, transform_indices = @transform_3, window_bounds = array<i64: 128, 128>}, {pipeline_mode = #tpu.pipeline_mode<synchronous>, transform_indices = @transform_4, window_bounds = array<i64: 256, 128>}, {transform_indices = @transform_5, window_bounds = array<i64: 128, 128>}]} {
    %c0 = arith.constant 0 : index
    %c0_0 = arith.constant 0 : index
    %0 = vector.load %arg1[%c0, %c0_0] : memref<128x256xf32, #tpu.memory_space<vmem>>, vector<128x256xf32>
    %c0_1 = arith.constant 0 : index
    %c0_2 = arith.constant 0 : index
    %1 = vector.load %arg2[%c0_1, %c0_2] : memref<256x640xf32, #tpu.memory_space<vmem>>, vector<256x640xf32>
    %c0_3 = arith.constant 0 : index
    %c0_4 = arith.constant 0 : index
    %2 = vector.load %arg3[%c0_3, %c0_4] : memref<128x128xf32, #tpu.memory_space<vmem>>, vector<128x128xf32>
    %c0_5 = arith.constant 0 : index
    %c0_6 = arith.constant 0 : index
    %3 = vector.load %arg4[%c0_5, %c0_6] : memref<128x128xf32, #tpu.memory_space<vmem>>, vector<128x128xf32>
    %c0_7 = arith.constant 0 : index
    %c0_8 = arith.constant 0 : index
    %4 = vector.load %arg5[%c0_7, %c0_8] : memref<256x128xf32, #tpu.memory_space<vmem>>, vector<256x128xf32>
    %cst = arith.constant dense<0.000000e+00> : vector<128x640xf32>
    %5 = tpu.matmul %0, %1, %cst {dimension_numbers = #tpu.dot_dimension_numbers<[1], [0], [0], [1], [0, 0, 1, 1], [], []>} : vector<128x256xf32>, vector<256x640xf32>, vector<128x640xf32> -> vector<128x640xf32>
    %6 = vector.extract_strided_slice %5 {offsets = [0, 0], sizes = [128, 128], strides = [1, 1]} : vector<128x640xf32> to vector<128x128xf32>
    %7 = vector.extract_strided_slice %5 {offsets = [0, 128], sizes = [128, 128], strides = [1, 1]} : vector<128x640xf32> to vector<128x128xf32>
    %8 = vector.extract_strided_slice %5 {offsets = [0, 256], sizes = [128, 128], strides = [1, 1]} : vector<128x640xf32> to vector<128x128xf32>
    %9 = vector.extract_strided_slice %5 {offsets = [0, 384], sizes = [128, 128], strides = [1, 1]} : vector<128x640xf32> to vector<128x128xf32>
    %10 = vector.extract_strided_slice %5 {offsets = [0, 512], sizes = [128, 128], strides = [1, 1]} : vector<128x640xf32> to vector<128x128xf32>
    %cst_9 = arith.constant 0.899999976 : f32
    %11 = vector.broadcast %cst_9 : f32 to vector<128x128xf32>
    %12 = arith.mulf %11, %6 : vector<128x128xf32>
    %cst_10 = arith.constant 1.000000e-01 : f32
    %13 = vector.broadcast %cst_10 : f32 to vector<128x128xf32>
    %14 = arith.mulf %13, %2 : vector<128x128xf32>
    %15 = arith.addf %12, %14 : vector<128x128xf32>
    %cst_11 = arith.constant dense<0.000000e+00> : vector<128x128xf32>
    %16 = tpu.matmul %15, %3, %cst_11 {dimension_numbers = #tpu.dot_dimension_numbers<[1], [0], [0], [1], [0, 0, 1, 1], [], []>} : vector<128x128xf32>, vector<128x128xf32>, vector<128x128xf32> -> vector<128x128xf32>
    %cst_12 = arith.constant 0.405465096 : f32
    %17 = vector.broadcast %cst_12 : f32 to vector<128x128xf32>
    %18 = arith.mulf %17, %16 : vector<128x128xf32>
    %cst_13 = arith.constant 0.594534874 : f32
    %19 = vector.broadcast %cst_13 : f32 to vector<128x128xf32>
    %20 = arith.mulf %19, %15 : vector<128x128xf32>
    %21 = arith.addf %18, %20 : vector<128x128xf32>
    %cst_14 = arith.constant 1.000000e-16 : f32
    %22 = vector.broadcast %cst_14 : f32 to vector<128x128xf32>
    %23 = arith.maximumf %8, %22 : vector<128x128xf32>
    %24 = math.sqrt %23 : vector<128x128xf32>
    %cst_15 = arith.constant 0.000000e+00 : f32
    %25 = vector.broadcast %cst_15 : f32 to vector<128x128xf32>
    %26 = arith.cmpf oeq, %9, %25 : vector<128x128xf32>
    %cst_16 = arith.constant 1.000000e-16 : f32
    %27 = vector.broadcast %cst_16 : f32 to vector<128x128xf32>
    %28 = arith.select %26, %27, %9 : vector<128x128xi1>, vector<128x128xf32>
    %cst_17 = arith.constant 0.000000e+00 : f32
    %29 = vector.broadcast %cst_17 : f32 to vector<128x128xf32>
    %30 = arith.cmpf olt, %28, %29 : vector<128x128xf32>
    %cst_18 = arith.constant -1.000000e+00 : f32
    %cst_19 = arith.constant 1.000000e+00 : f32
    %31 = vector.broadcast %cst_18 : f32 to vector<128x128xf32>
    %32 = vector.broadcast %cst_19 : f32 to vector<128x128xf32>
    %33 = arith.select %30, %31, %32 : vector<128x128xi1>, vector<128x128xf32>
    %34 = math.absf %28 : vector<128x128xf32>
    %cst_20 = arith.constant 0.333333343 : f32
    %35 = vector.broadcast %cst_20 : f32 to vector<128x128xf32>
    %36 = math.powf %34, %35 : vector<128x128xf32>
    %37 = arith.mulf %33, %36 : vector<128x128xf32>
    %cst_21 = arith.constant 1.000000e-16 : f32
    %38 = vector.broadcast %cst_21 : f32 to vector<128x128xf32>
    %39 = arith.maximumf %10, %38 : vector<128x128xf32>
    %40 = math.sqrt %39 : vector<128x128xf32>
    %41 = math.sqrt %40 : vector<128x128xf32>
    %42 = vector.extract_strided_slice %4 {offsets = [0, 0], sizes = [128, 128], strides = [1, 1]} : vector<256x128xf32> to vector<128x128xf32>
    %43 = vector.extract_strided_slice %4 {offsets = [128, 0], sizes = [128, 128], strides = [1, 1]} : vector<256x128xf32> to vector<128x128xf32>
    %cst_22 = arith.constant dense<0.000000e+00> : vector<128x128xf32>
    %44 = tpu.matmul %21, %43, %cst_22 {dimension_numbers = #tpu.dot_dimension_numbers<[1], [0], [0], [1], [0, 0, 1, 1], [], []>} : vector<128x128xf32>, vector<128x128xf32>, vector<128x128xf32> -> vector<128x128xf32>
    %45 = tpu.concatenate %7, %24, %37, %41 in 0 : vector<128x128xf32>, vector<128x128xf32>, vector<128x128xf32>, vector<128x128xf32> -> vector<512x128xf32>
    %cst_23 = arith.constant dense<0.000000e+00> : vector<512x128xf32>
    %46 = tpu.matmul %45, %42, %cst_23 {dimension_numbers = #tpu.dot_dimension_numbers<[1], [0], [0], [1], [0, 0, 1, 1], [], []>} : vector<512x128xf32>, vector<128x128xf32>, vector<512x128xf32> -> vector<512x128xf32>
    %47 = vector.extract_strided_slice %46 {offsets = [0, 0], sizes = [128, 128], strides = [1, 1]} : vector<512x128xf32> to vector<128x128xf32>
    %48 = arith.addf %47, %44 : vector<128x128xf32>
    %cst_24 = arith.constant 0.000000e+00 : f32
    %49 = vector.broadcast %cst_24 : f32 to vector<128x128xf32>
    %50 = arith.cmpf ogt, %48, %49 : vector<128x128xf32>
    %51 = math.exp %48 : vector<128x128xf32>
    %cst_25 = arith.constant 1.000000e+00 : f32
    %52 = vector.broadcast %cst_25 : f32 to vector<128x128xf32>
    %53 = arith.subf %51, %52 : vector<128x128xf32>
    %54 = arith.select %50, %48, %53 : vector<128x128xi1>, vector<128x128xf32>
    %55 = vector.extract_strided_slice %46 {offsets = [128, 0], sizes = [128, 128], strides = [1, 1]} : vector<512x128xf32> to vector<128x128xf32>
    %56 = arith.addf %55, %44 : vector<128x128xf32>
    %cst_26 = arith.constant 0.000000e+00 : f32
    %57 = vector.broadcast %cst_26 : f32 to vector<128x128xf32>
    %58 = arith.cmpf ogt, %56, %57 : vector<128x128xf32>
    %59 = math.exp %56 : vector<128x128xf32>
    %cst_27 = arith.constant 1.000000e+00 : f32
    %60 = vector.broadcast %cst_27 : f32 to vector<128x128xf32>
    %61 = arith.subf %59, %60 : vector<128x128xf32>
    %62 = arith.select %58, %56, %61 : vector<128x128xi1>, vector<128x128xf32>
    %63 = vector.extract_strided_slice %46 {offsets = [256, 0], sizes = [128, 128], strides = [1, 1]} : vector<512x128xf32> to vector<128x128xf32>
    %64 = arith.addf %63, %44 : vector<128x128xf32>
    %cst_28 = arith.constant 0.000000e+00 : f32
    %65 = vector.broadcast %cst_28 : f32 to vector<128x128xf32>
    %66 = arith.cmpf ogt, %64, %65 : vector<128x128xf32>
    %67 = math.exp %64 : vector<128x128xf32>
    %cst_29 = arith.constant 1.000000e+00 : f32
    %68 = vector.broadcast %cst_29 : f32 to vector<128x128xf32>
    %69 = arith.subf %67, %68 : vector<128x128xf32>
    %70 = arith.select %66, %64, %69 : vector<128x128xi1>, vector<128x128xf32>
    %71 = vector.extract_strided_slice %46 {offsets = [384, 0], sizes = [128, 128], strides = [1, 1]} : vector<512x128xf32> to vector<128x128xf32>
    %72 = arith.addf %71, %44 : vector<128x128xf32>
    %cst_30 = arith.constant 0.000000e+00 : f32
    %73 = vector.broadcast %cst_30 : f32 to vector<128x128xf32>
    %74 = arith.cmpf ogt, %72, %73 : vector<128x128xf32>
    %75 = math.exp %72 : vector<128x128xf32>
    %cst_31 = arith.constant 1.000000e+00 : f32
    %76 = vector.broadcast %cst_31 : f32 to vector<128x128xf32>
    %77 = arith.subf %75, %76 : vector<128x128xf32>
    %78 = arith.select %74, %72, %77 : vector<128x128xi1>, vector<128x128xf32>
    %79 = arith.maximumf %54, %62 : vector<128x128xf32>
    %80 = arith.maximumf %70, %78 : vector<128x128xf32>
    %81 = arith.maximumf %79, %80 : vector<128x128xf32>
    %82 = arith.subf %54, %81 : vector<128x128xf32>
    %83 = math.exp %82 : vector<128x128xf32>
    %84 = arith.subf %62, %81 : vector<128x128xf32>
    %85 = math.exp %84 : vector<128x128xf32>
    %86 = arith.subf %70, %81 : vector<128x128xf32>
    %87 = math.exp %86 : vector<128x128xf32>
    %88 = arith.subf %78, %81 : vector<128x128xf32>
    %89 = math.exp %88 : vector<128x128xf32>
    %90 = arith.addf %83, %85 : vector<128x128xf32>
    %91 = arith.addf %90, %87 : vector<128x128xf32>
    %92 = arith.addf %91, %89 : vector<128x128xf32>
    %93 = tpu.reciprocal %92 {approx = true} : vector<128x128xf32> -> vector<128x128xf32>
    %94 = arith.mulf %83, %7 : vector<128x128xf32>
    %95 = arith.mulf %85, %24 : vector<128x128xf32>
    %96 = arith.addf %94, %95 : vector<128x128xf32>
    %97 = arith.mulf %87, %37 : vector<128x128xf32>
    %98 = arith.addf %96, %97 : vector<128x128xf32>
    %99 = arith.mulf %89, %41 : vector<128x128xf32>
    %100 = arith.addf %98, %99 : vector<128x128xf32>
    %101 = arith.mulf %100, %93 : vector<128x128xf32>
    %cst_32 = arith.constant 1.000000e-01 : f32
    %102 = vector.broadcast %cst_32 : f32 to vector<128x128xf32>
    %103 = arith.mulf %102, %21 : vector<128x128xf32>
    %cst_33 = arith.constant 0.899999976 : f32
    %104 = vector.broadcast %cst_33 : f32 to vector<128x128xf32>
    %105 = arith.mulf %104, %101 : vector<128x128xf32>
    %106 = arith.addf %103, %105 : vector<128x128xf32>
    %c0_34 = arith.constant 0 : index
    %c0_35 = arith.constant 0 : index
    %107 = vector.load %arg6[%c0_34, %c0_35] : memref<128x128xf32, #tpu.memory_space<vmem>>, vector<128x128xf32>
    tpu.vector_store %arg6[%c0_34, %c0_35], %106 {strides = array<i32>} : memref<128x128xf32, #tpu.memory_space<vmem>>, vector<128x128xf32>,
    return
  }
  func.func @transform_0(%arg0: i32) -> (i32, i32) {
    %c0_i32 = arith.constant 0 : i32
    %c0_i32_0 = arith.constant 0 : i32
    return %arg0, %c0_i32 : i32, i32
  }
  func.func @transform_1(%arg0: i32) -> (i32, i32) {
    %c0_i32 = arith.constant 0 : i32
    %c0_i32_0 = arith.constant 0 : i32
    %c0_i32_1 = arith.constant 0 : i32
    return %c0_i32, %c0_i32_0 : i32, i32
  }
  func.func @transform_2(%arg0: i32) -> (i32, i32) {
    %c0_i32 = arith.constant 0 : i32
    %c0_i32_0 = arith.constant 0 : i32
    return %arg0, %c0_i32 : i32, i32
  }
  func.func @transform_3(%arg0: i32) -> (i32, i32) {
    %c0_i32 = arith.constant 0 : i32
    %c0_i32_0 = arith.constant 0 : i32
    %c0_i32_1 = arith.constant 0 : i32
    return %c0_i32, %c0_i32_0 : i32, i32
  }
  func.func @transform_4(%arg0: i32) -> (i32, i32) {
    %c0_i32 = arith.constant 0 : i32
    %c0_i32_0 = arith.constant 0 : i32
    %c0_i32_1 = arith.constant 0 : i32
    return %c0_i32, %c0_i32_0 : i32, i32
  }
  func.func @transform_5(%arg0: i32) -> (i32, i32) {
    %c0_i32 = arith.constant 0 : i32
    %c0_i32_0 = arith.constant 0 : i32
    return %arg0, %c0_i32 : i32, i32
  }
}

</mosaic_0001>

<bundles_post_ra>
// kernel: tpu_custom_call.1
= control target key start
LH: loop header
LB: loop body
LE: loop exit
PB: predicated region body
PF: predicated region fallthrough
CT: control target
= control target key end

     0   :  { %s7995_s0 = inlined_call_operand.hbm [shape: f32[256,256], index: 0, kind: input, shape index: {}]   ;;  %s7996_s1 = inlined_call_operand.hbm [shape: f32[256,640], index: 1, kind: input, shape index: {}]   ;;  %s7997_s2 = inlined_call_operand.hbm [shape: f32[256,128], index: 2, kind: input, shape index: {}]   ;;  %s7998_s3 = inlined_call_operand.hbm [shape: f32[128,128], index: 3, kind: input, shape index: {}]   ;;  %s7999_s4 = inlined_call_operand.hbm [shape: f32[256,128], index: 4, kind: input, shape index: {}]   ;;  %s8000_s5 = inlined_call_operand.hbm [shape: f32[256,128], index: 5, kind: output, shape index: {}]  }
   0x1   :  { %8101 = sst [smem:[#allocation126_spill]] %s7995_s0 }
   0x2   :  { %8102 = sst [smem:[#allocation127_spill]] %s7996_s1 }
   0x3   :  { %10 = vsyncpa [#allocation3], 0 }
   0x4   :  { %12 = vsyncpa [#allocation3 + $0x1], 0 }
   0x5   :  { %13 = vsyncpa [#allocation6], 0 }
   0x6   :  { %14 = vsyncpa [#allocation10], 0 }
   0x7   :  { %15 = vsyncpa [#allocation4], 0 }
   0x8   :  { %17 = vsyncpa [#allocation4 + $0x1], 0  ;;  %s4741_s18 = smov 0   ;;  %s4743_s19 = smov 0  }
   0x9   :  { %s4745_s20 = smov 0   ;;  %s4747_s21 = smov 0  }
   0xa LB: > { %8103 = sst [smem:[#allocation18_spill]] %s4693_s20  ;;  %s4762_s22 = sadd.s32 4294967295, %s4697_s21   ;;  %s4697_s21 = sphi %s4747_s21, %s8389_s21   ;;  %s4693_s20 = sphi %s4745_s20, %s8391_s20   ;;  %s4689_s19 = sphi %s4743_s19, %s8393_s19   ;;  %s4685_s18 = sphi %s4741_s18, %s8392_s18  }
   0xb   : > { %s3417_s23 = sadd.s32 4294967294, %s4697_s21   ;;  %p43_p0 = scmp.ne.s32.totalorder %s4689_s19, %s4685_s18 }
   0xc   : > { %p8001_p1 = scmp.eq.s32.totalorder %s4762_s22, 0  ;;  %p156_p2 = scmp.eq.s32.totalorder %s4762_s22, 1 }
   0xd   : > { %p162_p3 = scmp.eq.s32.totalorder %s3417_s23, 1  ;;  %p3418_p5 = scmp.ge.s32.totalorder %s4697_s21, 1 }
   0xe   : > { %p4771_p4 = por %p8001_p1, %p43_p0  ;;  %p169_p7 = scmp.lt.s32.totalorder %s4697_s21, 3 }
   0xf   : > { %p4776_p6 = por %p162_p3, %p43_p0  ;;  %s8107_s1 = sld [smem:[#allocation127_spill]] }
  0x10   : > { %p4784_p8 = pnand %p3418_p5, %p169_p7  ;;  %s4699_s30 = smov [#allocation5]  }
  0x11   : > { %s8105_s25 = scalar_select %p4776_p6, 1, 0 }
  0x12   : > { %p3912_p9 = pneg %p4784_p8  ;;  %s182_s6 = sshll.u32 %s4699_s30, 4  ;;  %s183_s6 = int_to_ptr.vmem [resolvable:$true] %s182_s6 }
  0x13   : > { %8106 = sst [smem:[#allocation19_spill]] %s8105_s25  ;;  %s4798_s8 = sadd.s32 1, %s4697_s21  }
  0x14   : > { %p4792_p10 = pnand %p3912_p9, %p8001_p1  ;;  %8110 = sst [smem:[#allocation20_spill]] %s4798_s8 }
  0x15   : > { %s180_s28 = sshll.u32 %s8107_s1, 4  ;;  %s4700_s9 = smov 640   ;;  %s181_s28 = int_to_ptr.hbm [resolvable:$true] %s180_s28 }
  0x16   : > { %s4701_s10 = smov 40   ;;  %s27_s11 = ssub.s32 %s4697_s21, %s4798_s8 }
  0x17   : > { %3915 = dma.hbm_to_vmem [thread:$0]  (!%p4792_p10), %s181_s28, 20480, %s183_s6, [#allocation6], %s4700_s9, %s4700_s9, %s4701_s10  }
  0x18   : > { %s30_s12 = sadd.s32 1, %s4693_s20  ;;  %p28_p12 = scmp.eq.s32.totalorder %s27_s11, 0 }
  0x19   : > { %p37_p13 = scmp.ne.s32.totalorder %s4693_s20, %s4689_s19  ;;  %p38_p0 = scmp.eq.s32.totalorder %s4697_s21, 0 }
  0x1a   : > { %p3936_p3 = scmp.lt.s32.totalorder %s4697_s21, 2  ;;  %s224_s15 = sand.u32 1, %s4697_s21  }
  0x1b   : > { %s4810_s13 = scalar_select %p28_p12, %s4693_s20, %s30_s12  }
  0x1c   : > { %p39_p5 = por %p38_p0, %p37_p13  ;;  %p4814_p7 = por %p156_p2, %p37_p13 }
  0x1d   : > { %8111 = sst [smem:[#allocation21_spill]] %s4810_s13  ;;  %s226_s16 = sand.u32 1, %s4693_s20  }
  0x1e   : > { %s3423_s17 = sshll.u32 %s226_s16, 8  ;;  %s3507_s23 = sshll.u32 %s4697_s21, 8 }
  0x1f   : > { %s8113_s0 = sld [smem:[#allocation126_spill]]  ;;  %s228_s30 = scalar_lea.vmem [#allocation2], %s3423_s17 }
  0x20   : > { %s237_s6 = sshll.u32 %s228_s30, 4  ;;  %p4826_p9 = pnand %p3936_p3, %p39_p5  ;;  %s238_s6 = int_to_ptr.vmem [resolvable:$true] %s237_s6 }
  0x21   : > { %s3427_s11 = sshll.u32 %s226_s16, 7  ;;  %s4830_s12 = scalar_lea.sflag [#allocation3], %s224_s15 }
  0x22   : > { %p4499_p12 = pneg %p4826_p9 }
  0x25   : > { %s234_s28 = scalar_lea.hbm %s8113_s0, %s3507_s23  ;;  %s4502_s26 = scalar_lea.hbm %s8113_s0, 512 }
  0x26   : > { %s235_s9 = sshll.u32 %s234_s28, 4  ;;  %s236_s9 = int_to_ptr.hbm [resolvable:$true] %s235_s9 }
  0x27   : > { %s4495_s1 = sshra.s32 %s236_s9, 4  ;;  %s4496_s1 = int_to_ptr.hbm [resolvable:$true] %s4495_s1 }
  0x28   : > { %s4497_s13 = scalar_lea.hbm %s4496_s1, 256  ;;  %p4503_p3 = scmp.lt.s32.totalorder %s4496_s1, %s8113_s0 }
  0x29   : > { %p4498_p2 = scmp.ne.s32.totalorder %s4496_s1, %s4497_s13  ;;  %p4504_p5 = scmp.lt.s32.totalorder %s4502_s26, %s4497_s13 }
  0x2b   : > { %p4500_p13 = pnand %p4499_p12, %p4498_p2  ;;  %p4505_p11 = por %p4504_p5, %p4503_p3 }
  0x2d   : > { %p4501_p0 = pneg %p4500_p13 }
  0x2f   : > { %p4506_p1 = pnand %p4505_p11, %p4501_p0 }
  0x31   : > { %4509 = shalt.err (!%p4506_p1)
}
  0x32   : > { %s4702_s15 = smov 256   ;;  %s4703_s16 = smov 16  }
  0x33   : > { %3925 = dma.hbm_to_vmem [thread:$0]  (!%p4826_p9), %s236_s9, 4096, %s238_s6, %s4830_s12, %s4702_s15, %s4702_s15, %s4703_s16  }
  0x34   : > { %s194_s17 = sshll.u32 %s7998_s3, 4  ;;  %s251_s23 = scalar_lea.vmem [#allocation7], %s3427_s11  ;;  %s195_s17 = int_to_ptr.hbm [resolvable:$true] %s194_s17 }
  0x35   : > { %s4849_s27 = sshll.u32 %s251_s23, 4  ;;  %s4704_s1 = smov [#allocation8]   ;;  %s260_s27 = int_to_ptr.vmem [resolvable:$true] %s4849_s27 }
  0x36   : > { %s196_s13 = sshll.u32 %s4704_s1, 4  ;;  %s208_s0 = sshll.u32 %s7999_s4, 4  ;;  %s197_s13 = int_to_ptr.vmem [resolvable:$true] %s196_s13  ;;  %s209_s0 = int_to_ptr.hbm [resolvable:$true] %s208_s0 }
  0x37   : > { %s4705_s8 = smov 128   ;;  %s4706_s25 = smov 8  }
  0x38   : > { %3918 = dma.hbm_to_vmem [thread:$0]  (!%p4792_p10), %s195_s17, 2048, %s197_s13, [#allocation6], %s4705_s8, %s4705_s8, %s4706_s25  }
  0x39   : > { %s4707_s20 = smov [#allocation9]   ;;  %s3508_s9 = sshll.u32 %s4697_s21, 7 }
  0x3a   : > { %s210_s6 = sshll.u32 %s4707_s20, 4  ;;  %s256_s16 = scalar_lea.hbm %s7997_s2, %s3508_s9  ;;  %s211_s6 = int_to_ptr.vmem [resolvable:$true] %s210_s6 }
  0x3b   : > { %3921 = dma.hbm_to_vmem [thread:$0]  (!%p4792_p10), %s209_s0, 4096, %s211_s6, [#allocation10], %s4705_s8, %s4705_s8, %s4706_s25  }
  0x3c   : > { %s257_s30 = sshll.u32 %s256_s16, 4  ;;  %s4592_s26 = scalar_lea.hbm %s7997_s2, 256  ;;  %s258_s30 = int_to_ptr.hbm [resolvable:$true] %s257_s30 }
  0x3d   : > { %s4585_s23 = sshra.s32 %s258_s30, 4  ;;  %s4586_s23 = int_to_ptr.hbm [resolvable:$true] %s4585_s23 }
  0x3e   : > { %s4587_s1 = scalar_lea.hbm %s4586_s23, 128  ;;  %p4593_p13 = scmp.lt.s32.totalorder %s4586_s23, %s7997_s2 }
  0x3f   : > { %p4588_p1 = scmp.ne.s32.totalorder %s4586_s23, %s4587_s1  ;;  %p4594_p10 = scmp.lt.s32.totalorder %s4592_s26, %s4587_s1 }
  0x41   : > { %p4590_p11 = pnand %p4588_p1, %p4499_p12  ;;  %p4595_p0 = por %p4594_p10, %p4593_p13 }
  0x43   : > { %p4591_p2 = pneg %p4590_p11 }
  0x45   : > { %p4596_p3 = pnand %p4595_p0, %p4591_p2 }
  0x47   : > { %4599 = shalt.err (!%p4596_p3)
}
  0x48   : > { %3928 = dma.hbm_to_vmem [thread:$0]  (!%p4826_p9), %s258_s30, 2048, %s260_s27, %s4830_s12, %s4705_s8, %s4705_s8, %s4706_s25  }
  0x49   : > { %271 = sbr.rel (%p4784_p8) target bundleno = 1145 (0x479), region = 40 }
  0x4e   : > { %s273_s0 = sand.u32 1, %s4762_s22   ;;  %s4879_s7 = sand.u32 1, %s4689_s19  }
  0x4f   : > { %s3431_s6 = sshll.u32 %s4879_s7, 8  ;;  %s274_s9 = scalar_lea.sflag [#allocation3], %s273_s0 }
  0x50   : > { %s4882_s11 = scalar_lea.vmem [#allocation2], %s3431_s6 }
  0x51   : > { %4660 = dma.done.wait (%p4771_p4), %s274_s9, 4096  }
  0x52   : > { %4662 = vsyncadd (%p4771_p4), %s274_s9, 4294963200  ;;  %p8115_p9 = scmp.eq.s32.totalorder %s4762_s22, 0 }
  0x54   : > { %4664 = dma.done.wait (%p8115_p9), [#allocation6], 20480   ;;  %p8116_p8 = pmov %p8115_p9 }
  0x55   : > { %s3433_s25 = sshll.u32 %s4879_s7, 7 }
  0x56   : > { %4666 = vsyncadd (%p8116_p8), [#allocation6], 4294946816  ;;  %s4895_s29 = scalar_lea.vmem [#allocation7], %s3433_s25 }
  0x57   : > { %4668 = dma.done.wait (%p4771_p4), %s274_s9, 2048  }
  0x58   : > { %4670 = vsyncadd (%p4771_p4), %s274_s9, 4294965248  ;;  %p8117_p12 = pmov %p8116_p8 }
  0x59   : > { %p8118_p5 = pmov %p8116_p8 }
  0x5a   : > { %4672 = dma.done.wait (%p8117_p12), [#allocation6], 2048  }
  0x5b   : > { %4674 = vsyncadd (%p8118_p5), [#allocation6], 4294965248  ;;  %p8119_p1 = pmov %p8118_p5 }
  0x5d   : > { %4676 = dma.done.wait (%p8119_p1), [#allocation10], 4096   ;;  %p8120_p11 = pmov %p8119_p1 }
  0x5e   : > { %v445_v0 = vld [vmem:[#allocation5 + $0x258] sm:$0xff]  ;;  %v446_v1 = vld [vmem:[#allocation5 + $0x260] sm:$0xff]  ;;  %v440_v2 = vld [vmem:[#allocation5 + $0x230] sm:$0xff]  ;;  %s7395_s24 = scalar_lea.vmem [#allocation11], %s3433_s25  ;;  %s3509_s8 = sshll.u32 %s4762_s22, 7 }
  0x5f   : > { %4678 = vsyncadd (%p8120_p11), [#allocation10], 4294963200  ;;  %594 = vmatpush.msra.mxu1 %v445_v0  ;;  %724 = vmatpush.msra.mxu2 %v446_v1  ;;  %v441_v3 = vld [vmem:[#allocation5 + $0x238] sm:$0xff]  ;;  %v435_v4 = vld [vmem:[#allocation5 + $0x208] sm:$0xff]  ;;  %s3291_s27 = scalar_lea.hbm %s8000_s5, %s3509_s8  ;;  %s3292_s15 = sshll.u32 %s7395_s24, 4  ;;  %s3293_s15 = int_to_ptr.vmem [resolvable:$true] %s3292_s15 }
  0x60   : > { %v436_v5 = vld [vmem:[#allocation5 + $0x210] sm:$0xff]  ;;  %v430_v6 = vld [vmem:[#allocation5 + $0x1e0] sm:$0xff]  ;;  %v431_v7 = vld [vmem:[#allocation5 + $0x1e8] sm:$0xff]  ;;  %s3294_s16 = sshll.u32 %s3291_s27, 4  ;;  %s3280_s22 = scalar_lea.sflag [#allocation4], %s4879_s7  ;;  %s3295_s16 = int_to_ptr.hbm [resolvable:$true] %s3294_s16 }
  0x61   : > { %595 = vmatpush.msra.mxu1 %v440_v2  ;;  %725 = vmatpush.msra.mxu2 %v441_v3  ;;  %v425_v8 = vld [vmem:[#allocation5 + $0x1b8] sm:$0xff]  ;;  %v426_v9 = vld [vmem:[#allocation5 + $0x1c0] sm:$0xff]  ;;  %v420_v10 = vld [vmem:[#allocation5 + $0x190] sm:$0xff]  ;;  %s4629_s30 = sshra.s32 %s3295_s16, 4  ;;  %s4635_s13 = scalar_lea.hbm %s8000_s5, 256  ;;  %s4630_s30 = int_to_ptr.hbm [resolvable:$true] %s4629_s30 }
  0x62   : > { %v421_v11 = vld [vmem:[#allocation5 + $0x198] sm:$0xff]  ;;  %v415_v12 = vld [vmem:[#allocation5 + $0x168] sm:$0xff]  ;;  %v416_v13 = vld [vmem:[#allocation5 + $0x170] sm:$0xff]  ;;  %s4631_s23 = scalar_lea.hbm %s4630_s30, 128  ;;  %p4636_p10 = scmp.lt.s32.totalorder %s4630_s30, %s8000_s5 }
  0x63   : > { %596 = vmatpush.msra.mxu1 %v435_v4  ;;  %726 = vmatpush.msra.mxu2 %v436_v5  ;;  %v410_v14 = vld [vmem:[#allocation5 + $0x140] sm:$0xff]  ;;  %v411_v15 = vld [vmem:[#allocation5 + $0x148] sm:$0xff]  ;;  %v405_v16 = vld [vmem:[#allocation5 + $0x118] sm:$0xff]  ;;  %p4632_p4 = scmp.ne.s32.totalorder %s4630_s30, %s4631_s23  ;;  %p4637_p0 = scmp.lt.s32.totalorder %s4635_s13, %s4631_s23 }
  0x64   : > { %v406_v17 = vld [vmem:[#allocation5 + $0x120] sm:$0xff]  ;;  %v400_v18 = vld [vmem:[#allocation5 + $0xf0] sm:$0xff]  ;;  %v401_v19 = vld [vmem:[#allocation5 + $0xf8] sm:$0xff] }
  0x65   : > { %597 = vmatpush.msra.mxu1 %v430_v6  ;;  %727 = vmatpush.msra.mxu2 %v431_v7  ;;  %v395_v20 = vld [vmem:[#allocation5 + $0xc8] sm:$0xff]  ;;  %v396_v21 = vld [vmem:[#allocation5 + $0xd0] sm:$0xff]  ;;  %v390_v22 = vld [vmem:[#allocation5 + $0xa0] sm:$0xff]  ;;  %p4633_p2 = pnand %p4632_p4, %p4814_p7  ;;  %p4638_p3 = por %p4637_p0, %p4636_p10 }
  0x66   : > { %v391_v23 = vld [vmem:[#allocation5 + $0xa8] sm:$0xff]  ;;  %v385_v24 = vld [vmem:[#allocation5 + $0x78] sm:$0xff]  ;;  %v386_v25 = vld [vmem:[#allocation5 + $0x80] sm:$0xff] }
  0x67   : > { %598 = vmatpush.msra.mxu1 %v425_v8  ;;  %728 = vmatpush.msra.mxu2 %v426_v9  ;;  %v380_v26 = vld [vmem:[#allocation5 + $0x50] sm:$0xff]  ;;  %v381_v27 = vld [vmem:[#allocation5 + $0x58] sm:$0xff]  ;;  %v375_v28 = vld [vmem:[#allocation5 + $0x28] sm:$0xff]  ;;  %p4634_p13 = pneg %p4633_p2 }
  0x68   : > { %v376_v29 = vld [vmem:[#allocation5 + $0x30] sm:$0xff]  ;;  %v370_v30 = vld [vmem:[#allocation5] sm:$0xff]  ;;  %v371_v31 = vld [vmem:[#allocation5 + $0x8] sm:$0xff] }
  0x69   : > { %599 = vmatpush.msra.mxu1 %v420_v10  ;;  %729 = vmatpush.msra.mxu2 %v421_v11  ;;  %v4910_v32 = vld [vmem:[%s4882_s11] sm:$0xff]  ;;  %v525_v33 = vld [vmem:[#allocation5 + $0x4d8] sm:$0xff]  ;;  %v520_v34 = vld [vmem:[#allocation5 + $0x4b0] sm:$0xff]  ;;  %p4639_p9 = pnand %p4638_p3, %p4634_p13 }
  0x6a   : > { %v515_v35 = vld [vmem:[#allocation5 + $0x488] sm:$0xff]  ;;  %v510_v36 = vld [vmem:[#allocation5 + $0x460] sm:$0xff]  ;;  %v4915_v37 = vld [vmem:[%s4882_s11 + $0x10] sm:$0xff] }
  0x6b   : > { %600 = vmatpush.msra.mxu1 %v415_v12  ;;  %730 = vmatpush.msra.mxu2 %v416_v13  ;;  %v505_v38 = vld [vmem:[#allocation5 + $0x438] sm:$0xff]  ;;  %v500_v39 = vld [vmem:[#allocation5 + $0x410] sm:$0xff]  ;;  %v4920_v40 = vld [vmem:[%s4882_s11 + $0x20] sm:$0xff] }
  0x6c   : > { %v495_v41 = vld [vmem:[#allocation5 + $0x3e8] sm:$0xff]  ;;  %v4925_v42 = vld [vmem:[%s4882_s11 + $0x30] sm:$0xff]  ;;  %v490_v43 = vld [vmem:[#allocation5 + $0x3c0] sm:$0xff] }
  0x6d   : > { %601 = vmatpush.msra.mxu1 %v410_v14  ;;  %731 = vmatpush.msra.mxu2 %v411_v15  ;;  %v4930_v44 = vld [vmem:[%s4882_s11 + $0x40] sm:$0xff]  ;;  %v485_v45 = vld [vmem:[#allocation5 + $0x398] sm:$0xff]  ;;  %v4935_v47 = vld [vmem:[%s4882_s11 + $0x50] sm:$0xff] }
  0x6e   : > { %v526_v46 = vld [vmem:[#allocation5 + $0x4e0] sm:$0xff]  ;;  %v480_v48 = vld [vmem:[#allocation5 + $0x370] sm:$0xff]  ;;  %v521_v49 = vld [vmem:[#allocation5 + $0x4b8] sm:$0xff] }
  0x6f   : > { %602 = vmatpush.msra.mxu1 %v405_v16  ;;  %732 = vmatpush.msra.mxu2 %v406_v17  ;;  %v516_v50 = vld [vmem:[#allocation5 + $0x490] sm:$0xff]  ;;  %v511_v51 = vld [vmem:[#allocation5 + $0x468] sm:$0xff]  ;;  %v506_v52 = vld [vmem:[#allocation5 + $0x440] sm:$0xff] }
  0x70   : > { %789 = vmatpush.msra.mxu3 %v526_v46  ;;  %v4940_v53 = vld [vmem:[%s4882_s11 + $0x60] sm:$0xff]  ;;  %v475_v54 = vld [vmem:[#allocation5 + $0x348] sm:$0xff]  ;;  %v501_v55 = vld [vmem:[#allocation5 + $0x418] sm:$0xff] }
  0x71   : > { %603 = vmatpush.msra.mxu1 %v400_v18  ;;  %733 = vmatpush.msra.mxu2 %v401_v19  ;;  %v496_v56 = vld [vmem:[#allocation5 + $0x3f0] sm:$0xff]  ;;  %v491_v57 = vld [vmem:[#allocation5 + $0x3c8] sm:$0xff]  ;;  %v486_v58 = vld [vmem:[#allocation5 + $0x3a0] sm:$0xff] }
  0x72   : > { %790 = vmatpush.msra.mxu3 %v521_v49  ;;  %v4945_v59 = vld [vmem:[%s4882_s11 + $0x70] sm:$0xff]  ;;  %v470_v60 = vld [vmem:[#allocation5 + $0x320] sm:$0xff]  ;;  %v481_v61 = vld [vmem:[#allocation5 + $0x378] sm:$0xff] }
  0x73   : > { %604 = vmatpush.msra.mxu1 %v395_v20  ;;  %734 = vmatpush.msra.mxu2 %v396_v21  ;;  %v476_v62 = vld [vmem:[#allocation5 + $0x350] sm:$0xff]  ;;  %v471_v63 = vld [vmem:[#allocation5 + $0x328] sm:$0xff]  ;;  %v466_v0 = vld [vmem:[#allocation5 + $0x300] sm:$0xff] }
  0x74   : > { %791 = vmatpush.msra.mxu3 %v516_v50  ;;  %v4950_v1 = vld [vmem:[%s4882_s11 + $0x80] sm:$0xff]  ;;  %v465_v2 = vld [vmem:[#allocation5 + $0x2f8] sm:$0xff]  ;;  %v447_v4 = vld [vmem:[#allocation5 + $0x268] sm:$0xff] }
  0x75   : > { %605 = vmatpush.msra.mxu1 %v390_v22  ;;  %735 = vmatpush.msra.mxu2 %v391_v23  ;;  %v461_v3 = vld [vmem:[#allocation5 + $0x2d8] sm:$0xff]  ;;  %v456_v5 = vld [vmem:[#allocation5 + $0x2b0] sm:$0xff]  ;;  %v442_v6 = vld [vmem:[#allocation5 + $0x240] sm:$0xff] }
  0x76   : > { %792 = vmatpush.msra.mxu3 %v511_v51  ;;  %v451_v7 = vld [vmem:[#allocation5 + $0x288] sm:$0xff]  ;;  %v437_v8 = vld [vmem:[#allocation5 + $0x218] sm:$0xff]  ;;  %v4958_v10 = vld [vmem:[%s4882_s11 + $0x90] sm:$0xff] }
  0x77   : > { %606 = vmatpush.msra.mxu1 %v385_v24  ;;  %736 = vmatpush.msra.mxu2 %v386_v25  ;;  %v4955_v9 = vld [vmem:[%s4882_s11 + $0x8] sm:$0xff]  ;;  %v432_v11 = vld [vmem:[#allocation5 + $0x1f0] sm:$0xff]  ;;  %v422_v14 = vld [vmem:[#allocation5 + $0x1a0] sm:$0xff] }
  0x78   : > { %793 = vmatpush.msra.mxu3 %v506_v52  ;;  %v460_v12 = vld [vmem:[#allocation5 + $0x2d0] sm:$0xff]  ;;  %v427_v13 = vld [vmem:[#allocation5 + $0x1c8] sm:$0xff]  ;;  %v4964_v15 = vld [vmem:[%s4882_s11 + $0x18] sm:$0xff] }
  0x79   : > { %607 = vmatpush.msra.mxu1 %v380_v26  ;;  %737 = vmatpush.msra.mxu2 %v381_v27  ;;  %v417_v16 = vld [vmem:[#allocation5 + $0x178] sm:$0xff]  ;;  %v4967_v17 = vld [vmem:[%s4882_s11 + $0xa0] sm:$0xff]  ;;  %v412_v18 = vld [vmem:[#allocation5 + $0x150] sm:$0xff] }
  0x7a   : > { %794 = vmatpush.msra.mxu3 %v501_v55  ;;  %v455_v19 = vld [vmem:[#allocation5 + $0x2a8] sm:$0xff]  ;;  %v402_v21 = vld [vmem:[#allocation5 + $0x100] sm:$0xff]  ;;  %v397_v23 = vld [vmem:[#allocation5 + $0xd8] sm:$0xff] }
  0x7b   : > { %608 = vmatpush.msra.mxu1 %v375_v28  ;;  %738 = vmatpush.msra.mxu2 %v376_v29  ;;  %v407_v20 = vld [vmem:[#allocation5 + $0x128] sm:$0xff]  ;;  %v4976_v24 = vld [vmem:[%s4882_s11 + $0xb0] sm:$0xff]  ;;  %v450_v26 = vld [vmem:[#allocation5 + $0x280] sm:$0xff] }
  0x7c   : > { %795 = vmatpush.msra.mxu3 %v496_v56  ;;  %v4973_v22 = vld [vmem:[%s4882_s11 + $0x28] sm:$0xff]  ;;  %v392_v25 = vld [vmem:[#allocation5 + $0xb0] sm:$0xff]  ;;  %v382_v28 = vld [vmem:[#allocation5 + $0x60] sm:$0xff] }
  0x7d   : > { %609 = vmatpush.msra.mxu1 %v370_v30  ;;  %739 = vmatpush.msra.mxu2 %v371_v31  ;;  %v387_v27 = vld [vmem:[#allocation5 + $0x88] sm:$0xff]  ;;  %v377_v29 = vld [vmem:[#allocation5 + $0x38] sm:$0xff]  ;;  %v4982_v30 = vld [vmem:[%s4882_s11 + $0xc0] sm:$0xff] }
  0x7e   : > { %610 = vmatmul.f32.vlgmr.msra.gmra.mxu1 %v4910_v32  ;;  %740 = vmatmul.f32.vlgmr.msra.gmra.mxu2 %v4910_v32  ;;  %v4985_v31 = vld [vmem:[%s4882_s11 + $0x38] sm:$0xff]  ;;  %v5012_v46 = vld [vmem:[%s4882_s11 + $0x68] sm:$0xff]  ;;  %v502_v56 = vld [vmem:[#allocation5 + $0x420] sm:$0xff] }
  0x7f   : > { %659 = vmatpush.msrb.mxu1 %v525_v33  ;;  %796 = vmatpush.msra.mxu3 %v491_v57  ;;  %v372_v33 = vld [vmem:[#allocation5 + $0x10] sm:$0xff]  ;;  %v5020_v50 = vld [vmem:[%s4882_s11 + $0x78] sm:$0xff]  ;;  %v507_v51 = vld [vmem:[#allocation5 + $0x448] sm:$0xff] }
  0x80   : > { %854 = vmatpush.msrb.mxu2 %v447_v4  ;;  %v5030_v55 = vld [vmem:[%s4882_s11 + $0x88] sm:$0xff] }
  0x81   : > { %660 = vmatpush.msrb.mxu1 %v520_v34  ;;  %797 = vmatpush.msra.mxu3 %v486_v58  ;;  %v527_v34 = vld [vmem:[#allocation5 + $0x4e8] sm:$0xff] }
  0x82   : > { %855 = vmatpush.msrb.mxu2 %v442_v6  ;;  %v487_v6 = vld [vmem:[#allocation5 + $0x3a8] sm:$0xff] }
  0x83   : > { %661 = vmatpush.msrb.mxu1 %v515_v35  ;;  %798 = vmatpush.msra.mxu3 %v481_v61  ;;  %v4991_v35 = vld [vmem:[%s4882_s11 + $0xd0] sm:$0xff]  ;;  %v497_v61 = vld [vmem:[#allocation5 + $0x3f8] sm:$0xff] }
  0x84   : > { %856 = vmatpush.msrb.mxu2 %v437_v8 }
  0x85   : > { %662 = vmatpush.msrb.mxu1 %v510_v36  ;;  %799 = vmatpush.msra.mxu3 %v476_v62  ;;  %v4994_v36 = vld [vmem:[%s4882_s11 + $0x48] sm:$0xff] }
  0x86   : > { %613 = vmatmul.f32.gmra.mxu1 %v4915_v37  ;;  %743 = vmatmul.f32.gmra.mxu2 %v4915_v37 }
  0x87   : > { %663 = vmatpush.msrb.mxu1 %v505_v38  ;;  %800 = vmatpush.msra.mxu3 %v471_v63  ;;  %v522_v38 = vld [vmem:[#allocation5 + $0x4c0] sm:$0xff] }
  0x88   : > { %857 = vmatpush.msrb.mxu2 %v432_v11  ;;  %v5070_v11 = vld [vmem:[%s4882_s11 + $0xc8] sm:$0xff] }
  0x89   : > { %664 = vmatpush.msrb.mxu1 %v500_v39  ;;  %801 = vmatpush.msra.mxu3 %v466_v0  ;;  %v5000_v39 = vld [vmem:[%s4882_s11 + $0xe0] sm:$0xff]  ;;  %v5050_v0 = vld [vmem:[%s4882_s11 + $0xa8] sm:$0xff] }
  0x8a   : > { %858 = vmatpush.msrb.mxu2 %v427_v13 }
  0x8b   : > { %665 = vmatpush.msrb.mxu1 %v495_v41  ;;  %802 = vmatpush.msra.mxu3 %v461_v3  ;;  %v5003_v41 = vld [vmem:[%s4882_s11 + $0x58] sm:$0xff] }
  0x8c   : > { %859 = vmatpush.msrb.mxu2 %v422_v14  ;;  %v577_v14 = vld [vmem:[#allocation9 + $0x78] sm:$0xff] }
  0x8d   : > { %666 = vmatpush.msrb.mxu1 %v490_v43  ;;  %803 = vmatpush.msra.mxu3 %v456_v5  ;;  %v517_v43 = vld [vmem:[#allocation5 + $0x498] sm:$0xff] }
  0x8e   : > { %616 = vmatmul.f32.gmra.mxu1 %v4920_v40  ;;  %746 = vmatmul.f32.gmra.mxu2 %v4920_v40  ;;  %v5060_v5 = vld [vmem:[%s4882_s11 + $0xb8] sm:$0xff] }
  0x8f   : > { %667 = vmatpush.msrb.mxu1 %v485_v45  ;;  %804 = vmatpush.msra.mxu3 %v451_v7  ;;  %v5009_v45 = vld [vmem:[%s4882_s11 + $0xf0] sm:$0xff] }
  0x90   : > { %805 = vmatmul.f32.vlgmr.msra.gmra.mxu3 %v4955_v9  ;;  %860 = vmatpush.msrb.mxu2 %v417_v16 }
  0x91   : > { %668 = vmatpush.msrb.mxu1 %v480_v48  ;;  %v512_v48 = vld [vmem:[#allocation5 + $0x470] sm:$0xff]  ;;  %2190 = vmatpush.msra.mxu0 %v577_v14  ;;  %v443_v14 = vld [vmem:[#allocation5 + $0x248] sm:$0xff] }
  0x92   : > { %861 = vmatpush.msrb.mxu2 %v412_v18  ;;  %v5080_v18 = vld [vmem:[%s4882_s11 + $0xd8] sm:$0xff] }
  0x93   : > { %669 = vmatpush.msrb.mxu1 %v475_v54 }
  0x94   : > { %862 = vmatpush.msrb.mxu2 %v407_v20  ;;  %v477_v20 = vld [vmem:[#allocation5 + $0x358] sm:$0xff] }
  0x95   : > { %670 = vmatpush.msrb.mxu1 %v470_v60  ;;  %v5040_v60 = vld [vmem:[%s4882_s11 + $0x98] sm:$0xff] }
  0x96   : > { %619 = vmatmul.f32.gmra.mxu1 %v4925_v42  ;;  %749 = vmatmul.f32.gmra.mxu2 %v4925_v42 }
  0x97   : > { %671 = vmatpush.msrb.mxu1 %v465_v2  ;;  %863 = vmatpush.msrb.mxu2 %v402_v21  ;;  %v492_v2 = vld [vmem:[#allocation5 + $0x3d0] sm:$0xff]  ;;  %v575_v21 = vld [vmem:[#allocation9 + $0x68] sm:$0xff] }
  0x98   : > { %808 = vmatmul.f32.gmra.mxu3 %v4964_v15 }
  0x99   : > { %672 = vmatpush.msrb.mxu1 %v460_v12  ;;  %864 = vmatpush.msrb.mxu2 %v397_v23  ;;  %v482_v12 = vld [vmem:[#allocation5 + $0x380] sm:$0xff] }
  0x9a   : > { %v574_v23 = vld [vmem:[#allocation9 + $0x60] sm:$0xff] }
  0x9b   : > { %673 = vmatpush.msrb.mxu1 %v455_v19  ;;  %865 = vmatpush.msrb.mxu2 %v392_v25  ;;  %v576_v19 = vld [vmem:[#allocation9 + $0x70] sm:$0xff] }
  0x9c   : > { %2191 = vmatpush.msra.mxu0 %v576_v19  ;;  %v566_v19 = vld [vmem:[#allocation9 + $0x20] sm:$0xff] }
  0x9d   : > { %674 = vmatpush.msrb.mxu1 %v450_v26  ;;  %866 = vmatpush.msrb.mxu2 %v387_v27  ;;  %v573_v26 = vld [vmem:[#allocation9 + $0x58] sm:$0xff] }
  0x9e   : > { %622 = vmatmul.f32.gmra.mxu1 %v4930_v44  ;;  %752 = vmatmul.f32.gmra.mxu2 %v4930_v44 }
  0x9f   : > { %867 = vmatpush.msrb.mxu2 %v382_v28  ;;  %919 = vmatpush.msra.mxu1 %v527_v34  ;;  %v5090_v28 = vld [vmem:[%s4882_s11 + $0xe8] sm:$0xff] }
  0xa0   : > { %811 = vmatmul.f32.gmra.mxu3 %v4973_v22  ;;  %2192 = vmatpush.msra.mxu0 %v575_v21  ;;  %v571_v34 = vld [vmem:[#allocation9 + $0x48] sm:$0xff]  ;;  %v438_v21 = vld [vmem:[#allocation5 + $0x220] sm:$0xff] }
  0xa1   : > { %868 = vmatpush.msrb.mxu2 %v377_v29  ;;  %920 = vmatpush.msra.mxu1 %v522_v38  ;;  %v572_v29 = vld [vmem:[#allocation9 + $0x50] sm:$0xff]  ;;  %v570_v38 = vld [vmem:[#allocation9 + $0x40] sm:$0xff] }
  0xa2   : > { %2193 = vmatpush.msra.mxu0 %v574_v23  ;;  %v565_v23 = vld [vmem:[#allocation9 + $0x18] sm:$0xff] }
  0xa3   : > { %869 = vmatpush.msrb.mxu2 %v372_v33  ;;  %921 = vmatpush.msra.mxu1 %v517_v43  ;;  %v472_v33 = vld [vmem:[#allocation5 + $0x330] sm:$0xff] }
  0xa4   : > { %2194 = vmatpush.msra.mxu0 %v573_v26 }
  0xa5   : > { %922 = vmatpush.msra.mxu1 %v512_v48  ;;  %v569_v48 = vld [vmem:[#allocation9 + $0x38] sm:$0xff] }
  0xa6   : > { %625 = vmatmul.f32.gmra.mxu1 %v4935_v47  ;;  %755 = vmatmul.f32.gmra.mxu2 %v4935_v47 }
  0xa7   : > { %923 = vmatpush.msra.mxu1 %v507_v51  ;;  %2195 = vmatpush.msra.mxu0 %v572_v29  ;;  %v528_v29 = vld [vmem:[#allocation5 + $0x4f0] sm:$0xff] }
  0xa8   : > { %814 = vmatmul.f32.gmra.mxu3 %v4985_v31 }
  0xa9   : > { %924 = vmatpush.msra.mxu1 %v502_v56  ;;  %2196 = vmatpush.msra.mxu0 %v571_v34  ;;  %v5100_v56 = vld [vmem:[%s4882_s11 + $0xf8] sm:$0xff]  ;;  %v564_v34 = vld [vmem:[#allocation9 + $0x10] sm:$0xff] }
  0xaa   : > { %1049 = vmatpush.msrb.mxu3 %v528_v29  ;;  %v518_v29 = vld [vmem:[#allocation5 + $0x4a0] sm:$0xff] }
  0xab   : > { %925 = vmatpush.msra.mxu1 %v497_v61  ;;  %2197 = vmatpush.msra.mxu0 %v570_v38  ;;  %v568_v61 = vld [vmem:[#allocation9 + $0x30] sm:$0xff]  ;;  %v462_v38 = vld [vmem:[#allocation5 + $0x2e0] sm:$0xff] }
  0xad   : > { %926 = vmatpush.msra.mxu1 %v492_v2  ;;  %2198 = vmatpush.msra.mxu0 %v569_v48  ;;  %v467_v2 = vld [vmem:[#allocation5 + $0x308] sm:$0xff]  ;;  %v428_v48 = vld [vmem:[#allocation5 + $0x1d0] sm:$0xff] }
  0xae   : > { %628 = vmatmul.f32.gmra.mxu1 %v4940_v53  ;;  %758 = vmatmul.f32.gmra.mxu2 %v4940_v53 }
  0xaf   : > { %927 = vmatpush.msra.mxu1 %v487_v6  ;;  %2199 = vmatpush.msra.mxu0 %v568_v61  ;;  %v448_v6 = vld [vmem:[#allocation5 + $0x270] sm:$0xff]  ;;  %v563_v61 = vld [vmem:[#allocation9 + $0x8] sm:$0xff] }
  0xb0   : > { %817 = vmatmul.f32.gmra.mxu3 %v4994_v36  ;;  %984 = vmatpush.msra.mxu2 %v448_v6  ;;  %v423_v6 = vld [vmem:[#allocation5 + $0x1a8] sm:$0xff] }
  0xb1   : > { %928 = vmatpush.msra.mxu1 %v482_v12  ;;  %v567_v12 = vld [vmem:[#allocation9 + $0x28] sm:$0xff] }
  0xb2   : > { %2200 = vmatpush.msra.mxu0 %v567_v12  ;;  %985 = vmatpush.msra.mxu2 %v443_v14  ;;  %v523_v12 = vld [vmem:[#allocation5 + $0x4c8] sm:$0xff]  ;;  %v562_v14 = vld [vmem:[#allocation9] sm:$0xff] }
  0xb3   : > { %929 = vmatpush.msra.mxu1 %v477_v20  ;;  %1050 = vmatpush.msrb.mxu3 %v523_v12  ;;  %v503_v12 = vld [vmem:[#allocation5 + $0x428] sm:$0xff] }
  0xb4   : > { %2201 = vmatpush.msra.mxu0 %v566_v19  ;;  %986 = vmatpush.msra.mxu2 %v438_v21 }
  0xb5   : > { %930 = vmatpush.msra.mxu1 %v472_v33  ;;  %v433_v33 = vld [vmem:[#allocation5 + $0x1f8] sm:$0xff]  ;;  %1051 = vmatpush.msrb.mxu3 %v518_v29 }
  0xb6   : > { %631 = vmatmul.f32.gmra.mxu1 %v4945_v59  ;;  %761 = vmatmul.f32.gmra.mxu2 %v4945_v59 }
  0xb7   : > { %931 = vmatpush.msra.mxu1 %v467_v2  ;;  %2202 = vmatpush.msra.mxu0 %v565_v23  ;;  %v418_v23 = vld [vmem:[#allocation5 + $0x180] sm:$0xff] }
  0xb8   : > { %820 = vmatmul.f32.gmra.mxu3 %v5003_v41  ;;  %987 = vmatpush.msra.mxu2 %v433_v33 }
  0xb9   : > { %2203 = vmatpush.msra.mxu0 %v564_v34  ;;  %932 = vmatpush.msra.mxu1 %v462_v38  ;;  %v513_v34 = vld [vmem:[#allocation5 + $0x478] sm:$0xff] }
  0xba   : > { %988 = vmatpush.msra.mxu2 %v428_v48  ;;  %v413_v38 = vld [vmem:[#allocation5 + $0x158] sm:$0xff]  ;;  %1052 = vmatpush.msrb.mxu3 %v513_v34  ;;  %v408_v48 = vld [vmem:[#allocation5 + $0x130] sm:$0xff]  ;;  %v498_v34 = vld [vmem:[#allocation5 + $0x400] sm:$0xff] }
  0xbb   : > { %2204 = vmatpush.msra.mxu0 %v563_v61  ;;  %v508_v61 = vld [vmem:[#allocation5 + $0x450] sm:$0xff] }
  0xbc   : > { %989 = vmatpush.msra.mxu2 %v423_v6  ;;  %1053 = vmatpush.msrb.mxu3 %v508_v61  ;;  %v403_v6 = vld [vmem:[#allocation5 + $0x108] sm:$0xff]  ;;  %v388_v61 = vld [vmem:[#allocation5 + $0x90] sm:$0xff] }
  0xbd   : > { %2205 = vmatpush.msra.mxu0 %v562_v14 }
  0xbe   : > { %634 = vmatmul.f32.gmra.mxu1 %v4950_v1  ;;  %764 = vmatmul.f32.gmra.mxu2 %v4950_v1 }
  0xbf   : > { %990 = vmatpush.msra.mxu2 %v418_v23  ;;  %1054 = vmatpush.msrb.mxu3 %v503_v12  ;;  %v398_v23 = vld [vmem:[#allocation5 + $0xe0] sm:$0xff]  ;;  %v383_v12 = vld [vmem:[#allocation5 + $0x68] sm:$0xff] }
  0xc0   : > { %823 = vmatmul.f32.gmra.mxu3 %v5012_v46 }
  0xc1   : > { %991 = vmatpush.msra.mxu2 %v413_v38  ;;  %1055 = vmatpush.msrb.mxu3 %v498_v34  ;;  %v393_v38 = vld [vmem:[#allocation5 + $0xb8] sm:$0xff] }
  0xc3   : > { %992 = vmatpush.msra.mxu2 %v408_v48 }
  0xc5   : > { %993 = vmatpush.msra.mxu2 %v403_v6 }
  0xc6   : > { %637 = vmatmul.f32.gmra.mxu1 %v4958_v10  ;;  %767 = vmatmul.f32.gmra.mxu2 %v4958_v10 }
  0xc7   : > { %994 = vmatpush.msra.mxu2 %v398_v23  ;;  %v378_v23 = vld [vmem:[#allocation5 + $0x40] sm:$0xff] }
  0xc8   : > { %826 = vmatmul.f32.gmra.mxu3 %v5020_v50 }
  0xc9   : > { %995 = vmatpush.msra.mxu2 %v393_v38  ;;  %v373_v38 = vld [vmem:[#allocation5 + $0x18] sm:$0xff] }
  0xcb   : > { %996 = vmatpush.msra.mxu2 %v388_v61  ;;  %v463_v61 = vld [vmem:[#allocation5 + $0x2e8] sm:$0xff] }
  0xcd   : > { %997 = vmatpush.msra.mxu2 %v383_v12 }
  0xce   : > { %640 = vmatmul.f32.gmra.mxu1 %v4967_v17  ;;  %770 = vmatmul.f32.gmra.mxu2 %v4967_v17 }
  0xcf   : > { %998 = vmatpush.msra.mxu2 %v378_v23 }
  0xd0   : > { %829 = vmatmul.f32.gmra.mxu3 %v5030_v55 }
  0xd1   : > { %999 = vmatpush.msra.mxu2 %v373_v38 }
  0xd6   : > { %643 = vmatmul.f32.gmra.mxu1 %v4976_v24  ;;  %773 = vmatmul.f32.gmra.mxu2 %v4976_v24 }
  0xd8   : > { %832 = vmatmul.f32.gmra.mxu3 %v5040_v60 }
  0xde   : > { %646 = vmatmul.f32.gmra.mxu1 %v4982_v30  ;;  %776 = vmatmul.f32.gmra.mxu2 %v4982_v30 }
  0xe0   : > { %835 = vmatmul.f32.gmra.mxu3 %v5050_v0 }
  0xe6   : > { %649 = vmatmul.f32.gmra.mxu1 %v4991_v35  ;;  %779 = vmatmul.f32.gmra.mxu2 %v4991_v35 }
  0xe8   : > { %838 = vmatmul.f32.gmra.mxu3 %v5060_v5 }
  0xee   : > { %652 = vmatmul.f32.gmra.mxu1 %v5000_v39  ;;  %782 = vmatmul.f32.gmra.mxu2 %v5000_v39 }
  0xf0   : > { %841 = vmatmul.f32.gmra.mxu3 %v5070_v11 }
  0xf6   : > { %655 = vmatmul.f32.gmra.mxu1 %v5009_v45  ;;  %785 = vmatmul.f32.gmra.mxu2 %v5009_v45 }
  0xf8   : > { %844 = vmatmul.f32.gmra.mxu3 %v5080_v18 }
  0xfb   : > { %v5017_v49 = vpop.f32.mrf.mxu1 }
  0xfe   : > { %675 = vmatmul.f32.vlgmr.msrb.gmra.mxu1 %v4955_v9  ;;  %870 = vmatmul.f32.vlgmr.msrb.gmra.mxu2 %v4910_v32 }
 0x100   : > { %847 = vmatmul.f32.gmra.mxu3 %v5090_v28 }
 0x101   : > { %v5025_v52 = vpop.f32.mrf.mxu2 }
 0x103   : > { %v5027_v54 = vpop.f32.mrf.mxu1 }
 0x106   : > { %678 = vmatmul.f32.gmra.mxu1 %v4964_v15  ;;  %873 = vmatmul.f32.gmra.mxu2 %v4915_v37 }
 0x108   : > { %850 = vmatmul.f32.gmra.mxu3 %v5100_v56 }
 0x109   : > { %v5035_v57 = vpop.f32.mrf.mxu2 }
 0x10b   : > { %v5037_v58 = vpop.f32.mrf.mxu1 }
 0x10e   : > { %681 = vmatmul.f32.gmra.mxu1 %v4973_v22  ;;  %876 = vmatmul.f32.gmra.mxu2 %v4920_v40 }
 0x111   : > { %v5045_v62 = vpop.f32.mrf.mxu2 }
 0x113   : > { %v5047_v63 = vpop.f32.mrf.mxu1  ;;  %v806_v2 = vpop.f32.mrf.mxu3 }
 0x114   : > { %v5112_v19 = vadd.f32 %v806_v2, %v5025_v52  ;;  %v457_v52 = vld [vmem:[#allocation5 + $0x2b8] sm:$0xff] }
 0x115   : > { %933 = vmatpush.msra.mxu1 %v457_v52  ;;  %v493_v52 = vld [vmem:[#allocation5 + $0x3d8] sm:$0xff] }
 0x116   : > { %684 = vmatmul.f32.gmra.mxu1 %v4985_v31  ;;  %879 = vmatmul.f32.gmra.mxu2 %v4925_v42  ;;  %8121 = vst [vmem:[#allocation22_spill] sm:$0xff] %v5112_v19 }
 0x117   : > { %2206 = vmatmul.f32.vlgmr.msra.gmra.mxu0 %v5112_v19  ;;  %1056 = vmatpush.msrb.mxu3 %v493_v52  ;;  %v473_v52 = vld [vmem:[#allocation5 + $0x338] sm:$0xff] }
 0x119   : > { %v5055_v3 = vpop.f32.mrf.mxu2 }
 0x11b   : > { %v5057_v4 = vpop.f32.mrf.mxu1  ;;  %v809_v2 = vpop.f32.mrf.mxu3 }
 0x11c   : > { %v5122_v14 = vadd.f32 %v809_v2, %v5035_v57  ;;  %v452_v57 = vld [vmem:[#allocation5 + $0x290] sm:$0xff] }
 0x11d   : > { %v488_v2 = vld [vmem:[#allocation5 + $0x3b0] sm:$0xff]  ;;  %934 = vmatpush.msra.mxu1 %v452_v57 }
 0x11e   : > { %687 = vmatmul.f32.gmra.mxu1 %v4994_v36  ;;  %882 = vmatmul.f32.gmra.mxu2 %v4930_v44  ;;  %8123 = vst [vmem:[#allocation24_spill] sm:$0xff] %v5122_v14 }
 0x11f   : > { %2209 = vmatmul.f32.gmra.mxu0 %v5122_v14  ;;  %1057 = vmatpush.msrb.mxu3 %v488_v2  ;;  %v478_v14 = vld [vmem:[#allocation5 + $0x360] sm:$0xff] }
 0x121   : > { %v5065_v7 = vpop.f32.mrf.mxu2 }
 0x123   : > { %v5067_v8 = vpop.f32.mrf.mxu1  ;;  %v812_v48 = vpop.f32.mrf.mxu3 }
 0x124   : > { %v5132_v6 = vadd.f32 %v812_v48, %v5045_v62  ;;  %v468_v62 = vld [vmem:[#allocation5 + $0x310] sm:$0xff] }
 0x126   : > { %690 = vmatmul.f32.gmra.mxu1 %v5003_v41  ;;  %885 = vmatmul.f32.gmra.mxu2 %v4935_v47  ;;  %8125 = vst [vmem:[#allocation26_spill] sm:$0xff] %v5132_v6 }
 0x127   : > { %2212 = vmatmul.f32.gmra.mxu0 %v5132_v6 }
 0x129   : > { %v5075_v13 = vpop.f32.mrf.mxu2 }
 0x12b   : > { %v5077_v16 = vpop.f32.mrf.mxu1  ;;  %v815_v57 = vpop.f32.mrf.mxu3 }
 0x12c   : > { %v5142_v2 = vadd.f32 %v815_v57, %v5055_v3 }
 0x12e   : > { %693 = vmatmul.f32.gmra.mxu1 %v5012_v46  ;;  %888 = vmatmul.f32.gmra.mxu2 %v4940_v53  ;;  %8126 = vst [vmem:[#allocation27_spill] sm:$0xff] %v5142_v2 }
 0x12f   : > { %2215 = vmatmul.f32.gmra.mxu0 %v5142_v2  ;;  %v533_v2 = vld [vmem:[%s4895_s29 + $0x18] sm:$0xff] }
 0x131   : > { %v5085_v25 = vpop.f32.mrf.mxu2 }
 0x133   : > { %v5087_v27 = vpop.f32.mrf.mxu1  ;;  %v818_v23 = vpop.f32.mrf.mxu3 }
 0x134   : > { %v5153_v3 = vadd.f32 %v818_v23, %v5065_v7 }
 0x136   : > { %696 = vmatmul.f32.gmra.mxu1 %v5020_v50  ;;  %891 = vmatmul.f32.gmra.mxu2 %v4945_v59  ;;  %8127 = vst [vmem:[#allocation28_spill] sm:$0xff] %v5153_v3 }
 0x137   : > { %2218 = vmatmul.f32.gmra.mxu0 %v5153_v3 }
 0x139   : > { %v5095_v43 = vpop.f32.mrf.mxu2 }
 0x13b   : > { %v5097_v51 = vpop.f32.mrf.mxu1 }
 0x13e   : > { %699 = vmatmul.f32.gmra.mxu1 %v5030_v55  ;;  %894 = vmatmul.f32.gmra.mxu2 %v4950_v1 }
 0x141   : > { %v5105_v20 = vpop.f32.mrf.mxu2 }
 0x143   : > { %v5107_v26 = vpop.f32.mrf.mxu1 }
 0x146   : > { %702 = vmatmul.f32.gmra.mxu1 %v5040_v60  ;;  %897 = vmatmul.f32.gmra.mxu2 %v4958_v10 }
 0x149   : > { %v5114_v21 = vpop.f32.mrf.mxu2 }
 0x14b   : > { %v5116_v33 = vpop.f32.mrf.mxu1 }
 0x14c   : > { %8122 = vst [vmem:[#allocation23_spill] sm:$0xff] %v5116_v33 }
 0x14e   : > { %705 = vmatmul.f32.gmra.mxu1 %v5050_v0  ;;  %900 = vmatmul.f32.gmra.mxu2 %v4967_v17 }
 0x151   : > { %v5124_v29 = vpop.f32.mrf.mxu2 }
 0x153   : > { %v5126_v19 = vpop.f32.mrf.mxu1 }
 0x154   : > { %8124 = vst [vmem:[#allocation25_spill] sm:$0xff] %v5126_v19  ;;  %v483_v19 = vld [vmem:[#allocation5 + $0x388] sm:$0xff] }
 0x155   : > { %1058 = vmatpush.msrb.mxu3 %v483_v19  ;;  %v458_v19 = vld [vmem:[#allocation5 + $0x2c0] sm:$0xff] }
 0x156   : > { %708 = vmatmul.f32.gmra.mxu1 %v5060_v5  ;;  %903 = vmatmul.f32.gmra.mxu2 %v4976_v24 }
 0x157   : > { %1059 = vmatpush.msrb.mxu3 %v478_v14  ;;  %v453_v14 = vld [vmem:[#allocation5 + $0x298] sm:$0xff] }
 0x159   : > { %v5134_v34 = vpop.f32.mrf.mxu2  ;;  %1060 = vmatpush.msrb.mxu3 %v473_v52 }
 0x15b   : > { %v5136_v33 = vpop.f32.mrf.mxu1  ;;  %1061 = vmatpush.msrb.mxu3 %v468_v62  ;;  %v821_v62 = vpop.f32.mrf.mxu3 }
 0x15c   : > { %v5164_v57 = vadd.f32 %v821_v62, %v5075_v13 }
 0x15d   : > { %1062 = vmatpush.msrb.mxu3 %v463_v61 }
 0x15e   : > { %711 = vmatmul.f32.gmra.mxu1 %v5070_v11  ;;  %906 = vmatmul.f32.gmra.mxu2 %v4982_v30  ;;  %8128 = vst [vmem:[#allocation29_spill] sm:$0xff] %v5164_v57 }
 0x15f   : > { %1063 = vmatpush.msrb.mxu3 %v458_v19  ;;  %2221 = vmatmul.f32.gmra.mxu0 %v5164_v57 }
 0x161   : > { %v5144_v48 = vpop.f32.mrf.mxu2  ;;  %1064 = vmatpush.msrb.mxu3 %v453_v14 }
 0x162   : > { %1065 = vmatmul.f32.vlgmr.msrb.gmra.mxu3 %v4955_v9 }
 0x163   : > { %v5146_v12 = vpop.f32.mrf.mxu1  ;;  %v824_v19 = vpop.f32.mrf.mxu3 }
 0x164   : > { %v5175_v14 = vadd.f32 %v824_v19, %v5085_v25 }
 0x166   : > { %714 = vmatmul.f32.gmra.mxu1 %v5080_v18  ;;  %909 = vmatmul.f32.gmra.mxu2 %v4991_v35  ;;  %8129 = vst [vmem:[#allocation30_spill] sm:$0xff] %v5175_v14 }
 0x167   : > { %2224 = vmatmul.f32.gmra.mxu0 %v5175_v14 }
 0x169   : > { %v5155_v38 = vpop.f32.mrf.mxu2 }
 0x16a   : > { %1068 = vmatmul.f32.gmra.mxu3 %v4964_v15 }
 0x16b   : > { %v5157_v52 = vpop.f32.mrf.mxu1  ;;  %v827_v62 = vpop.f32.mrf.mxu3 }
 0x16c   : > { %v5186_v57 = vadd.f32 %v827_v62, %v5095_v43 }
 0x16e   : > { %717 = vmatmul.f32.gmra.mxu1 %v5090_v28  ;;  %912 = vmatmul.f32.gmra.mxu2 %v5000_v39  ;;  %8130 = vst [vmem:[#allocation31_spill] sm:$0xff] %v5186_v57 }
 0x16f   : > { %2227 = vmatmul.f32.gmra.mxu0 %v5186_v57 }
 0x171   : > { %v5166_v61 = vpop.f32.mrf.mxu2 }
 0x172   : > { %1071 = vmatmul.f32.gmra.mxu3 %v4973_v22 }
 0x173   : > { %v5168_v7 = vpop.f32.mrf.mxu1  ;;  %v830_v19 = vpop.f32.mrf.mxu3 }
 0x176   : > { %720 = vmatmul.f32.gmra.mxu1 %v5100_v56  ;;  %915 = vmatmul.f32.gmra.mxu2 %v5009_v45 }
 0x179   : > { %v5177_v23 = vpop.f32.mrf.mxu2 }
 0x17a   : > { %1074 = vmatmul.f32.gmra.mxu3 %v4985_v31 }
 0x17b   : > { %v5179_v13 = vpop.f32.mrf.mxu1  ;;  %v833_v62 = vpop.f32.mrf.mxu3 }
 0x17e   : > { %935 = vmatmul.f32.vlgmr.msra.gmra.mxu1 %v4955_v9  ;;  %1000 = vmatmul.f32.vlgmr.msra.gmra.mxu2 %v4910_v32  ;;  %v5197_v32 = vadd.f32 %v830_v19, %v5105_v20 }
 0x180   : > { %8131 = vst [vmem:[#allocation32_spill] sm:$0xff] %v5197_v32  ;;  %2230 = vmatmul.f32.gmra.mxu0 %v5197_v32 }
 0x181   : > { %v5188_v3 = vpop.f32.mrf.mxu2 }
 0x182   : > { %1077 = vmatmul.f32.gmra.mxu3 %v4994_v36 }
 0x183   : > { %v5190_v25 = vpop.f32.mrf.mxu1  ;;  %v836_v19 = vpop.f32.mrf.mxu3 }
 0x186   : > { %938 = vmatmul.f32.gmra.mxu1 %v4964_v15  ;;  %1003 = vmatmul.f32.gmra.mxu2 %v4915_v37  ;;  %v5208_v37 = vadd.f32 %v833_v62, %v5114_v21 }
 0x188   : > { %8132 = vst [vmem:[#allocation33_spill] sm:$0xff] %v5208_v37  ;;  %2233 = vmatmul.f32.gmra.mxu0 %v5208_v37 }
 0x189   : > { %v5199_v9 = vpop.f32.mrf.mxu2 }
 0x18a   : > { %1080 = vmatmul.f32.gmra.mxu3 %v5003_v41 }
 0x18b   : > { %v5201_v43 = vpop.f32.mrf.mxu1  ;;  %v839_v62 = vpop.f32.mrf.mxu3 }
 0x18e   : > { %941 = vmatmul.f32.gmra.mxu1 %v4973_v22  ;;  %1006 = vmatmul.f32.gmra.mxu2 %v4920_v40  ;;  %v5219_v40 = vadd.f32 %v836_v19, %v5124_v29 }
 0x190   : > { %8133 = vst [vmem:[#allocation34_spill] sm:$0xff] %v5219_v40  ;;  %2236 = vmatmul.f32.gmra.mxu0 %v5219_v40 }
 0x191   : > { %v5210_v15 = vpop.f32.mrf.mxu2 }
 0x192   : > { %1083 = vmatmul.f32.gmra.mxu3 %v5012_v46 }
 0x193   : > { %v5212_v20 = vpop.f32.mrf.mxu1  ;;  %v842_v19 = vpop.f32.mrf.mxu3 }
 0x196   : > { %944 = vmatmul.f32.gmra.mxu1 %v4985_v31  ;;  %1009 = vmatmul.f32.gmra.mxu2 %v4925_v42  ;;  %v5230_v42 = vadd.f32 %v839_v62, %v5134_v34 }
 0x198   : > { %8134 = vst [vmem:[#allocation35_spill] sm:$0xff] %v5230_v42  ;;  %2239 = vmatmul.f32.gmra.mxu0 %v5230_v42 }
 0x199   : > { %v5221_v22 = vpop.f32.mrf.mxu2 }
 0x19a   : > { %1086 = vmatmul.f32.gmra.mxu3 %v5020_v50 }
 0x19b   : > { %v5223_v21 = vpop.f32.mrf.mxu1  ;;  %v845_v62 = vpop.f32.mrf.mxu3 }
 0x19e   : > { %947 = vmatmul.f32.gmra.mxu1 %v4994_v36  ;;  %1012 = vmatmul.f32.gmra.mxu2 %v4930_v44  ;;  %v5241_v44 = vadd.f32 %v842_v19, %v5144_v48 }
 0x1a0   : > { %8135 = vst [vmem:[#allocation36_spill] sm:$0xff] %v5241_v44  ;;  %2242 = vmatmul.f32.gmra.mxu0 %v5241_v44 }
 0x1a1   : > { %v5232_v31 = vpop.f32.mrf.mxu2 }
 0x1a2   : > { %1089 = vmatmul.f32.gmra.mxu3 %v5030_v55 }
 0x1a3   : > { %v5234_v29 = vpop.f32.mrf.mxu1  ;;  %v848_v19 = vpop.f32.mrf.mxu3 }
 0x1a6   : > { %950 = vmatmul.f32.gmra.mxu1 %v5003_v41  ;;  %1015 = vmatmul.f32.gmra.mxu2 %v4935_v47  ;;  %v5252_v47 = vadd.f32 %v845_v62, %v5155_v38  ;;  %v561_v62 = vld [vmem:[#allocation8 + $0x78] sm:$0xff] }
 0x1a7   : > { %1292 = vmatpush.msrb.mxu2 %v561_v62  ;;  %v557_v62 = vld [vmem:[#allocation8 + $0x58] sm:$0xff] }
 0x1a8   : > { %8136 = vst [vmem:[#allocation37_spill] sm:$0xff] %v5252_v47  ;;  %2245 = vmatmul.f32.gmra.mxu0 %v5252_v47 }
 0x1a9   : > { %v5243_v36 = vpop.f32.mrf.mxu2 }
 0x1aa   : > { %1092 = vmatmul.f32.gmra.mxu3 %v5040_v60 }
 0x1ab   : > { %v5245_v34 = vpop.f32.mrf.mxu1 }
 0x1ae   : > { %953 = vmatmul.f32.gmra.mxu1 %v5012_v46  ;;  %1018 = vmatmul.f32.gmra.mxu2 %v4940_v53  ;;  %v5263_v53 = vadd.f32 %v848_v19, %v5166_v61  ;;  %v559_v19 = vld [vmem:[#allocation8 + $0x68] sm:$0xff] }
 0x1b0   : > { %8137 = vst [vmem:[#allocation38_spill] sm:$0xff] %v5263_v53  ;;  %2248 = vmatmul.f32.gmra.mxu0 %v5263_v53 }
 0x1b1   : > { %v5254_v41 = vpop.f32.mrf.mxu2 }
 0x1b2   : > { %1095 = vmatmul.f32.gmra.mxu3 %v5050_v0 }
 0x1b3   : > { %v5256_v48 = vpop.f32.mrf.mxu1 }
 0x1b6   : > { %956 = vmatmul.f32.gmra.mxu1 %v5020_v50  ;;  %1021 = vmatmul.f32.gmra.mxu2 %v4945_v59  ;;  %v851_v50 = vpop.f32.mrf.mxu3  ;;  %v560_v59 = vld [vmem:[#allocation8 + $0x70] sm:$0xff] }
 0x1b7   : > { %v5274_v47 = vadd.f32 %v851_v50, %v5177_v23  ;;  %1293 = vmatpush.msrb.mxu2 %v560_v59  ;;  %v444_v23 = vld [vmem:[#allocation5 + $0x250] sm:$0xff] }
 0x1b8   : > { %v556_v50 = vld [vmem:[#allocation8 + $0x50] sm:$0xff] }
 0x1b9   : > { %v5265_v46 = vpop.f32.mrf.mxu2  ;;  %8138 = vst [vmem:[#allocation39_spill] sm:$0xff] %v5274_v47  ;;  %1294 = vmatpush.msrb.mxu2 %v559_v19  ;;  %2251 = vmatmul.f32.gmra.mxu0 %v5274_v47  ;;  %v529_v19 = vld [vmem:[#allocation5 + $0x4f8] sm:$0xff]  ;;  %v439_v47 = vld [vmem:[#allocation5 + $0x228] sm:$0xff] }
 0x1ba   : > { %1098 = vmatmul.f32.gmra.mxu3 %v5060_v5  ;;  %1179 = vmatpush.msrb.mxu1 %v529_v19 }
 0x1bb   : > { %v5267_v38 = vpop.f32.mrf.mxu1 }
 0x1be   : > { %959 = vmatmul.f32.gmra.mxu1 %v5030_v55  ;;  %1024 = vmatmul.f32.gmra.mxu2 %v4950_v1  ;;  %v558_v55 = vld [vmem:[#allocation8 + $0x60] sm:$0xff]  ;;  %v449_v1 = vld [vmem:[#allocation5 + $0x278] sm:$0xff] }
 0x1bf   : > { %1295 = vmatpush.msrb.mxu2 %v558_v55  ;;  %1114 = vmatpush.msra.mxu3 %v449_v1  ;;  %v555_v55 = vld [vmem:[#allocation8 + $0x48] sm:$0xff]  ;;  %v429_v1 = vld [vmem:[#allocation5 + $0x1d8] sm:$0xff] }
 0x1c1   : > { %v5276_v61 = vpop.f32.mrf.mxu2  ;;  %1296 = vmatpush.msrb.mxu2 %v557_v62  ;;  %1115 = vmatpush.msra.mxu3 %v444_v23  ;;  %v553_v62 = vld [vmem:[#allocation8 + $0x38] sm:$0xff]  ;;  %v424_v23 = vld [vmem:[#allocation5 + $0x1b0] sm:$0xff] }
 0x1c2   : > { %1101 = vmatmul.f32.gmra.mxu3 %v5070_v11 }
 0x1c3   : > { %v5278_v44 = vpop.f32.mrf.mxu1  ;;  %1297 = vmatpush.msrb.mxu2 %v556_v50  ;;  %1116 = vmatpush.msra.mxu3 %v439_v47  ;;  %v552_v50 = vld [vmem:[#allocation8 + $0x30] sm:$0xff] }
 0x1c4   : > { %v524_v47 = vld [vmem:[#allocation5 + $0x4d0] sm:$0xff] }
 0x1c5   : > { %1298 = vmatpush.msrb.mxu2 %v555_v55  ;;  %1180 = vmatpush.msrb.mxu1 %v524_v47  ;;  %v419_v55 = vld [vmem:[#allocation5 + $0x188] sm:$0xff] }
 0x1c6   : > { %962 = vmatmul.f32.gmra.mxu1 %v5040_v60  ;;  %1027 = vmatmul.f32.gmra.mxu2 %v4958_v10  ;;  %v434_v10 = vld [vmem:[#allocation5 + $0x200] sm:$0xff] }
 0x1c7   : > { %v554_v60 = vld [vmem:[#allocation8 + $0x40] sm:$0xff]  ;;  %1117 = vmatpush.msra.mxu3 %v434_v10  ;;  %v551_v10 = vld [vmem:[#allocation8 + $0x28] sm:$0xff] }
 0x1c8   : > { %1299 = vmatpush.msrb.mxu2 %v554_v60 }
 0x1c9   : > { %v5284_v59 = vpop.f32.mrf.mxu2  ;;  %1118 = vmatpush.msra.mxu3 %v429_v1  ;;  %v409_v1 = vld [vmem:[#allocation5 + $0x138] sm:$0xff] }
 0x1ca   : > { %1300 = vmatpush.msrb.mxu2 %v553_v62  ;;  %1104 = vmatmul.f32.gmra.mxu3 %v5080_v18  ;;  %v549_v62 = vld [vmem:[#allocation8 + $0x18] sm:$0xff] }
 0x1cb   : > { %v5286_v53 = vpop.f32.mrf.mxu1  ;;  %1119 = vmatpush.msra.mxu3 %v424_v23  ;;  %v404_v23 = vld [vmem:[#allocation5 + $0x110] sm:$0xff] }
 0x1cc   : > { %1301 = vmatpush.msrb.mxu2 %v552_v50  ;;  %v548_v50 = vld [vmem:[#allocation8 + $0x10] sm:$0xff] }
 0x1cd   : > { %1120 = vmatpush.msra.mxu3 %v419_v55  ;;  %v519_v55 = vld [vmem:[#allocation5 + $0x4a8] sm:$0xff] }
 0x1ce   : > { %965 = vmatmul.f32.gmra.mxu1 %v5050_v0  ;;  %1030 = vmatmul.f32.gmra.mxu2 %v4967_v17  ;;  %v414_v17 = vld [vmem:[#allocation5 + $0x160] sm:$0xff] }
 0x1cf   : > { %1302 = vmatpush.msrb.mxu2 %v551_v10  ;;  %v550_v0 = vld [vmem:[#allocation8 + $0x20] sm:$0xff]  ;;  %1121 = vmatpush.msra.mxu3 %v414_v17  ;;  %v399_v10 = vld [vmem:[#allocation5 + $0xe8] sm:$0xff] }
 0x1d0   : > { %1181 = vmatpush.msrb.mxu1 %v519_v55  ;;  %v547_v17 = vld [vmem:[#allocation8 + $0x8] sm:$0xff] }
 0x1d1   : > { %v5291_v19 = vpop.f32.mrf.mxu2  ;;  %1303 = vmatpush.msrb.mxu2 %v550_v0  ;;  %1122 = vmatpush.msra.mxu3 %v409_v1  ;;  %v389_v1 = vld [vmem:[#allocation5 + $0x98] sm:$0xff]  ;;  %v379_v55 = vld [vmem:[#allocation5 + $0x48] sm:$0xff] }
 0x1d2   : > { %1107 = vmatmul.f32.gmra.mxu3 %v5090_v28 }
 0x1d3   : > { %v5293_v60 = vpop.f32.mrf.mxu1  ;;  %1304 = vmatpush.msrb.mxu2 %v549_v62  ;;  %1123 = vmatpush.msra.mxu3 %v404_v23  ;;  %v384_v62 = vld [vmem:[#allocation5 + $0x70] sm:$0xff] }
 0x1d5   : > { %1305 = vmatpush.msrb.mxu2 %v548_v50  ;;  %1124 = vmatpush.msra.mxu3 %v399_v10  ;;  %v514_v50 = vld [vmem:[#allocation5 + $0x480] sm:$0xff] }
 0x1d6   : > { %968 = vmatmul.f32.gmra.mxu1 %v5060_v5  ;;  %1033 = vmatmul.f32.gmra.mxu2 %v4976_v24  ;;  %v394_v24 = vld [vmem:[#allocation5 + $0xc0] sm:$0xff] }
 0x1d7   : > { %1306 = vmatpush.msrb.mxu2 %v547_v17  ;;  %v546_v5 = vld [vmem:[#allocation8] sm:$0xff]  ;;  %1125 = vmatpush.msra.mxu3 %v394_v24  ;;  %v509_v24 = vld [vmem:[#allocation5 + $0x458] sm:$0xff] }
 0x1d8   : > { %1182 = vmatpush.msrb.mxu1 %v514_v50  ;;  %v374_v17 = vld [vmem:[#allocation5 + $0x20] sm:$0xff]  ;;  %v677_v50 = vadd.f32 %v5179_v13, %v5017_v49  ;;  %v680_v49 = vadd.f32 %v5190_v25, %v5027_v54  ;;  %v683_v25 = vadd.f32 %v5201_v43, %v5037_v58 }
 0x1d9   : > { %v5298_v47 = vpop.f32.mrf.mxu2  ;;  %1307 = vmatpush.msrb.mxu2 %v546_v5  ;;  %1126 = vmatpush.msra.mxu3 %v389_v1  ;;  %v4434_v1 = vld [vmem:[%s4882_s11 + $0x10] sm:$0xff]  ;;  %v4437_v58 = vld [vmem:[%s4882_s11 + $0x40] sm:$0xff] }
 0x1da   : > { %1110 = vmatmul.f32.gmra.mxu3 %v5100_v56  ;;  %1183 = vmatpush.msrb.mxu1 %v509_v24  ;;  %v1246_v37 = vmul.f32 0.9, %v683_v25 }
 0x1db   : > { %v5300_v0 = vpop.f32.mrf.mxu1  ;;  %1127 = vmatpush.msra.mxu3 %v384_v62 }
 0x1dd   : > { %1128 = vmatpush.msra.mxu3 %v379_v55  ;;  %v5325_v55 = vpop.f32.mrf.mxu0 }
 0x1de   : > { %971 = vmatmul.f32.gmra.mxu1 %v5070_v11  ;;  %1036 = vmatmul.f32.gmra.mxu2 %v4982_v30  ;;  %v4433_v30 = vld [vmem:[%s4882_s11] sm:$0xff]  ;;  %8139 = vst [vmem:[#allocation40_spill] sm:$0xff] %v5325_v55 }
 0x1df   : > { %1129 = vmatpush.msra.mxu3 %v374_v17  ;;  %v530_v17 = vld [vmem:[%s4895_s29] sm:$0xff] }
 0x1e1   : > { %v5305_v23 = vpop.f32.mrf.mxu2 }
 0x1e2   : > { %1130 = vmatmul.f32.vlgmr.msra.gmra.mxu3 %v4433_v30  ;;  %v4435_v30 = vld [vmem:[%s4882_s11 + $0x20] sm:$0xff] }
 0x1e3   : > { %v5307_v10 = vpop.f32.mrf.mxu1 }
 0x1e5   : > { %v5339_v40 = vpop.f32.mrf.mxu0 }
 0x1e6   : > { %974 = vmatmul.f32.gmra.mxu1 %v5080_v18  ;;  %1039 = vmatmul.f32.gmra.mxu2 %v4991_v35  ;;  %v504_v18 = vld [vmem:[#allocation5 + $0x430] sm:$0xff]  ;;  %8140 = vst [vmem:[#allocation41_spill] sm:$0xff] %v5339_v40 }
 0x1e7   : > { %1184 = vmatpush.msrb.mxu1 %v504_v18 }
 0x1e9   : > { %v5312_v11 = vpop.f32.mrf.mxu2 }
 0x1ea   : > { %1133 = vmatmul.f32.gmra.mxu3 %v4434_v1  ;;  %v499_v1 = vld [vmem:[#allocation5 + $0x408] sm:$0xff] }
 0x1eb   : > { %v5314_v5 = vpop.f32.mrf.mxu1  ;;  %1185 = vmatpush.msrb.mxu1 %v499_v1 }
 0x1ee   : > { %977 = vmatmul.f32.gmra.mxu1 %v5090_v28  ;;  %1042 = vmatmul.f32.gmra.mxu2 %v5000_v39  ;;  %v1244_v39 = vmul.f32 0.9, %v677_v50  ;;  %v1260_v28 = vmul.f32 0.1, %v530_v17  ;;  %v1245_v50 = vmul.f32 0.9, %v680_v49 }
 0x1ef   : > { %v532_v49 = vld [vmem:[%s4895_s29 + $0x10] sm:$0xff] }
 0x1f0   : > { %v5333_v42 = vadd.f32 %v1260_v28, %v1244_v39  ;;  %v494_v28 = vld [vmem:[#allocation5 + $0x3e0] sm:$0xff]  ;;  %v1262_v32 = vmul.f32 0.1, %v532_v49 }
 0x1f1   : > { %v5319_v62 = vpop.f32.mrf.mxu2  ;;  %1186 = vmatpush.msrb.mxu1 %v494_v28  ;;  %v5360_v28 = vpop.f32.mrf.mxu0 }
 0x1f2   : > { %1136 = vmatmul.f32.gmra.mxu3 %v4435_v30  ;;  %v4436_v30 = vld [vmem:[%s4882_s11 + $0x30] sm:$0xff]  ;;  %8141 = vst [vmem:[#allocation42_spill] sm:$0xff] %v5360_v28  ;;  %v5369_v57 = vadd.f32 %v1262_v32, %v1246_v37  ;;  %v1263_v28 = vmul.f32 0.1, %v533_v2 }
 0x1f3   : > { %v5321_v35 = vpop.f32.mrf.mxu1 }
 0x1f6   : > { %980 = vmatmul.f32.gmra.mxu1 %v5100_v56  ;;  %1045 = vmatmul.f32.gmra.mxu2 %v5009_v45  ;;  %v531_v56 = vld [vmem:[%s4895_s29 + $0x8] sm:$0xff] }
 0x1f7   : > { %v1261_v17 = vmul.f32 0.1, %v531_v56 }
 0x1f9   : > { %v5331_v24 = vpop.f32.mrf.mxu2 }
 0x1fa   : > { %1139 = vmatmul.f32.gmra.mxu3 %v4436_v30 }
 0x1fb   : > { %v936_v18 = vpop.f32.mrf.mxu1 }
 0x1fc   : > { %v937_v13 = vadd.f32 %v936_v18, %v5188_v3  ;;  %v5348_v3 = vpop.f32.mrf.mxu3  ;;  %v5353_v18 = vadd.f32 %v1261_v17, %v1245_v50  ;;  %v489_v50 = vld [vmem:[#allocation5 + $0x3b8] sm:$0xff] }
 0x1fd   : > { %1187 = vmatpush.msrb.mxu1 %v489_v50 }
 0x1fe   : > { %v5341_v45 = vmax.f32 %v937_v13, 1e-16  ;;  %1308 = vmatmul.f32.vlgmr.msrb.gmra.mxu2 %v5333_v42 }
 0x200   : > { %3985 = vrsqrt.f32 %v5341_v45  ;;  %vm1428_vm0 = vcmp.eq.f32.partialorder %v5341_v45, inf  ;;  %vm1430_vm1 = vcmp.eq.f32.partialorder %v5341_v45, 0.0 }
 0x201   : > { %v5346_v39 = vpop.f32.mrf.mxu2 }
 0x202   : > { %1142 = vmatmul.f32.gmra.mxu3 %v4437_v58 }
 0x203   : > { %v939_v54 = vpop.f32.mrf.mxu1 }
 0x204   : > { %v940_v1 = vadd.f32 %v939_v54, %v5199_v9  ;;  %v5371_v49 = vpop.f32.mrf.mxu3 }
 0x206   : > { %v3986_v13 = vpop.eup %3985  ;;  %v5356_v56 = vmax.f32 %v940_v1, 1e-16  ;;  %1311 = vmatmul.f32.gmra.mxu2 %v5353_v18  ;;  %v686_v1 = vadd.f32 %v5212_v20, %v5047_v63  ;;  %v4438_v63 = vld [vmem:[%s4882_s11 + $0x50] sm:$0xff] }
 0x207   : > { %v1422_v30 = vmul.f32 %v3986_v13, %v5341_v45  ;;  %v484_v20 = vld [vmem:[#allocation5 + $0x390] sm:$0xff] }
 0x208   : > { %3987 = vrsqrt.f32 %v5356_v56  ;;  %1188 = vmatpush.msrb.mxu1 %v484_v20  ;;  %v534_v20 = vld [vmem:[%s4895_s29 + $0x20] sm:$0xff]  ;;  %vm1440_vm2 = vcmp.eq.f32.partialorder %v5356_v56, inf  ;;  %vm1442_vm3 = vcmp.eq.f32.partialorder %v5356_v56, 0.0 }
 0x209   : > { %v5364_v9 = vpop.f32.mrf.mxu2  ;;  %v1423_v43 = vmul.f32 %v3986_v13, %v1422_v30 }
 0x20a   : > { %1145 = vmatmul.f32.gmra.mxu3 %v4438_v63 }
 0x20b   : > { %v942_v17 = vpop.f32.mrf.mxu1  ;;  %v1424_v54 = vmul.f32 0.5, %v1423_v43  ;;  %v1247_v43 = vmul.f32 0.9, %v686_v1  ;;  %v689_v1 = vadd.f32 %v5223_v21, %v5057_v4 }
 0x20c   : > { %v943_v25 = vadd.f32 %v942_v17, %v5210_v15  ;;  %v5383_v17 = vpop.f32.mrf.mxu0 }
 0x20d   : > { %v1425_v14 = vsub.f32 1.5, %v1424_v54  ;;  %8142 = vst [vmem:[#allocation43_spill] sm:$0xff] %v5383_v17  ;;  %v1248_v21 = vmul.f32 0.9, %v689_v1 }
 0x20e   : > { %v3988_v58 = vpop.eup %3987  ;;  %v5374_v6 = vmax.f32 %v943_v25, 1e-16  ;;  %1314 = vmatmul.f32.gmra.mxu2 %v5369_v57 }
 0x20f   : > { %v1426_v30 = vmul.f32 %v3986_v13, %v1425_v14  ;;  %v1434_v50 = vmul.f32 %v3988_v58, %v5356_v56  ;;  %v1431_v14 = vand.u32 2147483648, %v5341_v45 }
 0x210   : > { %3989 = vrsqrt.f32 %v5374_v6  ;;  %vm1452_vm4 = vcmp.eq.f32.partialorder %v5374_v6, inf  ;;  %vm1454_vm5 = vcmp.eq.f32.partialorder %v5374_v6, 0.0 }
 0x211   : > { %v5380_v32 = vpop.f32.mrf.mxu2  ;;  %v1427_v37 = vmul.f32 %v1426_v30, %v5341_v45  ;;  %v1435_v15 = vmul.f32 %v3988_v58, %v1434_v50  ;;  %v5394_v50 = vadd.f32 %v1263_v28, %v1247_v43  ;;  %v4439_v28 = vld [vmem:[%s4882_s11 + $0x60] sm:$0xff] }
 0x212   : > { %1148 = vmatmul.f32.gmra.mxu3 %v4439_v28 }
 0x213   : > { %v945_v13 = vpop.f32.mrf.mxu1  ;;  %v1429_v2 = vsel %vm1428_vm0, %v5341_v45, %v1427_v37  ;;  %v1436_v54 = vmul.f32 0.5, %v1435_v15  ;;  %v479_v45 = vld [vmem:[#allocation5 + $0x368] sm:$0xff]  ;;  %v5401_v37 = vpop.f32.mrf.mxu3  ;;  %v1264_v15 = vmul.f32 0.1, %v534_v20  ;;  %v692_v20 = vadd.f32 %v5234_v29, %v5067_v8 }
 0x214   : > { %v946_v25 = vadd.f32 %v945_v13, %v5221_v22  ;;  %v5392_v30 = vsel %vm1430_vm1, %v1431_v14, %v1429_v2  ;;  %1189 = vmatpush.msrb.mxu1 %v479_v45  ;;  %v474_v2 = vld [vmem:[#allocation5 + $0x340] sm:$0xff]  ;;  %v5415_v45 = vpop.f32.mrf.mxu0  ;;  %v459_v29 = vld [vmem:[#allocation5 + $0x2c8] sm:$0xff] }
 0x215   : > { %8143 = vst [vmem:[#allocation44_spill] sm:$0xff] %v5392_v30  ;;  %2254 = vmatmul.f32.gmra.mxu0 %v5392_v30  ;;  %v1437_v63 = vsub.f32 1.5, %v1436_v54  ;;  %v5420_v28 = vadd.f32 %v1264_v15, %v1248_v21  ;;  %v4440_v15 = vld [vmem:[%s4882_s11 + $0x70] sm:$0xff] }
 0x216   : > { %v3990_v17 = vpop.eup %3989  ;;  %v5398_v40 = vmax.f32 %v946_v25, 1e-16  ;;  %1317 = vmatmul.f32.gmra.mxu2 %v5394_v50  ;;  %1190 = vmatpush.msrb.mxu1 %v474_v2  ;;  %8144 = vst [vmem:[#allocation45_spill] sm:$0xff] %v5415_v45  ;;  %v535_v2 = vld [vmem:[%s4895_s29 + $0x28] sm:$0xff] }
 0x217   : > { %v1438_v4 = vmul.f32 %v3988_v58, %v1437_v63  ;;  %v1446_v22 = vmul.f32 %v3990_v17, %v5374_v6  ;;  %v1443_v58 = vand.u32 2147483648, %v5356_v56  ;;  %v469_v63 = vld [vmem:[#allocation5 + $0x318] sm:$0xff]  ;;  %v1265_v21 = vmul.f32 0.1, %v535_v2 }
 0x218   : > { %3991 = vrsqrt.f32 %v5398_v40  ;;  %1191 = vmatpush.msrb.mxu1 %v469_v63  ;;  %vm1464_vm6 = vcmp.eq.f32.partialorder %v5398_v40, inf  ;;  %vm1466_vm7 = vcmp.eq.f32.partialorder %v5398_v40, 0.0 }
 0x219   : > { %v5406_v43 = vpop.f32.mrf.mxu2  ;;  %v1439_v14 = vmul.f32 %v1438_v4, %v5356_v56  ;;  %v1447_v13 = vmul.f32 %v3990_v17, %v1446_v22 }
 0x21a   : > { %1151 = vmatmul.f32.gmra.mxu3 %v4440_v15 }
 0x21b   : > { %v948_v54 = vpop.f32.mrf.mxu1  ;;  %v1441_v1 = vsel %vm1440_vm2, %v5356_v56, %v1439_v14  ;;  %v1448_v25 = vmul.f32 0.5, %v1447_v13  ;;  %v464_v56 = vld [vmem:[#allocation5 + $0x2f0] sm:$0xff] }
 0x21c   : > { %v949_v4 = vadd.f32 %v948_v54, %v5232_v31  ;;  %v5418_v22 = vsel %vm1442_vm3, %v1443_v58, %v1441_v1  ;;  %1192 = vmatpush.msrb.mxu1 %v464_v56  ;;  %v1249_v58 = vmul.f32 0.9, %v692_v20  ;;  %v5432_v1 = vpop.f32.mrf.mxu3  ;;  %v4441_v56 = vld [vmem:[%s4882_s11 + $0x8] sm:$0xff]  ;;  %v5449_v45 = vpop.f32.mrf.mxu0 }
 0x21d   : > { %8145 = vst [vmem:[#allocation46_spill] sm:$0xff] %v5418_v22  ;;  %2257 = vmatmul.f32.gmra.mxu0 %v5418_v22  ;;  %v1449_v14 = vsub.f32 1.5, %v1448_v25  ;;  %v536_v22 = vld [vmem:[%s4895_s29 + $0x30] sm:$0xff] }
 0x21e   : > { %v3992_v13 = vpop.eup %3991  ;;  %v5424_v30 = vmax.f32 %v949_v4, 1e-16  ;;  %1320 = vmatmul.f32.gmra.mxu2 %v5420_v28  ;;  %1193 = vmatpush.msrb.mxu1 %v459_v29  ;;  %v454_v4 = vld [vmem:[#allocation5 + $0x2a0] sm:$0xff]  ;;  %v695_v29 = vadd.f32 %v5245_v34, %v5077_v16  ;;  %v5445_v15 = vadd.f32 %v1265_v21, %v1249_v58  ;;  %8147 = vst [vmem:[#allocation48_spill] sm:$0xff] %v5449_v45  ;;  %v1266_v34 = vmul.f32 0.1, %v536_v22 }
 0x21f   : > { %v1450_v8 = vmul.f32 %v3990_v17, %v1449_v14  ;;  %v1458_v31 = vmul.f32 %v3992_v13, %v5398_v40  ;;  %v1455_v17 = vand.u32 2147483648, %v5374_v6  ;;  %v4442_v58 = vld [vmem:[%s4882_s11 + $0x80] sm:$0xff] }
 0x220   : > { %3993 = vrsqrt.f32 %v5424_v30  ;;  %1194 = vmatpush.msrb.mxu1 %v454_v4  ;;  %vm1476_vm8 = vcmp.eq.f32.partialorder %v5424_v30, inf  ;;  %vm1478_vm9 = vcmp.eq.f32.partialorder %v5424_v30, 0.0 }
 0x221   : > { %v5430_v54 = vpop.f32.mrf.mxu2  ;;  %v1451_v25 = vmul.f32 %v1450_v8, %v5374_v6  ;;  %v1459_v63 = vmul.f32 %v3992_v13, %v1458_v31  ;;  %1195 = vmatmul.f32.vlgmr.msrb.gmra.mxu1 %v4441_v56 }
 0x222   : > { %1154 = vmatmul.f32.gmra.mxu3 %v4442_v58 }
 0x223   : > { %v951_v20 = vpop.f32.mrf.mxu1  ;;  %v1453_v14 = vsel %vm1452_vm4, %v5374_v6, %v1451_v25  ;;  %v1460_v2 = vmul.f32 0.5, %v1459_v63 }
 0x224   : > { %v952_v8 = vadd.f32 %v951_v20, %v5243_v36  ;;  %v5443_v31 = vsel %vm1454_vm5, %v1455_v17, %v1453_v14  ;;  %v1250_v36 = vmul.f32 0.9, %v695_v29  ;;  %v1467_v14 = vand.u32 2147483648, %v5398_v40  ;;  %v4443_v29 = vld [vmem:[%s4882_s11 + $0x18] sm:$0xff] }
 0x225   : > { %8146 = vst [vmem:[#allocation47_spill] sm:$0xff] %v5443_v31  ;;  %2260 = vmatmul.f32.gmra.mxu0 %v5443_v31  ;;  %v1461_v4 = vsub.f32 1.5, %v1460_v2  ;;  %v537_v31 = vld [vmem:[%s4895_s29 + $0x38] sm:$0xff] }
 0x226   : > { %v3994_v25 = vpop.eup %3993  ;;  %v5451_v6 = vmax.f32 %v952_v8, 1e-16  ;;  %1323 = vmatmul.f32.gmra.mxu2 %v5445_v15  ;;  %v698_v8 = vadd.f32 %v5256_v48, %v5087_v27  ;;  %v5480_v48 = vpop.f32.mrf.mxu0 }
 0x227   : > { %v1462_v63 = vmul.f32 %v3992_v13, %v1461_v4  ;;  %v1470_v16 = vmul.f32 %v3994_v25, %v5424_v30  ;;  %v5462_v13 = vpop.f32.mrf.mxu3  ;;  %8149 = vst [vmem:[#allocation50_spill] sm:$0xff] %v5480_v48  ;;  %v590_v48 = vld [vmem:[#allocation9 + $0xe0] sm:$0xff] }
 0x228   : > { %3995 = vrsqrt.f32 %v5451_v6  ;;  %v1251_v27 = vmul.f32 0.9, %v698_v8  ;;  %v701_v8 = vadd.f32 %v5267_v38, %v5097_v51  ;;  %v1067_v38 = vadd.f32 %v5348_v3, %v5346_v39 }
 0x229   : > { %v5457_v21 = vpop.f32.mrf.mxu2  ;;  %v1463_v17 = vmul.f32 %v1462_v63, %v5398_v40  ;;  %v1471_v20 = vmul.f32 %v3994_v25, %v1470_v16  ;;  %1198 = vmatmul.f32.gmra.mxu1 %v4443_v29  ;;  %v5472_v16 = vadd.f32 %v1266_v34, %v1250_v36  ;;  %v4444_v36 = vld [vmem:[%s4882_s11 + $0x90] sm:$0xff]  ;;  %v4445_v29 = vld [vmem:[%s4882_s11 + $0x28] sm:$0xff]  ;;  %vm1488_vm10 = vcmp.eq.f32.partialorder %v5451_v6, inf }
 0x22a   : > { %1157 = vmatmul.f32.gmra.mxu3 %v4444_v36  ;;  %v704_v39 = vadd.f32 %v5278_v44, %v5107_v26  ;;  %vm1490_vm11 = vcmp.eq.f32.partialorder %v5451_v6, 0.0  ;;  %vm1613_vm12 = vcmp.eq.f32.partialorder %v1067_v38, 0.0 }
 0x22b   : > { %v954_v2 = vpop.f32.mrf.mxu1  ;;  %v1465_v56 = vsel %vm1464_vm6, %v5398_v40, %v1463_v17  ;;  %v1472_v22 = vmul.f32 0.5, %v1471_v20 }
 0x22c   : > { %v955_v4 = vadd.f32 %v954_v2, %v5254_v41  ;;  %v5470_v63 = vsel %vm1466_vm7, %v1467_v14, %v1465_v56  ;;  %v1267_v41 = vmul.f32 0.1, %v537_v31 }
 0x22d   : > { %8148 = vst [vmem:[#allocation49_spill] sm:$0xff] %v5470_v63  ;;  %2263 = vmatmul.f32.gmra.mxu0 %v5470_v63  ;;  %v1473_v58 = vsub.f32 1.5, %v1472_v22 }
 0x22e   : > { %v3996_v17 = vpop.eup %3995  ;;  %v5476_v45 = vmax.f32 %v955_v4, 1e-16  ;;  %1326 = vmatmul.f32.gmra.mxu2 %v5472_v16 }
 0x22f   : > { %v1474_v40 = vmul.f32 %v3994_v25, %v1473_v58  ;;  %v1482_v20 = vmul.f32 %v3996_v17, %v5451_v6  ;;  %v1479_v25 = vand.u32 2147483648, %v5424_v30 }
 0x230   : > { %3997 = vrsqrt.f32 %v5476_v45  ;;  %vm1500_vm13 = vcmp.eq.f32.partialorder %v5476_v45, inf  ;;  %vm1502_vm14 = vcmp.eq.f32.partialorder %v5476_v45, 0.0 }
 0x231   : > { %v5484_v34 = vpop.f32.mrf.mxu2  ;;  %v1475_v14 = vmul.f32 %v1474_v40, %v5424_v30  ;;  %v1483_v2 = vmul.f32 %v3996_v17, %v1482_v20  ;;  %1201 = vmatmul.f32.gmra.mxu1 %v4445_v29  ;;  %v5497_v40 = vadd.f32 %v1267_v41, %v1251_v27  ;;  %v5499_v20 = vpop.f32.mrf.mxu3  ;;  %v4446_v41 = vld [vmem:[%s4882_s11 + $0xa0] sm:$0xff] }
 0x232   : > { %1160 = vmatmul.f32.gmra.mxu3 %v4446_v41 }
 0x233   : > { %v957_v56 = vpop.f32.mrf.mxu1  ;;  %v1477_v22 = vsel %vm1476_vm8, %v5424_v30, %v1475_v14  ;;  %v1484_v31 = vmul.f32 0.5, %v1483_v2  ;;  %v538_v14 = vld [vmem:[%s4895_s29 + $0x40] sm:$0xff] }
 0x234   : > { %v958_v4 = vadd.f32 %v957_v56, %v5265_v46  ;;  %v5495_v58 = vsel %vm1478_vm9, %v1479_v25, %v1477_v22  ;;  %v1252_v46 = vmul.f32 0.9, %v701_v8  ;;  %v1268_v27 = vmul.f32 0.1, %v538_v14  ;;  %v4447_v14 = vld [vmem:[%s4882_s11 + $0x38] sm:$0xff] }
 0x235   : > { %8150 = vst [vmem:[#allocation51_spill] sm:$0xff] %v5495_v58  ;;  %2266 = vmatmul.f32.gmra.mxu0 %v5495_v58  ;;  %v1485_v36 = vsub.f32 1.5, %v1484_v31  ;;  %v5514_v31 = vpop.f32.mrf.mxu0 }
 0x236   : > { %v3998_v30 = vpop.eup %3997  ;;  %v5503_v2 = vmax.f32 %v958_v4, 1e-16  ;;  %1329 = vmatmul.f32.gmra.mxu2 %v5497_v40  ;;  %8151 = vst [vmem:[#allocation52_spill] sm:$0xff] %v5514_v31  ;;  %v5527_v41 = vadd.f32 %v1268_v27, %v1252_v46  ;;  %v4448_v46 = vld [vmem:[%s4882_s11 + $0xb0] sm:$0xff] }
 0x237   : > { %v1486_v29 = vmul.f32 %v3996_v17, %v1485_v36  ;;  %v1494_v51 = vmul.f32 %v3998_v30, %v5476_v45  ;;  %v1491_v17 = vand.u32 2147483648, %v5451_v6  ;;  %v539_v36 = vld [vmem:[%s4895_s29 + $0x48] sm:$0xff] }
 0x238   : > { %3999 = vrsqrt.f32 %v5503_v2  ;;  %vm1512_vm0 = vcmp.eq.f32.partialorder %v5503_v2, inf  ;;  %vm1514_vm1 = vcmp.eq.f32.partialorder %v5503_v2, 0.0 }
 0x239   : > { %v5511_v25 = vpop.f32.mrf.mxu2  ;;  %v1487_v56 = vmul.f32 %v1486_v29, %v5451_v6  ;;  %v1495_v22 = vmul.f32 %v3998_v30, %v1494_v51  ;;  %1204 = vmatmul.f32.gmra.mxu1 %v4447_v14  ;;  %v5535_v14 = vpop.f32.mrf.mxu3 }
 0x23a   : > { %1163 = vmatmul.f32.gmra.mxu3 %v4448_v46 }
 0x23b   : > { %v960_v3 = vpop.f32.mrf.mxu1  ;;  %v1489_v8 = vsel %vm1488_vm10, %v5451_v6, %v1487_v56  ;;  %v1496_v4 = vmul.f32 0.5, %v1495_v22  ;;  %v1269_v6 = vmul.f32 0.1, %v539_v36  ;;  %v1253_v56 = vmul.f32 0.9, %v704_v39 }
 0x23c   : > { %v961_v29 = vadd.f32 %v960_v3, %v5276_v61  ;;  %v5525_v51 = vsel %vm1490_vm11, %v1491_v17, %v1489_v8  ;;  %v5533_v22 = vsel %vm1613_vm12, 1e-16, %v1067_v38 }
 0x23d   : > { %8152 = vst [vmem:[#allocation53_spill] sm:$0xff] %v5525_v51  ;;  %2269 = vmatmul.f32.gmra.mxu0 %v5525_v51  ;;  %v1497_v26 = vsub.f32 1.5, %v1496_v4  ;;  %v5544_v8 = vand.u32 2147483647, %v5533_v22  ;;  %v5550_v4 = vadd.f32 %v1269_v6, %v1253_v56  ;;  %v5557_v46 = vpop.f32.mrf.mxu0  ;;  %v540_v6 = vld [vmem:[%s4895_s29 + $0x50] sm:$0xff] }
 0x23e   : > { %v4000_v44 = vpop.eup %3999  ;;  %v5530_v58 = vmax.f32 %v961_v29, 1e-16  ;;  %1332 = vmatmul.f32.gmra.mxu2 %v5527_v41  ;;  %v4449_v29 = vld [vmem:[%s4882_s11 + $0x48] sm:$0xff] }
 0x23f   : > { %v1498_v63 = vmul.f32 %v3998_v30, %v1497_v26  ;;  %v1506_v61 = vmul.f32 %v4000_v44, %v5503_v2  ;;  %v1503_v30 = vand.u32 2147483648, %v5476_v45 }
 0x240   : > { %4001 = vrsqrt.f32 %v5530_v58  ;;  %vm1524_vm3 = vcmp.eq.f32.partialorder %v5530_v58, inf  ;;  %vm1526_vm4 = vcmp.eq.f32.partialorder %v5530_v58, 0.0 }
 0x241   : > { %v5540_v27 = vpop.f32.mrf.mxu2  ;;  %v1499_v17 = vmul.f32 %v1498_v63, %v5476_v45  ;;  %v1507_v3 = vmul.f32 %v4000_v44, %v1506_v61  ;;  %1207 = vmatmul.f32.gmra.mxu1 %v4449_v29  ;;  %v8153_v63 = vld [vmem:[#allocation23_spill] sm:$0xff]  ;;  %v1070_v61 = vadd.f32 %v5371_v49, %v5364_v9  ;;  %4003 = vlog2.f32 %v5544_v8 }
 0x242   : > { %v707_v26 = vadd.f32 %v5286_v53, %v8153_v63  ;;  %8154 = vst [vmem:[#allocation23_spill] sm:$0xff] %v5557_v46  ;;  %v593_v53 = vld [vmem:[#allocation9 + $0xf8] sm:$0xff]  ;;  %v591_v63 = vld [vmem:[#allocation9 + $0xe8] sm:$0xff] }
 0x243   : > { %v963_v38 = vpop.f32.mrf.mxu1  ;;  %v1501_v39 = vsel %vm1500_vm13, %v5476_v45, %v1499_v17  ;;  %v1508_v36 = vmul.f32 0.5, %v1507_v3  ;;  %2125 = vmatpush.msrb.mxu3 %v593_v53  ;;  %vm1614_vm15 = vcmp.eq.f32.partialorder %v1070_v61, 0.0  ;;  %v1270_v3 = vmul.f32 0.1, %v540_v6 }
 0x244   : > { %v964_v51 = vadd.f32 %v963_v38, %v5284_v59  ;;  %v5560_v31 = vsel %vm1502_vm14, %v1503_v30, %v1501_v39  ;;  %v1254_v59 = vmul.f32 0.9, %v707_v26  ;;  %v4450_v30 = vld [vmem:[%s4882_s11 + $0xc0] sm:$0xff]  ;;  %v592_v38 = vld [vmem:[#allocation9 + $0xf0] sm:$0xff]  ;;  %v5578_v26 = vsel %vm1614_vm15, 1e-16, %v1070_v61 }
 0x245   : > { %8155 = vst [vmem:[#allocation54_spill] sm:$0xff] %v5560_v31  ;;  %2272 = vmatmul.f32.gmra.mxu0 %v5560_v31  ;;  %v1509_v45 = vsub.f32 1.5, %v1508_v36  ;;  %1166 = vmatmul.f32.gmra.mxu3 %v4450_v30  ;;  %v4451_v30 = vld [vmem:[%s4882_s11 + $0x58] sm:$0xff] }
 0x246   : > { %v4002_v56 = vpop.eup %4001  ;;  %v5564_v17 = vmax.f32 %v964_v51, 1e-16  ;;  %1335 = vmatmul.f32.gmra.mxu2 %v5550_v4  ;;  %v5571_v51 = vpop.f32.mrf.mxu3  ;;  %2126 = vmatpush.msrb.mxu3 %v592_v38  ;;  %v5588_v61 = vadd.f32 %v1270_v3, %v1254_v59  ;;  %v589_v59 = vld [vmem:[#allocation9 + $0xd8] sm:$0xff] }
 0x247   : > { %v1510_v9 = vmul.f32 %v4000_v44, %v1509_v45  ;;  %v1518_v49 = vmul.f32 %v4002_v56, %v5530_v58  ;;  %v1515_v44 = vand.u32 2147483648, %v5503_v2 }
 0x248   : > { %4005 = vrsqrt.f32 %v5564_v17  ;;  %2127 = vmatpush.msrb.mxu3 %v591_v63  ;;  %vm1536_vm6 = vcmp.eq.f32.partialorder %v5564_v17, inf  ;;  %vm1538_vm7 = vcmp.eq.f32.partialorder %v5564_v17, 0.0 }
 0x249   : > { %v5573_v39 = vpop.f32.mrf.mxu2  ;;  %v1511_v36 = vmul.f32 %v1510_v9, %v5503_v2  ;;  %v1519_v29 = vmul.f32 %v4002_v56, %v1518_v49  ;;  %1210 = vmatmul.f32.gmra.mxu1 %v4451_v30  ;;  %v4004_v9 = vpop.eup %4003  ;;  %v8156_v49 = vld [vmem:[#allocation25_spill] sm:$0xff]  ;;  %v5595_v30 = vand.u32 2147483647, %v5578_v26 }
 0x24a   : > { %v710_v38 = vadd.f32 %v5293_v60, %v8156_v49  ;;  %2128 = vmatpush.msrb.mxu3 %v590_v48  ;;  %v5597_v60 = vpop.f32.mrf.mxu0 }
 0x24b   : > { %v966_v45 = vpop.f32.mrf.mxu1  ;;  %v1513_v6 = vsel %vm1512_vm0, %v5503_v2, %v1511_v36  ;;  %v1520_v53 = vmul.f32 0.5, %v1519_v29  ;;  %v1073_v36 = vadd.f32 %v5401_v37, %v5380_v32  ;;  %v541_v29 = vld [vmem:[%s4895_s29 + $0x58] sm:$0xff]  ;;  %8158 = vst [vmem:[#allocation55_spill] sm:$0xff] %v5597_v60  ;;  %v3516_v37 = vmul.f32 -0.33333334, %v4004_v9  ;;  %v542_v60 = vld [vmem:[%s4895_s29 + $0x60] sm:$0xff] }
 0x24c   : > { %v967_v31 = vadd.f32 %v966_v45, %v5291_v19  ;;  %v5586_v46 = vsel %vm1514_vm1, %v1515_v44, %v1513_v6  ;;  %2129 = vmatpush.msrb.mxu3 %v589_v59  ;;  %v1255_v44 = vmul.f32 0.9, %v710_v38  ;;  %v1271_v48 = vmul.f32 0.1, %v541_v29  ;;  %v4452_v45 = vld [vmem:[%s4882_s11 + $0xd0] sm:$0xff]  ;;  %v587_v38 = vld [vmem:[#allocation9 + $0xc8] sm:$0xff] }
 0x24d   : > { %8157 = vst [vmem:[#allocation25_spill] sm:$0xff] %v5586_v46  ;;  %2275 = vmatmul.f32.gmra.mxu0 %v5586_v46  ;;  %v1521_v2 = vsub.f32 1.5, %v1520_v53  ;;  %1169 = vmatmul.f32.gmra.mxu3 %v4452_v45  ;;  %v588_v6 = vld [vmem:[#allocation9 + $0xd0] sm:$0xff]  ;;  %vm1615_vm2 = vcmp.eq.f32.partialorder %v1073_v36, 0.0  ;;  %v1527_v9 = vand.u32 2147483648, %v5530_v58  ;;  %v586_v46 = vld [vmem:[#allocation9 + $0xc0] sm:$0xff] }
 0x24e   : > { %v4006_v63 = vpop.eup %4005  ;;  %v5599_v19 = vmax.f32 %v967_v31, 1e-16  ;;  %1338 = vmatmul.f32.gmra.mxu2 %v5588_v61  ;;  %2130 = vmatpush.msrb.mxu3 %v588_v6  ;;  %v5623_v6 = vadd.f32 %v1271_v48, %v1255_v44 }
 0x24f   : > { %v1522_v3 = vmul.f32 %v4002_v56, %v1521_v2  ;;  %v1530_v32 = vmul.f32 %v4006_v63, %v5564_v17  ;;  %v1076_v56 = vadd.f32 %v5432_v1, %v5406_v43  ;;  %v5613_v2 = vpop.f32.mrf.mxu3  ;;  %v713_v43 = vadd.f32 %v5300_v0, %v5136_v33  ;;  %v585_v33 = vld [vmem:[#allocation9 + $0xb8] sm:$0xff] }
 0x250   : > { %4007 = vrsqrt.f32 %v5599_v19  ;;  %2131 = vmatpush.msrb.mxu3 %v587_v38  ;;  %8160 = vst [vmem:[#allocation57_spill] sm:$0xff] %v5623_v6  ;;  %v584_v38 = vld [vmem:[#allocation9 + $0xb0] sm:$0xff]  ;;  %vm1548_vm8 = vcmp.eq.f32.partialorder %v5599_v19, inf  ;;  %vm1550_vm10 = vcmp.eq.f32.partialorder %v5599_v19, 0.0 }
 0x251   : > { %v5605_v53 = vpop.f32.mrf.mxu2  ;;  %v1523_v31 = vmul.f32 %v1522_v3, %v5530_v58  ;;  %v1531_v49 = vmul.f32 %v4006_v63, %v1530_v32  ;;  %4009 = vlog2.f32 %v5595_v30  ;;  %v4453_v32 = vld [vmem:[%s4882_s11 + $0x68] sm:$0xff]  ;;  %vm1616_vm5 = vcmp.eq.f32.partialorder %v1076_v56, 0.0 }
 0x252   : > { %1213 = vmatmul.f32.gmra.mxu1 %v4453_v32  ;;  %4011 = vpow2.f32 %v3516_v37  ;;  %2132 = vmatpush.msrb.mxu3 %v586_v46  ;;  %v1256_v48 = vmul.f32 0.9, %v713_v43  ;;  %v1272_v46 = vmul.f32 0.1, %v542_v60  ;;  %v583_v43 = vld [vmem:[#allocation9 + $0xa8] sm:$0xff] }
 0x253   : > { %v969_v29 = vpop.f32.mrf.mxu1  ;;  %v1525_v59 = vsel %vm1524_vm3, %v5530_v58, %v1523_v31  ;;  %v1532_v3 = vmul.f32 0.5, %v1531_v49  ;;  %v5628_v49 = vsel %vm1615_vm2, 1e-16, %v1073_v36  ;;  %v4454_v36 = vld [vmem:[%s4882_s11 + $0xe0] sm:$0xff]  ;;  %v5649_v60 = vsel %vm1616_vm5, 1e-16, %v1076_v56 }
 0x254   : > { %v970_v1 = vadd.f32 %v969_v29, %v5298_v47  ;;  %v5621_v45 = vsel %vm1526_vm4, %v1527_v9, %v1525_v59  ;;  %2133 = vmatpush.msrb.mxu3 %v585_v33  ;;  %v5634_v9 = vpop.f32.mrf.mxu0  ;;  %v5641_v59 = vand.u32 2147483647, %v5628_v49  ;;  %v543_v33 = vld [vmem:[%s4895_s29 + $0x68] sm:$0xff]  ;;  %vm3526_vm3 = vweird.f32 %v5544_v8 }
 0x255   : > { %8159 = vst [vmem:[#allocation56_spill] sm:$0xff] %v5621_v45  ;;  %2278 = vmatmul.f32.gmra.mxu0 %v5621_v45  ;;  %v1533_v31 = vsub.f32 1.5, %v1532_v3  ;;  %1172 = vmatmul.f32.gmra.mxu3 %v4454_v36  ;;  %v582_v36 = vld [vmem:[#allocation9 + $0xa0] sm:$0xff] }
 0x256   : > { %v4008_v58 = vpop.eup %4007  ;;  %v5630_v37 = vmax.f32 %v970_v1, 1e-16  ;;  %1341 = vmatmul.f32.gmra.mxu2 %v5623_v6  ;;  %8161 = vst [vmem:[#allocation58_spill] sm:$0xff] %v5634_v9  ;;  %2134 = vmatpush.msrb.mxu3 %v584_v38  ;;  %v716_v1 = vadd.f32 %v5307_v10, %v5146_v12  ;;  %v5660_v38 = vadd.f32 %v1272_v46, %v1256_v48 }
 0x257   : > { %v1534_v47 = vmul.f32 %v4006_v63, %v1533_v31  ;;  %v1542_v0 = vmul.f32 %v4008_v58, %v5599_v19  ;;  %v4010_v44 = vpop.eup %4009  ;;  %v1539_v31 = vand.u32 2147483648, %v5564_v17  ;;  %v5664_v6 = vpop.f32.mrf.mxu3 }
 0x258   : > { %4013 = vrsqrt.f32 %v5630_v37  ;;  %v5638_v29 = vpop.eup %4011  ;;  %2135 = vmatpush.msrb.mxu3 %v583_v43  ;;  %v3540_v12 = vmul.f32 -0.33333334, %v4010_v44  ;;  %8163 = vst [vmem:[#allocation60_spill] sm:$0xff] %v5660_v38  ;;  %v581_v43 = vld [vmem:[#allocation9 + $0x98] sm:$0xff]  ;;  %v5670_v44 = vand.u32 2147483647, %v5649_v60 }
 0x259   : > { %v5643_v63 = vpop.f32.mrf.mxu2  ;;  %v1535_v3 = vmul.f32 %v1534_v47, %v5564_v17  ;;  %v1543_v32 = vmul.f32 %v4008_v58, %v1542_v0  ;;  %v4455_v0 = vld [vmem:[%s4882_s11 + $0x78] sm:$0xff]  ;;  %v3518_v55 = vmul.f32 %v5638_v29, %v5638_v29  ;;  %4015 = vlog2.f32 %v5641_v59 }
 0x25a   : > { %1216 = vmatmul.f32.gmra.mxu1 %v4455_v0  ;;  %2136 = vmatpush.msrb.mxu3 %v582_v36  ;;  %4017 = vpow2.f32 %v3540_v12  ;;  %v580_v36 = vld [vmem:[#allocation9 + $0x90] sm:$0xff]  ;;  %v579_v12 = vld [vmem:[#allocation9 + $0x88] sm:$0xff]  ;;  %vm1560_vm12 = vcmp.eq.f32.partialorder %v5630_v37, inf  ;;  %vm1562_vm13 = vcmp.eq.f32.partialorder %v5630_v37, 0.0 }
 0x25b   : > { %v972_v45 = vpop.f32.mrf.mxu1  ;;  %v1537_v9 = vsel %vm1536_vm6, %v5564_v17, %v1535_v3  ;;  %v1544_v47 = vmul.f32 0.5, %v1543_v32  ;;  %v1273_v17 = vmul.f32 0.1, %v543_v33  ;;  %v544_v32 = vld [vmem:[%s4895_s29 + $0x70] sm:$0xff]  ;;  %v719_v33 = vadd.f32 %v5314_v5, %v5157_v52 }
 0x25c   : > { %v973_v10 = vadd.f32 %v972_v45, %v5305_v23  ;;  %v5658_v56 = vsel %vm1538_vm7, %v1539_v31, %v1537_v9  ;;  %v1257_v45 = vmul.f32 0.9, %v716_v1  ;;  %v1079_v9 = vadd.f32 %v5462_v13, %v5430_v54  ;;  %2137 = vmatpush.msrb.mxu3 %v581_v43  ;;  %v4456_v1 = vld [vmem:[%s4882_s11 + $0xf0] sm:$0xff] }
 0x25d   : > { %8162 = vst [vmem:[#allocation59_spill] sm:$0xff] %v5658_v56  ;;  %2281 = vmatmul.f32.gmra.mxu0 %v5658_v56  ;;  %v1545_v3 = vsub.f32 1.5, %v1544_v47  ;;  %1175 = vmatmul.f32.gmra.mxu3 %v4456_v1  ;;  %v3519_v47 = vmul.f32 %v3518_v55, %v5544_v8  ;;  %v1274_v13 = vmul.f32 0.1, %v544_v32  ;;  %v1551_v52 = vand.u32 2147483648, %v5599_v19 }
 0x25e   : > { %v4014_v23 = vpop.eup %4013  ;;  %v5672_v48 = vmax.f32 %v973_v10, 1e-16  ;;  %1344 = vmatmul.f32.gmra.mxu2 %v5660_v38  ;;  %2138 = vmatpush.msrb.mxu3 %v580_v36  ;;  %v5690_v5 = vadd.f32 %v1273_v17, %v1257_v45  ;;  %vm1617_vm9 = vcmp.eq.f32.partialorder %v1079_v9, 0.0  ;;  %v1258_v1 = vmul.f32 0.9, %v719_v33  ;;  %v578_v17 = vld [vmem:[#allocation9 + $0x80] sm:$0xff] }
 0x25f   : > { %v1546_v46 = vmul.f32 %v4008_v58, %v1545_v3  ;;  %v1554_v31 = vmul.f32 %v4014_v23, %v5630_v37  ;;  %v5686_v58 = vpop.f32.mrf.mxu0  ;;  %v4016_v3 = vpop.eup %4015  ;;  %v3520_v45 = vmul.f32 %v3519_v47, %v3518_v55  ;;  %vm3510_vm6 = vcmp.eq.f32.partialorder %v5544_v8, 0.0 }
 0x260   : > { %4019 = vrsqrt.f32 %v5672_v48  ;;  %8164 = vst [vmem:[#allocation61_spill] sm:$0xff] %v5686_v58  ;;  %2139 = vmatpush.msrb.mxu3 %v579_v12  ;;  %v5699_v58 = vpop.eup %4017  ;;  %vm1572_vm15 = vcmp.eq.f32.partialorder %v5672_v48, inf  ;;  %vm1574_vm0 = vcmp.eq.f32.partialorder %v5672_v48, 0.0  ;;  %vm3511_vm7 = vcmp.lt.f32.partialorder %v5544_v8, 0.0 }
 0x261   : > { %v5683_v0 = vpop.f32.mrf.mxu2  ;;  %v1547_v10 = vmul.f32 %v1546_v46, %v5599_v19  ;;  %v1555_v54 = vmul.f32 %v4014_v23, %v1554_v31  ;;  %8165 = vst [vmem:[#allocation62_spill] sm:$0xff] %v5690_v5  ;;  %4021 = vlog2.f32 %v5670_v44  ;;  %v4457_v31 = vld [vmem:[%s4882_s11 + $0x88] sm:$0xff] }
 0x262   : > { %1219 = vmatmul.f32.gmra.mxu1 %v4457_v31  ;;  %2140 = vmatpush.msrb.mxu3 %v578_v17  ;;  %v545_v31 = vld [vmem:[%s4895_s29 + $0x78] sm:$0xff]  ;;  %v1085_v17 = vadd.f32 %v5535_v14, %v5484_v34 }
 0x263   : > { %v975_v43 = vpop.f32.mrf.mxu1  ;;  %v1549_v46 = vsel %vm1548_vm8, %v5599_v19, %v1547_v10  ;;  %v1556_v32 = vmul.f32 0.5, %v1555_v54  ;;  %v5703_v19 = vsel %vm1617_vm9, 1e-16, %v1079_v9  ;;  %v1082_v54 = vadd.f32 %v5499_v20, %v5457_v21 }
 0x264   : > { %v976_v36 = vadd.f32 %v975_v43, %v5312_v11  ;;  %v5697_v56 = vsel %vm1550_vm10, %v1551_v52, %v1549_v46  ;;  %v3564_v11 = vmul.f32 -0.33333334, %v4016_v3  ;;  %v5710_v52 = vpop.f32.mrf.mxu3  ;;  %v722_v43 = vadd.f32 %v5321_v35, %v5168_v7 }
 0x265   : > { %8166 = vst [vmem:[#allocation63_spill] sm:$0xff] %v5697_v56  ;;  %2284 = vmatmul.f32.gmra.mxu0 %v5697_v56  ;;  %v1557_v38 = vsub.f32 1.5, %v1556_v32  ;;  %v5716_v9 = vadd.f32 %v1274_v13, %v1258_v1  ;;  %v3521_v21 = vsub.f32 %v3520_v45, %v5638_v29  ;;  %v5720_v20 = vand.u32 2147483647, %v5703_v19  ;;  %v4458_v1 = vld [vmem:[%s4882_s11 + $0x98] sm:$0xff] }
 0x266   : > { %v4020_v10 = vpop.eup %4019  ;;  %v5707_v33 = vmax.f32 %v976_v36, 1e-16  ;;  %1347 = vmatmul.f32.gmra.mxu2 %v5690_v5  ;;  %v3542_v46 = vmul.f32 %v5699_v58, %v5699_v58  ;;  %vm1618_vm11 = vcmp.eq.f32.partialorder %v1082_v54, 0.0  ;;  %v1563_v7 = vand.u32 2147483648, %v5630_v37 }
 0x267   : > { %v1558_v55 = vmul.f32 %v4014_v23, %v1557_v38  ;;  %v1566_v47 = vmul.f32 %v4020_v10, %v5672_v48  ;;  %v4022_v12 = vpop.eup %4021  ;;  %8167 = vst [vmem:[#allocation64_spill] sm:$0xff] %v5716_v9  ;;  %v5735_v45 = vpop.f32.mrf.mxu0  ;;  %v1275_v34 = vmul.f32 0.1, %v545_v31  ;;  %v5747_v14 = vsel %vm1618_vm11, 1e-16, %v1082_v54 }
 0x268   : > { %4023 = vrsqrt.f32 %v5707_v33  ;;  %v3588_v36 = vmul.f32 -0.33333334, %v4022_v12  ;;  %8168 = vst [vmem:[#allocation65_spill] sm:$0xff] %v5735_v45  ;;  %vm1619_vm14 = vcmp.eq.f32.partialorder %v1085_v17, 0.0  ;;  %vm1584_vm2 = vcmp.eq.f32.partialorder %v5707_v33, inf }
 0x269   : > { %v5722_v3 = vpop.f32.mrf.mxu2  ;;  %v1559_v38 = vmul.f32 %v1558_v55, %v5630_v37  ;;  %v1567_v23 = vmul.f32 %v4020_v10, %v1566_v47  ;;  %4025 = vpow2.f32 %v3564_v11  ;;  %v3522_v11 = vmul.f32 -0.33333334, %v3521_v21 }
 0x26a   : > { %1222 = vmatmul.f32.gmra.mxu1 %v4458_v1  ;;  %4027 = vlog2.f32 %v5720_v20  ;;  %v1259_v1 = vmul.f32 0.9, %v722_v43  ;;  %v1088_v43 = vadd.f32 %v5571_v51, %v5511_v25  ;;  %v5768_v25 = vsel %vm1619_vm14, 1e-16, %v1085_v17 }
 0x26b   : > { %v978_v35 = vpop.f32.mrf.mxu1  ;;  %v1561_v13 = vsel %vm1560_vm12, %v5630_v37, %v1559_v38  ;;  %v1568_v32 = vmul.f32 0.5, %v1567_v23  ;;  %v3543_v37 = vmul.f32 %v3542_v46, %v5595_v30  ;;  %4029 = vpow2.f32 %v3588_v36 }
 0x26c   : > { %v979_v55 = vadd.f32 %v978_v35, %v5319_v62  ;;  %v5738_v47 = vsel %vm1562_vm13, %v1563_v7, %v1561_v13  ;;  %v3523_v35 = vadd.f32 %v5638_v29, %v3522_v11  ;;  %v5756_v13 = vpop.f32.mrf.mxu3  ;;  %v5762_v36 = vand.u32 2147483647, %v5747_v14 }
 0x26d   : > { %8169 = vst [vmem:[#allocation66_spill] sm:$0xff] %v5738_v47  ;;  %2287 = vmatmul.f32.gmra.mxu0 %v5738_v47  ;;  %v1569_v38 = vsub.f32 1.5, %v1568_v32  ;;  %v3544_v31 = vmul.f32 %v3543_v37, %v3542_v46  ;;  %v5766_v29 = vadd.f32 %v1275_v34, %v1259_v1  ;;  %vm1620_vm1 = vcmp.eq.f32.partialorder %v1088_v43, 0.0 }
 0x26e   : > { %v4024_v23 = vpop.eup %4023  ;;  %v5743_v12 = vmax.f32 %v979_v55, 1e-16  ;;  %1350 = vmatmul.f32.gmra.mxu2 %v5716_v9  ;;  %v1575_v55 = vand.u32 2147483648, %v5672_v48  ;;  %v3524_v47 = vmul.f32 %v3523_v35, %v5544_v8  ;;  %vm1586_vm5 = vcmp.eq.f32.partialorder %v5707_v33, 0.0 }
 0x26f   : > { %v1570_v62 = vmul.f32 %v4020_v10, %v1569_v38  ;;  %v1578_v21 = vmul.f32 %v4024_v23, %v5707_v33  ;;  %v5750_v7 = vpop.eup %4025  ;;  %8170 = vst [vmem:[#allocation67_spill] sm:$0xff] %v5766_v29  ;;  %vm1645_vm10 = vcmp.lt.f32.partialorder %v5533_v22, 0.0  ;;  %vm3550_vm11 = vweird.f32 %v5595_v30 }
 0x270   : > { %4031 = vrsqrt.f32 %v5743_v12  ;;  %v4028_v11 = vpop.eup %4027  ;;  %v3566_v1 = vmul.f32 %v5750_v7, %v5750_v7  ;;  %vm1596_vm8 = vcmp.eq.f32.partialorder %v5743_v12, inf  ;;  %vm1598_vm9 = vcmp.eq.f32.partialorder %v5743_v12, 0.0 }
 0x271   : > { %v5758_v32 = vpop.f32.mrf.mxu2  ;;  %v1571_v10 = vmul.f32 %v1570_v62, %v5672_v48  ;;  %v1579_v54 = vmul.f32 %v4024_v23, %v1578_v21  ;;  %v4459_v21 = vld [vmem:[%s4882_s11 + $0xa8] sm:$0xff]  ;;  %v5779_v34 = vpop.eup %4029  ;;  %4033 = vlog2.f32 %v5762_v36  ;;  %vm3513_vm13 = vcmp.eq.f32.partialorder %v5544_v8, inf }
 0x272   : > { %1225 = vmatmul.f32.gmra.mxu1 %v4459_v21  ;;  %vm3534_vm14 = vcmp.eq.f32.partialorder %v5595_v30, 0.0 }
 0x273   : > { %v981_v51 = vpop.f32.mrf.mxu1  ;;  %v1573_v38 = vsel %vm1572_vm15, %v5672_v48, %v1571_v10  ;;  %v1580_v62 = vmul.f32 0.5, %v1579_v54  ;;  %v3545_v48 = vsub.f32 %v3544_v31, %v5699_v58  ;;  %v5783_v54 = vpop.f32.mrf.mxu0  ;;  %v5795_v31 = vsel %vm1620_vm1, 1e-16, %v1088_v43  ;;  %v4460_v43 = vld [vmem:[%s4882_s11 + $0xb8] sm:$0xff] }
 0x274   : > { %v982_v46 = vadd.f32 %v981_v51, %v5331_v24  ;;  %v5774_v37 = vsel %vm1574_vm0, %v1575_v55, %v1573_v38  ;;  %8172 = vst [vmem:[#allocation69_spill] sm:$0xff] %v5783_v54  ;;  %v3612_v24 = vmul.f32 -0.33333334, %v4028_v11  ;;  %v5790_v55 = vand.u32 2147483647, %v5768_v25 }
 0x275   : > { %8171 = vst [vmem:[#allocation68_spill] sm:$0xff] %v5774_v37  ;;  %2290 = vmatmul.f32.gmra.mxu0 %v5774_v37  ;;  %v1581_v17 = vsub.f32 1.5, %v1580_v62  ;;  %v1091_v51 = vadd.f32 %v5613_v2, %v5540_v27  ;;  %v3567_v37 = vmul.f32 %v3566_v1, %v5641_v59  ;;  %v3546_v45 = vmul.f32 -0.33333334, %v3545_v48 }
 0x276   : > { %v4032_v10 = vpop.eup %4031  ;;  %v5785_v21 = vmax.f32 %v982_v46, 1e-16  ;;  %1353 = vmatmul.f32.gmra.mxu2 %v5766_v29  ;;  %v3525_v46 = vmul.f32 %v3524_v47, %v3523_v35  ;;  %v3590_v27 = vmul.f32 %v5779_v34, %v5779_v34  ;;  %v1587_v2 = vand.u32 2147483648, %v5707_v33  ;;  %v5807_v47 = vpop.f32.mrf.mxu3 }
 0x277   : > { %v1582_v38 = vmul.f32 %v4024_v23, %v1581_v17  ;;  %v1590_v62 = vmul.f32 %v4032_v10, %v5743_v12  ;;  %vm1621_vm4 = vcmp.eq.f32.partialorder %v1091_v51, 0.0  ;;  %v4034_v17 = vpop.eup %4033  ;;  %vm3535_vm1 = vcmp.lt.f32.partialorder %v5595_v30, 0.0 }
 0x278   : > { %4035 = vrsqrt.f32 %v5785_v21  ;;  %vm1608_vm15 = vcmp.eq.f32.partialorder %v5785_v21, inf  ;;  %vm1610_vm0 = vcmp.eq.f32.partialorder %v5785_v21, 0.0 }
 0x279   : > { %v5799_v11 = vpop.f32.mrf.mxu2  ;;  %v1583_v56 = vmul.f32 %v1582_v38, %v5707_v33  ;;  %v1591_v54 = vmul.f32 %v4032_v10, %v1590_v62  ;;  %4037 = vpow2.f32 %v3612_v24  ;;  %v3529_v38 = vand.u32 2147483648, %v5544_v8 }
 0x27a   : > { %1228 = vmatmul.f32.gmra.mxu1 %v4460_v43  ;;  %v3568_v62 = vmul.f32 %v3567_v37, %v3566_v1  ;;  %v1373_v37 = vmul.f32 0.5945349, %v5333_v42  ;;  %4039 = vlog2.f32 %v5790_v55 }
 0x27b   : > { %v1585_v23 = vsel %vm1584_vm2, %v5707_v33, %v1583_v56  ;;  %v1592_v35 = vmul.f32 0.5, %v1591_v54  ;;  %v3527_v56 = vsel %vm3526_vm3, %v5544_v8, %v3525_v46  ;;  %v3547_v33 = vadd.f32 %v5699_v58, %v3546_v45  ;;  %v5837_v45 = vpop.f32.mrf.mxu0 }
 0x27c   : > { %v5812_v48 = vsel %vm1586_vm5, %v1587_v2, %v1585_v23  ;;  %v3591_v54 = vmul.f32 %v3590_v27, %v5670_v44  ;;  %v5823_v2 = vand.u32 2147483647, %v5795_v31  ;;  %v5826_v23 = vsel %vm1621_vm4, 1e-16, %v1091_v51  ;;  %8174 = vst [vmem:[#allocation71_spill] sm:$0xff] %v5837_v45 }
 0x27d   : > { %8173 = vst [vmem:[#allocation70_spill] sm:$0xff] %v5812_v48  ;;  %2293 = vmatmul.f32.gmra.mxu0 %v5812_v48  ;;  %v1593_v24 = vsub.f32 1.5, %v1592_v35  ;;  %v3636_v48 = vmul.f32 -0.33333334, %v4034_v17  ;;  %v5835_v58 = vadd.f32 %v5664_v6, %v5573_v39  ;;  %v3530_v51 = vsel %vm3510_vm6, %v3529_v38, %v3527_v56 }
 0x27e   : > { %v4036_v43 = vpop.eup %4035  ;;  %v3569_v42 = vsub.f32 %v3568_v62, %v5750_v7  ;;  %v3548_v29 = vmul.f32 %v3547_v33, %v5595_v30  ;;  %v3592_v9 = vmul.f32 %v3591_v54, %v3590_v27  ;;  %v1599_v39 = vand.u32 2147483648, %v5743_v12  ;;  %v4461_v62 = vld [vmem:[%s4882_s11 + $0xc8] sm:$0xff]  ;;  %v5857_v54 = vpop.f32.mrf.mxu3 }
 0x27f   : > { %v1594_v1 = vmul.f32 %v4032_v10, %v1593_v24  ;;  %v1602_v35 = vmul.f32 %v4036_v43, %v5785_v21  ;;  %v5831_v46 = vpop.eup %4037  ;;  %4041 = vpow2.f32 %v3636_v48  ;;  %vm1622_vm12 = vcmp.eq.f32.partialorder %v5835_v58, 0.0 }
 0x280   : > { %v3614_v56 = vmul.f32 %v5831_v46, %v5831_v46  ;;  %v3570_v27 = vmul.f32 -0.33333334, %v3569_v42  ;;  %4043 = vlog2.f32 %v5823_v2  ;;  %v3593_v48 = vsub.f32 %v3592_v9, %v5779_v34 }
 0x281   : > { %v1309_v10 = vpop.f32.mrf.mxu2  ;;  %v1595_v24 = vmul.f32 %v1594_v1, %v5743_v12  ;;  %v1603_v17 = vmul.f32 %v4036_v43, %v1602_v35  ;;  %vm1646_vm2 = vcmp.lt.f32.partialorder %v5578_v26, 0.0  ;;  %vm3537_vm3 = vcmp.eq.f32.partialorder %v5595_v30, inf }
 0x282   : > { %v1357_v5 = vmul.f32 0.4054651, %v1309_v10  ;;  %1231 = vmatmul.f32.gmra.mxu1 %v4461_v62  ;;  %v4040_v62 = vpop.eup %4039  ;;  %vm3574_vm4 = vweird.f32 %v5641_v59 }
 0x283   : > { %v1597_v6 = vsel %vm1596_vm8, %v5743_v12, %v1595_v24  ;;  %v1604_v38 = vmul.f32 0.5, %v1603_v17  ;;  %v1374_v12 = vmul.f32 0.5945349, %v5353_v18  ;;  %v3531_v24 = vsel %vm3511_vm7, nan, %v3530_v51 }
 0x284   : > { %v5852_v1 = vadd.f32 %v1373_v37, %v1357_v5  ;;  %v5854_v35 = vsel %vm1598_vm9, %v1599_v39, %v1597_v6  ;;  %v3549_v17 = vmul.f32 %v3548_v29, %v3547_v33  ;;  %v5865_v5 = vand.u32 2147483647, %v5826_v23 }
 0x285   : > { %8175 = vst [vmem:[#allocation72_spill] sm:$0xff] %v5854_v35  ;;  %2296 = vmatmul.f32.gmra.mxu0 %v5854_v35  ;;  %v1605_v10 = vsub.f32 1.5, %v1604_v38  ;;  %v3615_v18 = vmul.f32 %v3614_v56, %v5720_v20  ;;  %v3660_v42 = vmul.f32 -0.33333334, %v4040_v62  ;;  %v3532_v29 = vsel %vm3510_vm6, 0.0, %v3531_v24  ;;  %v5876_v51 = vpop.eup %4041 }
 0x286   : > { %2141 = vmatmul.f32.vlgmr.msrb.gmra.mxu3 %v5852_v1  ;;  %v3571_v33 = vadd.f32 %v5750_v7, %v3570_v27  ;;  %v3551_v9 = vsel %vm3550_vm11, %v5595_v30, %v3549_v17  ;;  %v4044_v38 = vpop.eup %4043  ;;  %v1611_v24 = vand.u32 2147483648, %v5785_v21  ;;  %v3594_v7 = vmul.f32 -0.33333334, %v3593_v48 }
 0x287   : > { %v1606_v37 = vmul.f32 %v4036_v43, %v1605_v10  ;;  %v3553_v43 = vand.u32 2147483648, %v5595_v30  ;;  %v5882_v10 = vpop.f32.mrf.mxu0  ;;  %v3616_v35 = vmul.f32 %v3615_v18, %v3614_v56  ;;  %4045 = vpow2.f32 %v3660_v42 }
 0x288   : > { %8176 = vst [vmem:[#allocation73_spill] sm:$0xff] %v5882_v10  ;;  %v3572_v10 = vmul.f32 %v3571_v33, %v5641_v59  ;;  %v5899_v48 = vsel %vm1622_vm12, 1e-16, %v5835_v58  ;;  %v3684_v56 = vmul.f32 -0.33333334, %v4044_v38  ;;  %v8042_v18 = vmov 1.0  }
 0x289   : > { %v1312_v39 = vpop.f32.mrf.mxu2  ;;  %v1607_v6 = vmul.f32 %v1606_v37, %v5785_v21  ;;  %v4462_v37 = vld [vmem:[%s4882_s11 + $0xd8] sm:$0xff]  ;;  %v1661_v42 = vsel %vm1645_vm10, -1.0, %v8042_v18  ;;  %v3533_v58 = vsel %vm3513_vm13, inf, %v3532_v29  ;;  %4047 = vlog2.f32 %v5865_v5 }
 0x28a   : > { %v1358_v62 = vmul.f32 0.4054651, %v1312_v39  ;;  %1234 = vmatmul.f32.gmra.mxu1 %v4462_v37  ;;  %v3638_v39 = vmul.f32 %v5876_v51, %v5876_v51  ;;  %v3573_v38 = vmul.f32 %v3572_v10, %v3571_v33  ;;  %4049 = vpow2.f32 %v3684_v56 }
 0x28b   : > { %v1609_v27 = vsel %vm1608_vm15, %v5785_v21, %v1607_v6  ;;  %v3554_v21 = vsel %vm3534_vm14, %v3553_v43, %v3551_v9  ;;  %v5915_v6 = vpop.f32.mrf.mxu3  ;;  %v1375_v9 = vmul.f32 0.5945349, %v5369_v57  ;;  %v5921_v43 = vand.u32 2147483647, %v5899_v48 }
 0x28c   : > { %v5889_v17 = vadd.f32 %v1374_v12, %v1358_v62  ;;  %v5891_v45 = vsel %vm1610_vm0, %v1611_v24, %v1609_v27  ;;  %v1097_v12 = vadd.f32 %v5710_v52, %v5605_v53  ;;  %v3595_v53 = vadd.f32 %v5779_v34, %v3594_v7  ;;  %v4463_v27 = vld [vmem:[%s4882_s11 + $0xe8] sm:$0xff] }
 0x28d   : > { %8177 = vst [vmem:[#allocation74_spill] sm:$0xff] %v5891_v45  ;;  %2299 = vmatmul.f32.gmra.mxu0 %v5891_v45  ;;  %v3617_v52 = vsub.f32 %v3616_v35, %v5831_v46  ;;  %v3555_v22 = vsel %vm3535_vm1, nan, %v3554_v21  ;;  %v3639_v8 = vmul.f32 %v3638_v39, %v5762_v36  ;;  %v5924_v29 = vpop.eup %4045  ;;  %v5926_v24 = vmul.f32 %v3533_v58, %v1661_v42 }
 0x28e   : > { %2144 = vmatmul.f32.gmra.mxu3 %v5889_v17  ;;  %vm1623_vm5 = vcmp.eq.f32.partialorder %v1097_v12, 0.0  ;;  %v1100_v57 = vadd.f32 %v5756_v13, %v5643_v63  ;;  %vm3558_vm6 = vcmp.eq.f32.partialorder %v5641_v59, 0.0  ;;  %v3556_v33 = vsel %vm3534_vm14, 0.0, %v3555_v22 }
 0x28f   : > { %8178 = vst [vmem:[#allocation75_spill] sm:$0xff] %v5926_v24  ;;  %v3577_v10 = vand.u32 2147483648, %v5641_v59  ;;  %v3596_v7 = vmul.f32 %v3595_v53, %v5670_v44  ;;  %v3618_v37 = vmul.f32 -0.33333334, %v3617_v52  ;;  %v4048_v21 = vpop.eup %4047  ;;  %v3575_v63 = vsel %vm3574_vm4, %v5641_v59, %v3573_v38 }
 0x290   : > { %v3640_v13 = vmul.f32 %v3639_v8, %v3638_v39  ;;  %v3662_v42 = vmul.f32 %v5924_v29, %v5924_v29  ;;  %v5946_v58 = vsel %vm1623_vm5, 1e-16, %v1097_v12  ;;  %v1376_v22 = vmul.f32 0.5945349, %v5394_v50  ;;  %v5958_v12 = vpop.eup %4049 }
 0x291   : > { %v1315_v62 = vpop.f32.mrf.mxu2  ;;  %4051 = vlog2.f32 %v5921_v43  ;;  %vm1624_vm7 = vcmp.eq.f32.partialorder %v1100_v57, 0.0  ;;  %v3557_v39 = vsel %vm3537_vm3, inf, %v3556_v33  ;;  %vm3559_vm8 = vcmp.lt.f32.partialorder %v5641_v59, 0.0 }
 0x292   : > { %v1359_v34 = vmul.f32 0.4054651, %v1315_v62  ;;  %v5932_v35 = vpop.f32.mrf.mxu0  ;;  %1237 = vmatmul.f32.gmra.mxu1 %v4463_v27  ;;  %v3578_v52 = vsel %vm3558_vm6, %v3577_v10, %v3575_v63  ;;  %v3597_v50 = vmul.f32 %v3596_v7, %v3595_v53  ;;  %v3619_v38 = vadd.f32 %v5831_v46, %v3618_v37 }
 0x293   : > { %v3708_v8 = vmul.f32 -0.33333334, %v4048_v21  ;;  %v5964_v62 = vand.u32 2147483647, %v5946_v58  ;;  %vm3598_vm9 = vweird.f32 %v5670_v44  ;;  %v3641_v26 = vsub.f32 %v3640_v13, %v5876_v51  ;;  %v5974_v33 = vpop.f32.mrf.mxu3  ;;  %v4464_v13 = vld [vmem:[%s4882_s11 + $0xf8] sm:$0xff] }
 0x294   : > { %v5940_v56 = vadd.f32 %v1375_v9, %v1359_v34  ;;  %v1662_v9 = vsel %vm1646_vm2, -1.0, %v8042_v18  ;;  %v3663_v30 = vmul.f32 %v3662_v42, %v5790_v55  ;;  %vm1647_vm10 = vcmp.lt.f32.partialorder %v5628_v49, 0.0 }
 0x295   : > { %2302 = vmatmul.f32.gmra.mxu0 %v5926_v24  ;;  %v5970_v34 = vsel %vm1624_vm7, 1e-16, %v1100_v57  ;;  %v1103_v53 = vadd.f32 %v5807_v47, %v5683_v0  ;;  %v5976_v10 = vmul.f32 %v3557_v39, %v1662_v9  ;;  %v3579_v37 = vsel %vm3559_vm8, nan, %v3578_v52 }
 0x296   : > { %2147 = vmatmul.f32.gmra.mxu3 %v5940_v56  ;;  %vm3582_vm11 = vcmp.eq.f32.partialorder %v5670_v44, 0.0  ;;  %v3686_v57 = vmul.f32 %v5958_v12, %v5958_v12  ;;  %v3599_v63 = vsel %vm3598_vm9, %v5670_v44, %v3597_v50  ;;  %v3601_v0 = vand.u32 2147483648, %v5670_v44 }
 0x297   : > { %8179 = vst [vmem:[#allocation76_spill] sm:$0xff] %v5976_v10  ;;  %v4052_v21 = vpop.eup %4051  ;;  %v3620_v47 = vmul.f32 %v3619_v38, %v5720_v20  ;;  %4053 = vpow2.f32 %v3708_v8  ;;  %v3642_v39 = vmul.f32 -0.33333334, %v3641_v26  ;;  %v5993_v52 = vand.u32 2147483647, %v5970_v34 }
 0x298   : > { %4055 = vlog2.f32 %v5964_v62  ;;  %vm3561_vm12 = vcmp.eq.f32.partialorder %v5641_v59, inf  ;;  %v3580_v50 = vsel %vm3558_vm6, 0.0, %v3579_v37  ;;  %vm1625_vm13 = vcmp.eq.f32.partialorder %v1103_v53, 0.0 }
 0x299   : > { %v1318_v46 = vpop.f32.mrf.mxu2  ;;  %v3687_v8 = vmul.f32 %v3686_v57, %v5823_v2  ;;  %v1663_v26 = vsel %vm1647_vm10, -1.0, %v8042_v18  ;;  %vm3583_vm14 = vcmp.lt.f32.partialorder %v5670_v44, 0.0  ;;  %v3581_v59 = vsel %vm3561_vm12, inf, %v3580_v50 }
 0x29a   : > { %v1360_v7 = vmul.f32 0.4054651, %v1318_v46  ;;  %v5978_v27 = vpop.f32.mrf.mxu0  ;;  %1240 = vmatmul.f32.gmra.mxu1 %v4464_v13  ;;  %v3664_v46 = vmul.f32 %v3663_v30, %v3662_v42  ;;  %v3732_v42 = vmul.f32 -0.33333334, %v4052_v21  ;;  %v3602_v30 = vsel %vm3582_vm11, %v3601_v0, %v3599_v63 }
 0x29b   : > { %vm3622_vm15 = vweird.f32 %v5720_v20  ;;  %v3643_v37 = vadd.f32 %v5876_v51, %v3642_v39  ;;  %vm1648_vm0 = vcmp.lt.f32.partialorder %v5649_v60, 0.0  ;;  %v6014_v21 = vsel %vm1625_vm13, 1e-16, %v1103_v53  ;;  %v6026_v39 = vpop.f32.mrf.mxu3 }
 0x29c   : > { %v5989_v9 = vadd.f32 %v1376_v22, %v1360_v7  ;;  %v1377_v22 = vmul.f32 0.5945349, %v5420_v28  ;;  %v3621_v7 = vmul.f32 %v3620_v47, %v3619_v38  ;;  %v3665_v28 = vsub.f32 %v3664_v46, %v5924_v29 }
 0x29d   : > { %2305 = vmatmul.f32.gmra.mxu0 %v5976_v10  ;;  %v6011_v13 = vpop.eup %4053  ;;  %vm3606_vm1 = vcmp.eq.f32.partialorder %v5720_v20, 0.0  ;;  %4057 = vlog2.f32 %v5993_v52  ;;  %v3603_v51 = vsel %vm3583_vm14, nan, %v3602_v30  ;;  %v3688_v47 = vmul.f32 %v3687_v8, %v3686_v57 }
 0x29e   : > { %2150 = vmatmul.f32.gmra.mxu3 %v5989_v9  ;;  %v6017_v18 = vpop.f32.mrf.mxu1  ;;  %v4056_v38 = vpop.eup %4055  ;;  %4059 = vpow2.f32 %v3732_v42  ;;  %v1106_v53 = vadd.f32 %v5857_v54, %v5722_v3  ;;  %v6028_v46 = vmul.f32 %v3581_v59, %v1663_v26  ;;  %v3623_v50 = vsel %vm3622_vm15, %v5720_v20, %v3621_v7 }
 0x29f   : > { %v3644_v10 = vmul.f32 %v3643_v37, %v5762_v36  ;;  %v3666_v30 = vmul.f32 -0.33333334, %v3665_v28  ;;  %v3710_v57 = vmul.f32 %v6011_v13, %v6011_v13  ;;  %vm3585_vm2 = vcmp.eq.f32.partialorder %v5670_v44, inf }
 0x2a0   : > { %8180 = vst [vmem:[#allocation77_spill] sm:$0xff] %v6028_v46  ;;  %v3604_v3 = vsel %vm3582_vm11, 0.0, %v3603_v51  ;;  %v3756_v54 = vmul.f32 -0.33333334, %v4056_v38  ;;  %vm1649_vm3 = vcmp.lt.f32.partialorder %v5703_v19, 0.0  ;;  %v8181_v8 = vmov 1.0  }
 0x2a1   : > { %v1321_v49 = vpop.f32.mrf.mxu2  ;;  %v1664_v42 = vsel %vm1648_vm0, -1.0, %v8181_v8  ;;  %v3689_v26 = vsub.f32 %v3688_v47, %v5958_v12  ;;  %v6051_v59 = vand.u32 2147483647, %v6014_v21  ;;  %vm1626_vm4 = vcmp.eq.f32.partialorder %v1106_v53, 0.0 }
 0x2a2   : > { %v1361_v63 = vmul.f32 0.4054651, %v1321_v49  ;;  %v6020_v0 = vpop.f32.mrf.mxu0  ;;  %v3625_v49 = vand.u32 2147483648, %v5720_v20  ;;  %vm3607_vm5 = vcmp.lt.f32.partialorder %v5720_v20, 0.0  ;;  %v3605_v38 = vsel %vm3585_vm2, inf, %v3604_v3 }
 0x2a3   : > { %v4058_v7 = vpop.eup %4057  ;;  %v3711_v60 = vmul.f32 %v3710_v57, %v5865_v5  ;;  %v1109_v51 = vadd.f32 %v5915_v6, %v5758_v32  ;;  %vm3630_vm6 = vcmp.eq.f32.partialorder %v5762_v36, 0.0  ;;  %vm3646_vm7 = vweird.f32 %v5762_v36 }
 0x2a4   : > { %v6034_v45 = vadd.f32 %v1377_v22, %v1361_v63  ;;  %v1378_v22 = vmul.f32 0.5945349, %v5445_v15  ;;  %v3626_v44 = vsel %vm3606_vm1, %v3625_v49, %v3623_v50  ;;  %v6056_v28 = vpop.eup %4059  ;;  %v3645_v15 = vmul.f32 %v3644_v10, %v3643_v37 }
 0x2a5   : > { %2308 = vmatmul.f32.gmra.mxu0 %v6028_v46  ;;  %v3667_v63 = vadd.f32 %v5924_v29, %v3666_v30  ;;  %4061 = vpow2.f32 %v3756_v54  ;;  %v3627_v50 = vsel %vm3607_vm5, nan, %v3626_v44  ;;  %v3649_v49 = vand.u32 2147483648, %v5762_v36 }
 0x2a6   : > { %2153 = vmatmul.f32.gmra.mxu3 %v6034_v45  ;;  %v3690_v10 = vmul.f32 -0.33333334, %v3689_v26  ;;  %v6067_v37 = vmul.f32 %v3605_v38, %v1664_v42  ;;  %v6069_v29 = vpop.f32.mrf.mxu1  ;;  %v3734_v32 = vmul.f32 %v6056_v28, %v6056_v28  ;;  %v3780_v6 = vmul.f32 -0.33333334, %v4058_v7 }
 0x2a7   : > { %4063 = vlog2.f32 %v6051_v59  ;;  %v3647_v3 = vsel %vm3646_vm7, %v5762_v36, %v3645_v15  ;;  %v3668_v54 = vmul.f32 %v3667_v63, %v5790_v55  ;;  %v3712_v44 = vmul.f32 %v3711_v60, %v3710_v57 }
 0x2a8   : > { %8183 = vst [vmem:[#allocation79_spill] sm:$0xff] %v6067_v37  ;;  %vm3609_vm8 = vcmp.eq.f32.partialorder %v5720_v20, inf  ;;  %v3628_v42 = vsel %vm3606_vm1, 0.0, %v3627_v50  ;;  %v6085_v26 = vsel %vm1626_vm4, 1e-16, %v1106_v53  ;;  %v3691_v57 = vadd.f32 %v5958_v12, %v3690_v10 }
 0x2a9   : > { %v1324_v47 = vpop.f32.mrf.mxu2  ;;  %vm1627_vm9 = vcmp.eq.f32.partialorder %v1109_v51, 0.0  ;;  %vm3631_vm10 = vcmp.lt.f32.partialorder %v5762_v36, 0.0  ;;  %v3650_v20 = vsel %vm3630_vm6, %v3649_v49, %v3647_v3  ;;  %v3735_v7 = vmul.f32 %v3734_v32, %v5921_v43 }
 0x2aa   : > { %v1362_v46 = vmul.f32 0.4054651, %v1324_v47  ;;  %v6064_v24 = vpop.f32.mrf.mxu0  ;;  %v6078_v47 = vpop.f32.mrf.mxu3  ;;  %v3629_v53 = vsel %vm3609_vm8, inf, %v3628_v42  ;;  %v3669_v38 = vmul.f32 %v3668_v54, %v3667_v63  ;;  %v3713_v15 = vsub.f32 %v3712_v44, %v6011_v13 }
 0x2ab   : > { %8182 = vst [vmem:[#allocation78_spill] sm:$0xff] %v6064_v24  ;;  %4065 = vpow2.f32 %v3780_v6  ;;  %vm1650_vm11 = vcmp.lt.f32.partialorder %v5747_v14, 0.0  ;;  %v6101_v19 = vand.u32 2147483647, %v6085_v26  ;;  %v1379_v50 = vmul.f32 0.5945349, %v5472_v16 }
 0x2ac   : > { %v6074_v30 = vadd.f32 %v1378_v22, %v1362_v46  ;;  %v1665_v46 = vsel %vm1649_vm3, -1.0, %v8181_v8  ;;  %v6092_v22 = vpop.eup %4061  ;;  %vm3670_vm12 = vweird.f32 %v5790_v55  ;;  %v3651_v3 = vsel %vm3631_vm10, nan, %v3650_v20 }
 0x2ad   : > { %2311 = vmatmul.f32.gmra.mxu0 %v6067_v37  ;;  %v4064_v60 = vpop.eup %4063  ;;  %v3692_v63 = vmul.f32 %v3691_v57, %v5823_v2  ;;  %v3758_v6 = vmul.f32 %v6092_v22, %v6092_v22  ;;  %v6111_v54 = vsel %vm1627_vm9, 1e-16, %v1109_v51  ;;  %v6113_v44 = vmul.f32 %v3629_v53, %v1665_v46 }
 0x2ae   : > { %2156 = vmatmul.f32.gmra.mxu3 %v6074_v30  ;;  %v3673_v42 = vand.u32 2147483648, %v5790_v55  ;;  %v3736_v37 = vmul.f32 %v3735_v7, %v3734_v32  ;;  %vm3654_vm13 = vcmp.eq.f32.partialorder %v5790_v55, 0.0  ;;  %v3714_v20 = vmul.f32 -0.33333334, %v3713_v15 }
 0x2af   : > { %8185 = vst [vmem:[#allocation81_spill] sm:$0xff] %v6113_v44  ;;  %vm3633_vm14 = vcmp.eq.f32.partialorder %v5762_v36, inf  ;;  %v3652_v51 = vsel %vm3630_vm6, 0.0, %v3651_v3  ;;  %v3804_v46 = vmul.f32 -0.33333334, %v4064_v60  ;;  %4067 = vlog2.f32 %v6101_v19 }
 0x2b0   : > { %v1112_v7 = vadd.f32 %v5974_v33, %v5799_v11  ;;  %v1380_v53 = vmul.f32 0.5945349, %v5497_v40  ;;  %v3759_v15 = vmul.f32 %v3758_v6, %v5964_v62  ;;  %vm3655_vm15 = vcmp.lt.f32.partialorder %v5790_v55, 0.0 }
 0x2b1   : > { %v1327_v12 = vpop.f32.mrf.mxu2  ;;  %v6127_v32 = vpop.eup %4065  ;;  %vm3694_vm0 = vweird.f32 %v5823_v2  ;;  %v6142_v11 = vand.u32 2147483647, %v6111_v54  ;;  %v1666_v40 = vsel %vm1650_vm11, -1.0, %v8181_v8  ;;  %v3653_v33 = vsel %vm3633_vm14, inf, %v3652_v51 }
 0x2b2   : > { %v1363_v10 = vmul.f32 0.4054651, %v1327_v12  ;;  %v6105_v49 = vpop.f32.mrf.mxu0  ;;  %v3671_v12 = vsel %vm3670_vm12, %v5790_v55, %v3669_v38  ;;  %v3693_v38 = vmul.f32 %v3692_v63, %v3691_v57  ;;  %v3715_v57 = vadd.f32 %v6011_v13, %v3714_v20 }
 0x2b3   : > { %8184 = vst [vmem:[#allocation80_spill] sm:$0xff] %v6105_v49  ;;  %v6124_v49 = vpop.f32.mrf.mxu1  ;;  %v3674_v60 = vsel %vm3654_vm13, %v3673_v42, %v3671_v12  ;;  %vm3678_vm1 = vcmp.eq.f32.partialorder %v5823_v2, 0.0  ;;  %v3697_v63 = vand.u32 2147483648, %v5823_v2  ;;  %4069 = vpow2.f32 %v3804_v46 }
 0x2b4   : > { %v6116_v16 = vadd.f32 %v1379_v50, %v1363_v10  ;;  %v6134_v50 = vpop.f32.mrf.mxu3  ;;  %v3737_v10 = vsub.f32 %v3736_v37, %v6056_v28  ;;  %v3782_v37 = vmul.f32 %v6127_v32, %v6127_v32  ;;  %v3695_v14 = vsel %vm3694_vm0, %v5823_v2, %v3693_v38 }
 0x2b5   : > { %2314 = vmatmul.f32.gmra.mxu0 %v6113_v44  ;;  %v3675_v44 = vsel %vm3655_vm15, nan, %v3674_v60  ;;  %v3760_v24 = vmul.f32 %v3759_v15, %v3758_v6  ;;  %v4068_v36 = vpop.eup %4067  ;;  %vm1651_vm2 = vcmp.lt.f32.partialorder %v5768_v25, 0.0  ;;  %vm1628_vm3 = vcmp.eq.f32.partialorder %v1112_v7, 0.0 }
 0x2b6   : > { %8186 = vst [vmem:[#allocation82_spill] sm:$0xff] %v6116_v16  ;;  %2159 = vmatmul.f32.gmra.mxu3 %v6116_v16  ;;  %v6158_v13 = vmul.f32 %v3653_v33, %v1666_v40  ;;  %v3738_v20 = vmul.f32 -0.33333334, %v3737_v10  ;;  %v1197_v16 = vadd.f32 %v6017_v18, %v6026_v39  ;;  %vm3657_vm4 = vcmp.eq.f32.partialorder %v5790_v55, inf }
 0x2b7   : > { %v3716_v46 = vmul.f32 %v3715_v57, %v5865_v5  ;;  %v3676_v6 = vsel %vm3654_vm13, 0.0, %v3675_v44  ;;  %vm3679_vm5 = vcmp.lt.f32.partialorder %v5823_v2, 0.0  ;;  %v3698_v38 = vsel %vm3678_vm1, %v3697_v63, %v3695_v14 }
 0x2b8   : > { %8188 = vst [vmem:[#allocation84_spill] sm:$0xff] %v6158_v13  ;;  %v6173_v15 = vsel %vm1628_vm3, 1e-16, %v1112_v7  ;;  %v3761_v18 = vsub.f32 %v3760_v24, %v6092_v22  ;;  %v3828_v39 = vmul.f32 -0.33333334, %v4068_v36  ;;  %4071 = vlog2.f32 %v6142_v11 }
 0x2b9   : > { %v1330_v3 = vpop.f32.mrf.mxu2  ;;  %v6178_v60 = vpop.eup %4069  ;;  %vm1652_vm6 = vcmp.lt.f32.partialorder %v5795_v31, 0.0  ;;  %v1381_v44 = vmul.f32 0.5945349, %v5527_v41  ;;  %v1667_v10 = vsel %vm1651_vm2, -1.0, %v8181_v8  ;;  %v3739_v7 = vadd.f32 %v6056_v28, %v3738_v20 }
 0x2ba   : > { %v1364_v42 = vmul.f32 0.4054651, %v1330_v3  ;;  %v6154_v12 = vpop.f32.mrf.mxu0  ;;  %v6188_v33 = vmax.f32 %v1197_v16, 1e-16  ;;  %v3677_v24 = vsel %vm3657_vm4, inf, %v3676_v6  ;;  %v3699_v3 = vsel %vm3679_vm5, nan, %v3698_v38 }
 0x2bb   : > { %8187 = vst [vmem:[#allocation83_spill] sm:$0xff] %v6154_v12  ;;  %v6185_v40 = vpop.f32.mrf.mxu1  ;;  %v3717_v63 = vmul.f32 %v3716_v46, %v3715_v57  ;;  %vm3681_vm7 = vcmp.eq.f32.partialorder %v5823_v2, inf  ;;  %vm3718_vm8 = vweird.f32 %v5865_v5  ;;  %v3762_v55 = vmul.f32 -0.33333334, %v3761_v18  ;;  %v8191_v2 = vld [vmem:[#allocation57_spill] sm:$0xff] }
 0x2bc   : > { %v6160_v51 = vadd.f32 %v1380_v53, %v1364_v42  ;;  %v3783_v53 = vmul.f32 %v3782_v37, %v5993_v52  ;;  %v6195_v42 = vand.u32 2147483647, %v6173_v15  ;;  %v6197_v41 = vpop.f32.mrf.mxu3  ;;  %v3806_v36 = vmul.f32 %v6178_v60, %v6178_v60 }
 0x2bd   : > { %2317 = vmatmul.f32.gmra.mxu0 %v6158_v13  ;;  %4073 = vpow2.f32 %v3828_v39  ;;  %v6205_v57 = vmul.f32 %v3677_v24, %v1667_v10  ;;  %v3700_v20 = vsel %vm3678_vm1, 0.0, %v3699_v3  ;;  %v3721_v46 = vand.u32 2147483648, %v5865_v5 }
 0x2be   : > { %2162 = vmatmul.f32.gmra.mxu3 %v6160_v51  ;;  %v3784_v28 = vmul.f32 %v3783_v53, %v3782_v37  ;;  %v3740_v6 = vmul.f32 %v3739_v7, %v5921_v43  ;;  %v4072_v38 = vpop.eup %4071  ;;  %4075 = vrsqrt.f32 %v6188_v33  ;;  %vm3702_vm9 = vcmp.eq.f32.partialorder %v5865_v5, 0.0 }
 0x2bf   : > { %8190 = vst [vmem:[#allocation86_spill] sm:$0xff] %v6205_v57  ;;  %v3719_v53 = vsel %vm3718_vm8, %v5865_v5, %v3717_v63  ;;  %v1382_v18 = vmul.f32 0.5945349, %v5550_v4  ;;  %v1668_v39 = vsel %vm1652_vm6, -1.0, %v8181_v8  ;;  %4077 = vlog2.f32 %v6195_v42 }
 0x2c0   : > { %v3785_v10 = vsub.f32 %v3784_v28, %v6127_v32  ;;  %vm3703_vm10 = vcmp.lt.f32.partialorder %v5865_v5, 0.0  ;;  %v3763_v24 = vadd.f32 %v6092_v22, %v3762_v55  ;;  %v3807_v3 = vmul.f32 %v3806_v36, %v6051_v59  ;;  %v8192_v22 = vld [vmem:[#allocation60_spill] sm:$0xff] }
 0x2c1   : > { %v1333_v25 = vpop.f32.mrf.mxu2  ;;  %v1200_v4 = vadd.f32 %v6069_v29, %v6078_v47  ;;  %v3722_v31 = vsel %vm3702_vm9, %v3721_v46, %v3719_v53  ;;  %v3741_v63 = vmul.f32 %v3740_v6, %v3739_v7  ;;  %vm3742_vm11 = vweird.f32 %v5921_v43 }
 0x2c2   : > { %v1365_v16 = vmul.f32 0.4054651, %v1333_v25  ;;  %v6201_v14 = vpop.f32.mrf.mxu0  ;;  %v3852_v25 = vmul.f32 -0.33333334, %v4072_v38  ;;  %v6241_v55 = vmul.f32 0.5945349, %v8192_v22  ;;  %v3764_v53 = vmul.f32 %v3763_v24, %v5964_v62 }
 0x2c3   : > { %8189 = vst [vmem:[#allocation85_spill] sm:$0xff] %v6201_v14  ;;  %v6233_v28 = vpop.eup %4073  ;;  %vm3726_vm12 = vcmp.eq.f32.partialorder %v5921_v43, 0.0  ;;  %v3745_v29 = vand.u32 2147483648, %v5921_v43  ;;  %v6247_v47 = vpop.f32.mrf.mxu1  ;;  %v3786_v7 = vmul.f32 -0.33333334, %v3785_v10  ;;  %v3723_v38 = vsel %vm3703_vm10, nan, %v3722_v31 }
 0x2c4   : > { %v6212_v37 = vadd.f32 %v1381_v44, %v1365_v16  ;;  %v3701_v44 = vsel %vm3681_vm7, inf, %v3700_v20  ;;  %v1383_v16 = vmul.f32 0.5945349, %v5588_v61  ;;  %v6237_v20 = vmul.f32 0.5945349, %v8191_v2  ;;  %v6249_v46 = vpop.eup %4075 }
 0x2c5   : > { %2320 = vmatmul.f32.gmra.mxu0 %v6205_v57  ;;  %v6243_v13 = vmul.f32 %v3701_v44, %v1668_v39  ;;  %v3808_v2 = vmul.f32 %v3807_v3, %v3806_v36  ;;  %v4078_v39 = vpop.eup %4077  ;;  %v6256_v44 = vpop.f32.mrf.mxu3  ;;  %v6258_v22 = vmax.f32 %v1200_v4, 1e-16  ;;  %v3743_v10 = vsel %vm3742_vm11, %v5921_v43, %v3741_v63  ;;  %v8196_v36 = vld [vmem:[#allocation62_spill] sm:$0xff] }
 0x2c6   : > { %2165 = vmatmul.f32.gmra.mxu3 %v6212_v37  ;;  %4079 = vpow2.f32 %v3852_v25  ;;  %vm1653_vm13 = vcmp.lt.f32.partialorder %v5826_v23, 0.0  ;;  %vm3705_vm14 = vcmp.eq.f32.partialorder %v5865_v5, inf  ;;  %v6270_v3 = vmul.f32 0.5945349, %v8196_v36 }
 0x2c7   : > { %8193 = vst [vmem:[#allocation57_spill] sm:$0xff] %v6243_v13  ;;  %v1742_v4 = vmul.f32 %v6249_v46, %v6188_v33  ;;  %v3724_v31 = vsel %vm3702_vm9, 0.0, %v3723_v38  ;;  %vm3727_vm15 = vcmp.lt.f32.partialorder %v5921_v43, 0.0  ;;  %v3787_v63 = vadd.f32 %v6127_v32, %v3786_v7 }
 0x2c8   : > { %v3765_v25 = vmul.f32 %v3764_v53, %v3763_v24  ;;  %v3876_v36 = vmul.f32 -0.33333334, %v4078_v39  ;;  %4081 = vrsqrt.f32 %v6258_v22  ;;  %vm3766_vm0 = vweird.f32 %v5964_v62  ;;  %v8197_v24 = vld [vmem:[#allocation64_spill] sm:$0xff] }
 0x2c9   : > { %v1336_v57 = vpop.f32.mrf.mxu2  ;;  %v1669_v32 = vsel %vm1653_vm13, -1.0, %v8181_v8  ;;  %vm3750_vm1 = vcmp.eq.f32.partialorder %v5964_v62, 0.0  ;;  %v6295_v7 = vmul.f32 0.5945349, %v8197_v24  ;;  %v3769_v39 = vand.u32 2147483648, %v5964_v62 }
 0x2ca   : > { %v1366_v61 = vmul.f32 0.4054651, %v1336_v57  ;;  %v6251_v6 = vpop.f32.mrf.mxu0  ;;  %v3830_v57 = vmul.f32 %v6233_v28, %v6233_v28  ;;  %v3788_v23 = vmul.f32 %v3787_v63, %v5993_v52  ;;  %4083 = vpow2.f32 %v3876_v36 }
 0x2cb   : > { %8194 = vst [vmem:[#allocation60_spill] sm:$0xff] %v6251_v6  ;;  %vm1654_vm2 = vcmp.lt.f32.partialorder %v5899_v48, 0.0  ;;  %v6312_v12 = vpop.f32.mrf.mxu1  ;;  %vm3729_vm3 = vcmp.eq.f32.partialorder %v5921_v43, inf  ;;  %vm1655_vm4 = vcmp.lt.f32.partialorder %v5946_v58, 0.0  ;;  %vm3751_vm5 = vcmp.lt.f32.partialorder %v5964_v62, 0.0 }
 0x2cc   : > { %v6266_v6 = vadd.f32 %v1382_v18, %v1366_v61  ;;  %v3746_v18 = vsel %vm3726_vm12, %v3745_v29, %v3743_v10  ;;  %v3809_v61 = vsub.f32 %v3808_v2, %v6178_v60  ;;  %v3831_v38 = vmul.f32 %v3830_v57, %v6101_v19  ;;  %v6297_v53 = vpop.eup %4079 }
 0x2cd   : > { %2323 = vmatmul.f32.gmra.mxu0 %v6243_v13  ;;  %v1203_v13 = vadd.f32 %v6124_v49, %v6134_v50  ;;  %v3725_v29 = vsel %vm3705_vm14, inf, %v3724_v31  ;;  %v1743_v49 = vmul.f32 %v6249_v46, %v1742_v4  ;;  %v3747_v2 = vsel %vm3727_vm15, nan, %v3746_v18 }
 0x2ce   : > { %8195 = vst [vmem:[#allocation87_spill] sm:$0xff] %v6266_v6  ;;  %2168 = vmatmul.f32.gmra.mxu3 %v6266_v6  ;;  %v3767_v31 = vsel %vm3766_vm0, %v5964_v62, %v3765_v25  ;;  %v3810_v14 = vmul.f32 -0.33333334, %v3809_v61  ;;  %v6310_v4 = vmul.f32 %v3725_v29, %v1669_v32  ;;  %v3832_v18 = vmul.f32 %v3831_v38, %v3830_v57  ;;  %v6321_v61 = vpop.eup %4081 }
 0x2cf   : > { %v6308_v24 = vmax.f32 %v1203_v13, 1e-16  ;;  %v3854_v25 = vmul.f32 %v6297_v53, %v6297_v53  ;;  %v6324_v13 = vpop.f32.mrf.mxu3  ;;  %v3789_v57 = vmul.f32 %v3788_v23, %v3787_v63  ;;  %v1206_v36 = vadd.f32 %v6185_v40, %v6197_v41 }
 0x2d0   : > { %8199 = vst [vmem:[#allocation64_spill] sm:$0xff] %v6310_v4  ;;  %vm3790_vm6 = vweird.f32 %v5993_v52  ;;  %v3811_v38 = vadd.f32 %v6178_v60, %v3810_v14  ;;  %v1744_v32 = vmul.f32 0.5, %v1743_v49  ;;  %v1670_v29 = vsel %vm1654_vm2, -1.0, %v8181_v8 }
 0x2d1   : > { %v1339_v50 = vpop.f32.mrf.mxu2  ;;  %4085 = vrsqrt.f32 %v6308_v24  ;;  %v3833_v63 = vsub.f32 %v3832_v18, %v6233_v28  ;;  %v1754_v40 = vmul.f32 %v6321_v61, %v6258_v22  ;;  %v3793_v60 = vand.u32 2147483648, %v5993_v52 }
 0x2d2   : > { %v1367_v10 = vmul.f32 0.4054651, %v1339_v50  ;;  %v6304_v5 = vpop.f32.mrf.mxu0  ;;  %v3748_v50 = vsel %vm3726_vm12, 0.0, %v3747_v2  ;;  %v3855_v14 = vmul.f32 %v3854_v25, %v6142_v11  ;;  %vm3753_vm7 = vcmp.eq.f32.partialorder %v5964_v62, inf }
 0x2d3   : > { %8198 = vst [vmem:[#allocation62_spill] sm:$0xff] %v6304_v5  ;;  %v3749_v2 = vsel %vm3729_vm3, inf, %v3748_v50  ;;  %vm3774_vm8 = vcmp.eq.f32.partialorder %v5993_v52, 0.0  ;;  %vm3775_vm9 = vcmp.lt.f32.partialorder %v5993_v52, 0.0  ;;  %v3791_v48 = vsel %vm3790_vm6, %v5993_v52, %v3789_v57 }
 0x2d4   : > { %v6314_v6 = vadd.f32 %v1383_v16, %v1367_v10  ;;  %v3770_v16 = vsel %vm3750_vm1, %v3769_v39, %v3767_v31  ;;  %v6342_v39 = vpop.eup %4083  ;;  %v6354_v43 = vmax.f32 %v1206_v36, 1e-16  ;;  %v3812_v31 = vmul.f32 %v3811_v38, %v6051_v59 }
 0x2d5   : > { %2326 = vmatmul.f32.gmra.mxu0 %v6310_v4  ;;  %v3771_v41 = vsel %vm3751_vm5, nan, %v3770_v16  ;;  %v1745_v18 = vsub.f32 1.5, %v1744_v32  ;;  %v6359_v50 = vmul.f32 %v3749_v2, %v1670_v29  ;;  %v3834_v4 = vmul.f32 -0.33333334, %v3833_v63  ;;  %v6378_v29 = vpop.f32.mrf.mxu1 }
 0x2d6   : > { %8200 = vst [vmem:[#allocation88_spill] sm:$0xff] %v6314_v6  ;;  %2171 = vmatmul.f32.gmra.mxu3 %v6314_v6  ;;  %v3772_v16 = vsel %vm3750_vm1, 0.0, %v3771_v41  ;;  %v3878_v5 = vmul.f32 %v6342_v39, %v6342_v39  ;;  %v1755_v6 = vmul.f32 %v6321_v61, %v1754_v40  ;;  %v3794_v36 = vsel %vm3774_vm8, %v3793_v60, %v3791_v48 }
 0x2d7   : > { %8202 = vst [vmem:[#allocation90_spill] sm:$0xff] %v6359_v50  ;;  %vm1656_vm10 = vcmp.lt.f32.partialorder %v5970_v34, 0.0  ;;  %v1671_v32 = vsel %vm1655_vm4, -1.0, %v8181_v8  ;;  %vm3814_vm11 = vweird.f32 %v6051_v59  ;;  %4087 = vrsqrt.f32 %v6354_v43  ;;  %v6389_v41 = vpop.f32.mrf.mxu3 }
 0x2d8   : > { %v3813_v63 = vmul.f32 %v3812_v31, %v3811_v38  ;;  %v1746_v40 = vmul.f32 %v6249_v46, %v1745_v18  ;;  %v1209_v58 = vadd.f32 %v6247_v47, %v6256_v44  ;;  %v3795_v60 = vsel %vm3775_vm9, nan, %v3794_v36 }
 0x2d9   : > { %v1342_v49 = vpop.f32.mrf.mxu2  ;;  %v3879_v48 = vmul.f32 %v3878_v5, %v6195_v42  ;;  %vm3777_vm12 = vcmp.eq.f32.partialorder %v5993_v52, inf  ;;  %v1756_v46 = vmul.f32 0.5, %v1755_v6  ;;  %v1672_v47 = vsel %vm1656_vm10, -1.0, %v8181_v8 }
 0x2da   : > { %v1368_v23 = vmul.f32 0.4054651, %v1342_v49  ;;  %v6356_v10 = vpop.f32.mrf.mxu0  ;;  %v3856_v49 = vmul.f32 %v3855_v14, %v3854_v25  ;;  %v3773_v25 = vsel %vm3753_vm7, inf, %v3772_v16  ;;  %v3835_v14 = vadd.f32 %v6233_v28, %v3834_v4 }
 0x2db   : > { %8201 = vst [vmem:[#allocation89_spill] sm:$0xff] %v6356_v10  ;;  %v6371_v10 = vpop.eup %4085  ;;  %v6401_v31 = vmul.f32 %v3773_v25, %v1671_v32  ;;  %vm3798_vm13 = vcmp.eq.f32.partialorder %v6051_v59, 0.0  ;;  %v3817_v28 = vand.u32 2147483648, %v6051_v59  ;;  %v3796_v18 = vsel %vm3774_vm8, 0.0, %v3795_v60 }
 0x2dc   : > { %v6367_v57 = vadd.f32 %v6237_v20, %v1368_v23  ;;  %v8203_v20 = vld [vmem:[#allocation67_spill] sm:$0xff]  ;;  %v1766_v23 = vmul.f32 %v6371_v10, %v6308_v24  ;;  %v3857_v62 = vsub.f32 %v3856_v49, %v6297_v53  ;;  %v3815_v6 = vsel %vm3814_vm11, %v6051_v59, %v3813_v63 }
 0x2dd   : > { %2329 = vmatmul.f32.gmra.mxu0 %v6359_v50  ;;  %v6382_v2 = vmul.f32 0.5945349, %v8203_v20  ;;  %8204 = vst [vmem:[#allocation67_spill] sm:$0xff] %v6401_v31  ;;  %v1747_v16 = vmul.f32 %v1746_v40, %v6188_v33  ;;  %v6416_v36 = vmax.f32 %v1209_v58, 1e-16  ;;  %v3836_v34 = vmul.f32 %v3835_v14, %v6101_v19  ;;  %v6420_v32 = vpop.eup %4087 }
 0x2de   : > { %2174 = vmatmul.f32.gmra.mxu3 %v6367_v57  ;;  %v3880_v49 = vmul.f32 %v3879_v48, %v3878_v5  ;;  %vm1748_vm14 = vcmp.eq.f32.partialorder %v6188_v33, inf  ;;  %v1767_v20 = vmul.f32 %v6371_v10, %v1766_v23  ;;  %v3858_v60 = vmul.f32 -0.33333334, %v3857_v62  ;;  %v6442_v48 = vpop.f32.mrf.mxu1 }
 0x2df   : > { %v3797_v63 = vsel %vm3777_vm12, inf, %v3796_v18  ;;  %vm3799_vm15 = vcmp.lt.f32.partialorder %v6051_v59, 0.0  ;;  %v3818_v5 = vsel %vm3798_vm13, %v3817_v28, %v3815_v6  ;;  %vm3838_vm0 = vweird.f32 %v6101_v19 }
 0x2e0   : > { %v1749_v40 = vsel %vm1748_vm14, %v6188_v33, %v1747_v16  ;;  %vm1750_vm1 = vcmp.eq.f32.partialorder %v6188_v33, 0.0  ;;  %v1751_v58 = vand.u32 2147483648, %v6188_v33  ;;  %v1778_v52 = vmul.f32 %v6420_v32, %v6354_v43 }
 0x2e1   : > { %v1345_v38 = vpop.f32.mrf.mxu2  ;;  %4089 = vrsqrt.f32 %v6416_v36  ;;  %v3837_v23 = vmul.f32 %v3836_v34, %v3835_v14  ;;  %v3881_v62 = vsub.f32 %v3880_v49, %v6342_v39  ;;  %v3859_v28 = vadd.f32 %v6297_v53, %v3858_v60 }
 0x2e2   : > { %v1369_v44 = vmul.f32 0.4054651, %v1345_v38  ;;  %v6408_v4 = vpop.f32.mrf.mxu0  ;;  %v1757_v38 = vsub.f32 1.5, %v1756_v46  ;;  %v3819_v46 = vsel %vm3799_vm15, nan, %v3818_v5  ;;  %vm1657_vm2 = vcmp.lt.f32.partialorder %v6014_v21, 0.0 }
 0x2e3   : > { %vm3801_vm3 = vcmp.eq.f32.partialorder %v6051_v59, inf  ;;  %vm3822_vm4 = vcmp.eq.f32.partialorder %v6101_v19, 0.0  ;;  %v3841_v6 = vand.u32 2147483648, %v6101_v19  ;;  %v6457_v53 = vmul.f32 %v3797_v63, %v1672_v47 }
 0x2e4   : > { %v6424_v25 = vadd.f32 %v6241_v55, %v1369_v44  ;;  %v1212_v55 = vadd.f32 %v6312_v12, %v6324_v13  ;;  %v1758_v12 = vmul.f32 %v6321_v61, %v1757_v38  ;;  %v1768_v13 = vmul.f32 0.5, %v1767_v20  ;;  %v6448_v44 = vpop.f32.mrf.mxu3 }
 0x2e5   : > { %2332 = vmatmul.f32.gmra.mxu0 %v6401_v31  ;;  %8206 = vst [vmem:[#allocation92_spill] sm:$0xff] %v6457_v53  ;;  %v6461_v61 = vsel %vm1750_vm1, %v1751_v58, %v1749_v40  ;;  %v1779_v49 = vmul.f32 %v6420_v32, %v1778_v52  ;;  %v3820_v20 = vsel %vm3798_vm13, 0.0, %v3819_v46  ;;  %v3839_v60 = vsel %vm3838_vm0, %v6101_v19, %v3837_v23 }
 0x2e6   : > { %8205 = vst [vmem:[#allocation91_spill] sm:$0xff] %v6424_v25  ;;  %2177 = vmatmul.f32.gmra.mxu3 %v6424_v25  ;;  %v6453_v14 = vmax.f32 %v1212_v55, 1e-16  ;;  %v3882_v38 = vmul.f32 -0.33333334, %v3881_v62  ;;  %v3860_v47 = vmul.f32 %v3859_v28, %v6142_v11  ;;  %v1759_v63 = vmul.f32 %v1758_v12, %v6258_v22 }
 0x2e7   : > { %v1769_v33 = vsub.f32 1.5, %v1768_v13  ;;  %v6474_v55 = vpop.eup %4089  ;;  %vm1658_vm5 = vcmp.lt.f32.partialorder %v6085_v26, 0.0  ;;  %v1215_v40 = vadd.f32 %v6378_v29, %v6389_v41  ;;  %4091 = vrsqrt.f32 %v6461_v61 }
 0x2e8   : > { %vm1760_vm6 = vcmp.eq.f32.partialorder %v6258_v22, inf  ;;  %4093 = vrsqrt.f32 %v6453_v14  ;;  %v3821_v58 = vsel %vm3801_vm3, inf, %v3820_v20  ;;  %vm3823_vm7 = vcmp.lt.f32.partialorder %v6101_v19, 0.0 }
 0x2e9   : > { %v1348_v18 = vpop.f32.mrf.mxu2  ;;  %v3842_v29 = vsel %vm3822_vm4, %v3841_v6, %v3839_v60  ;;  %v3883_v41 = vadd.f32 %v6342_v39, %v3882_v38  ;;  %vm1762_vm8 = vcmp.eq.f32.partialorder %v6258_v22, 0.0  ;;  %v1763_v52 = vand.u32 2147483648, %v6258_v22 }
 0x2ea   : > { %v1370_v16 = vmul.f32 0.4054651, %v1348_v18  ;;  %v6455_v34 = vpop.f32.mrf.mxu0  ;;  %v3861_v23 = vmul.f32 %v3860_v47, %v3859_v28  ;;  %v1761_v62 = vsel %vm1760_vm6, %v6258_v22, %v1759_v63  ;;  %v1770_v21 = vmul.f32 %v6371_v10, %v1769_v33  ;;  %v6502_v18 = vpop.f32.mrf.mxu1 }
 0x2eb   : > { %v1780_v46 = vmul.f32 0.5, %v1779_v49  ;;  %v1790_v59 = vmul.f32 %v6474_v55, %v6416_v36  ;;  %v6499_v12 = vmax.f32 %v1215_v40, 1e-16  ;;  %vm3825_vm9 = vcmp.eq.f32.partialorder %v6101_v19, inf }
 0x2ec   : > { %v6470_v5 = vadd.f32 %v6270_v3, %v1370_v16  ;;  %v1673_v3 = vsel %vm1657_vm2, -1.0, %v8181_v8  ;;  %vm3862_vm10 = vweird.f32 %v6142_v11  ;;  %v1674_v10 = vsel %vm1658_vm5, -1.0, %v8181_v8  ;;  %v1155_v20 = vpop.f32.mrf.mxu3 }
 0x2ed   : > { %2335 = vmatmul.f32.gmra.mxu0 %v6457_v53  ;;  %v3843_v28 = vsel %vm3823_vm7, nan, %v3842_v29  ;;  %v3865_v16 = vand.u32 2147483648, %v6142_v11  ;;  %v6513_v49 = vpop.eup %4091  ;;  %v6515_v60 = vmul.f32 %v3821_v58, %v1673_v3  ;;  %vm3846_vm11 = vcmp.eq.f32.partialorder %v6142_v11, 0.0 }
 0x2ee   : > { %8207 = vst [vmem:[#allocation93_spill] sm:$0xff] %v6470_v5  ;;  %2180 = vmatmul.f32.gmra.mxu3 %v6470_v5  ;;  %v3884_v38 = vmul.f32 %v3883_v41, %v6195_v42  ;;  %v6521_v47 = vsel %vm1762_vm8, %v1763_v52, %v1761_v62  ;;  %v6523_v26 = vpop.eup %4093  ;;  %v3863_v33 = vsel %vm3862_vm10, %v6142_v11, %v3861_v23  ;;  %v1781_v29 = vsub.f32 1.5, %v1780_v46 }
 0x2ef   : > { %8208 = vst [vmem:[#allocation94_spill] sm:$0xff] %v6515_v60  ;;  %v1771_v40 = vmul.f32 %v1770_v21, %v6308_v24  ;;  %v1791_v3 = vmul.f32 %v6474_v55, %v1790_v59  ;;  %4095 = vrsqrt.f32 %v6499_v12  ;;  %v3844_v22 = vsel %vm3822_vm4, 0.0, %v3843_v28 }
 0x2f0   : > { %vm1772_vm12 = vcmp.eq.f32.partialorder %v6308_v24, inf  ;;  %vm3847_vm13 = vcmp.lt.f32.partialorder %v6142_v11, 0.0  ;;  %vm3886_vm14 = vweird.f32 %v6195_v42  ;;  %4097 = vrsqrt.f32 %v6521_v47 }
 0x2f1   : > { %v1351_v13 = vpop.f32.mrf.mxu2  ;;  %v1218_v58 = vadd.f32 %v6442_v48, %v6448_v44  ;;  %v3866_v52 = vsel %vm3846_vm11, %v3865_v16, %v3863_v33  ;;  %v3885_v23 = vmul.f32 %v3884_v38, %v3883_v41  ;;  %v1775_v62 = vand.u32 2147483648, %v6308_v24 }
 0x2f2   : > { %v1371_v39 = vmul.f32 0.4054651, %v1351_v13  ;;  %v6505_v6 = vpop.f32.mrf.mxu0  ;;  %v3845_v21 = vsel %vm3825_vm9, inf, %v3844_v22  ;;  %v1773_v46 = vsel %vm1772_vm12, %v6308_v24, %v1771_v40  ;;  %vm1774_vm15 = vcmp.eq.f32.partialorder %v6308_v24, 0.0  ;;  %v1223_v40 = vpop.f32.mrf.mxu1 }
 0x2f3   : > { %v1782_v59 = vmul.f32 %v6420_v32, %v1781_v29  ;;  %vm1659_vm0 = vcmp.lt.f32.partialorder %v6111_v54, 0.0  ;;  %v1802_v48 = vmul.f32 %v6523_v26, %v6453_v14  ;;  %vm3870_vm1 = vcmp.eq.f32.partialorder %v6195_v42, 0.0 }
 0x2f4   : > { %v6526_v63 = vadd.f32 %v6295_v7, %v1371_v39  ;;  %v1934_v7 = vmul.f32 %v6513_v49, %v6461_v61  ;;  %v1792_v41 = vmul.f32 0.5, %v1791_v3  ;;  %v3867_v19 = vsel %vm3847_vm13, nan, %v3866_v52 }
 0x2f5   : > { %2338 = vmatmul.f32.gmra.mxu0 %v6515_v60  ;;  %v3889_v28 = vand.u32 2147483648, %v6195_v42  ;;  %v6562_v32 = vpop.eup %4095  ;;  %v6564_v38 = vmax.f32 %v1218_v58, 1e-16  ;;  %v6566_v33 = vmul.f32 %v3845_v21, %v1674_v10  ;;  %v3887_v29 = vsel %vm3886_vm14, %v6195_v42, %v3885_v23  ;;  %v1158_v58 = vpop.f32.mrf.mxu3 }
 0x2f6   : > { %8209 = vst [vmem:[#allocation95_spill] sm:$0xff] %v6526_v63  ;;  %2183 = vmatmul.f32.gmra.mxu3 %v6526_v63  ;;  %v1935_v16 = vmul.f32 %v6513_v49, %v1934_v7  ;;  %v6573_v3 = vsel %vm1774_vm15, %v1775_v62, %v1773_v46  ;;  %v6575_v22 = vpop.eup %4097  ;;  %v1675_v7 = vsel %vm1659_vm0, -1.0, %v8181_v8  ;;  %vm3849_vm2 = vcmp.eq.f32.partialorder %v6142_v11, inf }
 0x2f7   : > { %8210 = vst [vmem:[#allocation96_spill] sm:$0xff] %v6566_v33  ;;  %v1783_v10 = vmul.f32 %v1782_v59, %v6354_v43  ;;  %v1803_v23 = vmul.f32 %v6523_v26, %v1802_v48  ;;  %v3868_v24 = vsel %vm3846_vm11, 0.0, %v3867_v19  ;;  %vm1784_vm3 = vcmp.eq.f32.partialorder %v6354_v43, inf }
 0x2f8   : > { %vm3871_vm4 = vcmp.lt.f32.partialorder %v6195_v42, 0.0  ;;  %v3890_v54 = vsel %vm3870_vm1, %v3889_v28, %v3887_v29  ;;  %v1936_v62 = vmul.f32 0.5, %v1935_v16  ;;  %4099 = vrsqrt.f32 %v6573_v3 }
 0x2f9   : > { %v1354_v44 = vpop.f32.mrf.mxu2  ;;  %4101 = vrsqrt.f32 %v6564_v38  ;;  %v1221_v21 = vadd.f32 %v6502_v18, %v1155_v20  ;;  %v1946_v46 = vmul.f32 %v6575_v22, %v6521_v47  ;;  %v1787_v59 = vand.u32 2147483648, %v6354_v43 }
 0x2fa   : > { %v1372_v13 = vmul.f32 0.4054651, %v1354_v44  ;;  %v6556_v39 = vpop.f32.mrf.mxu0  ;;  %v1814_v48 = vmul.f32 %v6562_v32, %v6499_v12  ;;  %v3869_v44 = vsel %vm3849_vm2, inf, %v3868_v24  ;;  %vm1786_vm5 = vcmp.eq.f32.partialorder %v6354_v43, 0.0 }
 0x2fb   : > { %v1804_v19 = vmul.f32 0.5, %v1803_v23  ;;  %v3891_v18 = vsel %vm3871_vm4, nan, %v3890_v54  ;;  %v1937_v20 = vsub.f32 1.5, %v1936_v62  ;;  %v6609_v16 = vmax.f32 %v1221_v21, 1e-16 }
 0x2fc   : > { %v6578_v52 = vadd.f32 %v6382_v2, %v1372_v13  ;;  %v1793_v2 = vsub.f32 1.5, %v1792_v41  ;;  %v1785_v41 = vsel %vm1784_vm3, %v6354_v43, %v1783_v10  ;;  %v6611_v29 = vmul.f32 %v3869_v44, %v1675_v7  ;;  %v1226_v10 = vpop.f32.mrf.mxu1 }
 0x2fd   : > { %2341 = vmatmul.f32.gmra.mxu0 %v6566_v33  ;;  %v6614_v63 = vsel %vm1786_vm5, %v1787_v59, %v1785_v41  ;;  %vm1660_vm6 = vcmp.lt.f32.partialorder %v6173_v15, 0.0  ;;  %v1815_v43 = vmul.f32 %v6562_v32, %v1814_v48  ;;  %vm3873_vm7 = vcmp.eq.f32.partialorder %v6195_v42, inf  ;;  %v1161_v15 = vpop.f32.mrf.mxu3 }
 0x2fe   : > { %8211 = vst [vmem:[#allocation97_spill] sm:$0xff] %v6578_v52  ;;  %2186 = vmatmul.f32.gmra.mxu3 %v6578_v52  ;;  %v1794_v13 = vmul.f32 %v6474_v55, %v1793_v2  ;;  %v1947_v52 = vmul.f32 %v6575_v22, %v1946_v46  ;;  %v6616_v11 = vpop.eup %4099  ;;  %v3892_v7 = vsel %vm3870_vm1, 0.0, %v3891_v18  ;;  %v1805_v24 = vsub.f32 1.5, %v1804_v19 }
 0x2ff   : > { %8213 = vst [vmem:[#allocation99_spill] sm:$0xff] %v6611_v29  ;;  %v6620_v55 = vpop.eup %4101  ;;  %v1938_v2 = vmul.f32 %v6513_v49, %v1937_v20  ;;  %4103 = vrsqrt.f32 %v6614_v63  ;;  %vm1796_vm8 = vcmp.eq.f32.partialorder %v6416_v36, inf  ;;  %v1676_v54 = vsel %vm1660_vm6, -1.0, %v8181_v8 }
 0x300   : > { %v1795_v23 = vmul.f32 %v1794_v13, %v6416_v36  ;;  %4105 = vrsqrt.f32 %v6609_v16  ;;  %v1948_v62 = vmul.f32 0.5, %v1947_v52  ;;  %v1958_v42 = vmul.f32 %v6616_v11, %v6573_v3 }
 0x301   : > { %v1826_v21 = vmul.f32 %v6620_v55, %v6564_v38  ;;  %v3893_v46 = vsel %vm3873_vm7, inf, %v3892_v7  ;;  %v1799_v59 = vand.u32 2147483648, %v6416_v36  ;;  %v1816_v49 = vmul.f32 0.5, %v1815_v43 }
 0x302   : > { %v6607_v28 = vpop.f32.mrf.mxu0  ;;  %v1224_v48 = vadd.f32 %v1223_v40, %v1158_v58  ;;  %v1797_v44 = vsel %vm1796_vm8, %v6416_v36, %v1795_v23  ;;  %vm1798_vm9 = vcmp.eq.f32.partialorder %v6416_v36, 0.0  ;;  %v1806_v41 = vmul.f32 %v6523_v26, %v1805_v24 }
 0x303   : > { %8212 = vst [vmem:[#allocation98_spill] sm:$0xff] %v6607_v28  ;;  %v1939_v8 = vmul.f32 %v1938_v2, %v6461_v61  ;;  %v6643_v52 = vmul.f32 %v3893_v46, %v1676_v54  ;;  %vm1940_vm10 = vcmp.eq.f32.partialorder %v6461_v61, inf  ;;  %v1949_v19 = vsub.f32 1.5, %v1948_v62 }
 0x304   : > { %v1959_v18 = vmul.f32 %v6616_v11, %v1958_v42  ;;  %v6649_v40 = vsel %vm1798_vm9, %v1799_v59, %v1797_v44  ;;  %v1817_v58 = vsub.f32 1.5, %v1816_v49  ;;  %v1827_v36 = vmul.f32 %v6620_v55, %v1826_v21  ;;  %v1229_v2 = vpop.f32.mrf.mxu1 }
 0x305   : > { %2344 = vmatmul.f32.gmra.mxu0 %v6611_v29  ;;  %8215 = vst [vmem:[#allocation101_spill] sm:$0xff] %v6643_v52  ;;  %v6647_v20 = vpop.eup %4103  ;;  %v6654_v26 = vmax.f32 %v1224_v48, 1e-16  ;;  %v1807_v7 = vmul.f32 %v1806_v41, %v6453_v14  ;;  %v1941_v23 = vsel %vm1940_vm10, %v6461_v61, %v1939_v8  ;;  %vm1942_vm11 = vcmp.eq.f32.partialorder %v6461_v61, 0.0  ;;  %v1164_v49 = vpop.f32.mrf.mxu3 }
 0x306   : > { %v6651_v43 = vpop.eup %4105  ;;  %v1943_v24 = vand.u32 2147483648, %v6461_v61  ;;  %vm1808_vm12 = vcmp.eq.f32.partialorder %v6453_v14, inf  ;;  %v1950_v54 = vmul.f32 %v6575_v22, %v1949_v19  ;;  %v1960_v62 = vmul.f32 0.5, %v1959_v18 }
 0x307   : > { %v1970_v42 = vmul.f32 %v6647_v20, %v6614_v63  ;;  %4107 = vrsqrt.f32 %v6649_v40  ;;  %v1838_v21 = vmul.f32 %v6651_v43, %v6609_v16  ;;  %vm1810_vm13 = vcmp.eq.f32.partialorder %v6453_v14, 0.0 }
 0x308   : > { %v1811_v46 = vand.u32 2147483648, %v6453_v14  ;;  %v1818_v59 = vmul.f32 %v6562_v32, %v1817_v58  ;;  %4109 = vrsqrt.f32 %v6654_v26  ;;  %v1227_v48 = vadd.f32 %v1226_v10, %v1161_v15 }
 0x309   : > { %v1809_v22 = vsel %vm1808_vm12, %v6453_v14, %v1807_v7  ;;  %v1828_v44 = vmul.f32 0.5, %v1827_v36  ;;  %v1961_v8 = vsub.f32 1.5, %v1960_v62  ;;  %v1971_v19 = vmul.f32 %v6647_v20, %v1970_v42 }
 0x30a   : > { %v6640_v13 = vpop.f32.mrf.mxu0  ;;  %v6678_v18 = vsel %vm1942_vm11, %v1943_v24, %v1941_v23  ;;  %v6681_v5 = vsel %vm1810_vm13, %v1811_v46, %v1809_v22  ;;  %v1819_v32 = vmul.f32 %v1818_v59, %v6499_v12  ;;  %v1839_v14 = vmul.f32 %v6651_v43, %v1838_v21 }
 0x30b   : > { %8214 = vst [vmem:[#allocation100_spill] sm:$0xff] %v6640_v13  ;;  %v6687_v10 = vmax.f32 %v1227_v48, 1e-16  ;;  %vm1820_vm14 = vcmp.eq.f32.partialorder %v6499_v12, inf  ;;  %v1829_v15 = vsub.f32 1.5, %v1828_v44  ;;  %vm1952_vm15 = vcmp.eq.f32.partialorder %v6521_v47, inf }
 0x30c   : > { %vm1954_vm0 = vcmp.eq.f32.partialorder %v6521_v47, 0.0  ;;  %v1955_v61 = vand.u32 2147483648, %v6521_v47  ;;  %v1962_v7 = vmul.f32 %v6616_v11, %v1961_v8  ;;  %v1972_v23 = vmul.f32 0.5, %v1971_v19  ;;  %v1232_v46 = vpop.f32.mrf.mxu1 }
 0x30d   : > { %2347 = vmatmul.f32.gmra.mxu0 %v6643_v52  ;;  %v1951_v52 = vmul.f32 %v1950_v54, %v6521_v47  ;;  %v6684_v58 = vpop.eup %4107  ;;  %4111 = vrsqrt.f32 %v6681_v5  ;;  %v1823_v24 = vand.u32 2147483648, %v6499_v12  ;;  %v1230_v54 = vadd.f32 %v1229_v2, %v1164_v49  ;;  %v1167_v2 = vpop.f32.mrf.mxu3 }
 0x30e   : > { %v6694_v36 = vpop.eup %4109  ;;  %v1982_v62 = vmul.f32 %v6684_v58, %v6649_v40  ;;  %v1821_v42 = vsel %vm1820_vm14, %v6499_v12, %v1819_v32  ;;  %vm1822_vm1 = vcmp.eq.f32.partialorder %v6499_v12, 0.0  ;;  %4113 = vrsqrt.f32 %v6687_v10 }
 0x30f   : > { %v1953_v21 = vsel %vm1952_vm15, %v6521_v47, %v1951_v52  ;;  %v1830_v11 = vmul.f32 %v6620_v55, %v1829_v15  ;;  %v1840_v59 = vmul.f32 0.5, %v1839_v14  ;;  %v1850_v48 = vmul.f32 %v6694_v36, %v6654_v26 }
 0x310   : > { %v1963_v49 = vmul.f32 %v1962_v7, %v6573_v3  ;;  %v1973_v44 = vsub.f32 1.5, %v1972_v23  ;;  %v6711_v8 = vsel %vm1822_vm1, %v1823_v24, %v1821_v42  ;;  %v6713_v12 = vmax.f32 %v1230_v54, 1e-16 }
 0x311   : > { %v6717_v52 = vsel %vm1954_vm0, %v1955_v61, %v1953_v21  ;;  %vm1964_vm2 = vcmp.eq.f32.partialorder %v6573_v3, inf  ;;  %v1983_v55 = vmul.f32 %v6684_v58, %v1982_v62  ;;  %v1831_v32 = vmul.f32 %v1830_v11, %v6564_v38 }
 0x312   : > { %v6673_v41 = vpop.f32.mrf.mxu0  ;;  %v1841_v14 = vsub.f32 1.5, %v1840_v59  ;;  %v1851_v15 = vmul.f32 %v6694_v36, %v1850_v48  ;;  %4115 = vrsqrt.f32 %v6711_v8  ;;  %vm1832_vm3 = vcmp.eq.f32.partialorder %v6564_v38, inf }
 0x313   : > { %v6721_v19 = vpop.eup %4111  ;;  %v1965_v61 = vsel %vm1964_vm2, %v6573_v3, %v1963_v49  ;;  %vm1966_vm4 = vcmp.eq.f32.partialorder %v6573_v3, 0.0  ;;  %v1967_v7 = vand.u32 2147483648, %v6573_v3  ;;  %v1974_v23 = vmul.f32 %v6647_v20, %v1973_v44 }
 0x314   : > { %v6728_v47 = vpop.eup %4113  ;;  %4117 = vrsqrt.f32 %v6713_v12  ;;  %v1984_v24 = vmul.f32 0.5, %v1983_v55  ;;  %v1994_v54 = vmul.f32 %v6721_v19, %v6681_v5  ;;  %v1835_v62 = vand.u32 2147483648, %v6564_v38  ;;  %v1235_v49 = vpop.f32.mrf.mxu1 }
 0x315   : > { %2350 = vmatmul.f32.gmra.mxu0 %v6678_v18  ;;  %v1233_v42 = vadd.f32 %v1232_v46, %v1167_v2  ;;  %v1833_v21 = vsel %vm1832_vm3, %v6564_v38, %v1831_v32  ;;  %vm1834_vm5 = vcmp.eq.f32.partialorder %v6564_v38, 0.0  ;;  %v1842_v11 = vmul.f32 %v6651_v43, %v1841_v14  ;;  %v1170_v32 = vpop.f32.mrf.mxu3 }
 0x316   : > { %v1862_v59 = vmul.f32 %v6728_v47, %v6687_v10  ;;  %v1852_v20 = vmul.f32 0.5, %v1851_v15  ;;  %v1975_v44 = vmul.f32 %v1974_v23, %v6614_v63  ;;  %vm1976_vm6 = vcmp.eq.f32.partialorder %v6614_v63, inf }
 0x317   : > { %v6751_v46 = vsel %vm1966_vm4, %v1967_v7, %v1965_v61  ;;  %v1985_v38 = vsub.f32 1.5, %v1984_v24  ;;  %v1995_v43 = vmul.f32 %v6721_v19, %v1994_v54  ;;  %v6754_v2 = vsel %vm1834_vm5, %v1835_v62, %v1833_v21 }
 0x318   : > { %v6747_v55 = vpop.eup %4115  ;;  %8216 = vst [vmem:[#allocation102_spill] sm:$0xff] %v6751_v46  ;;  %v6756_v14 = vmax.f32 %v1233_v42, 1e-16  ;;  %v1843_v15 = vmul.f32 %v1842_v11, %v6609_v16  ;;  %v1863_v29 = vmul.f32 %v6728_v47, %v1862_v59  ;;  %v1979_v3 = vand.u32 2147483648, %v6614_v63 }
 0x319   : > { %vm1844_vm7 = vcmp.eq.f32.partialorder %v6609_v16, inf  ;;  %v1853_v61 = vsub.f32 1.5, %v1852_v20  ;;  %v1977_v7 = vsel %vm1976_vm6, %v6614_v63, %v1975_v44  ;;  %vm1978_vm8 = vcmp.eq.f32.partialorder %v6614_v63, 0.0 }
 0x31a   : > { %v6708_v22 = vpop.f32.mrf.mxu0  ;;  %v6760_v23 = vpop.eup %4117  ;;  %v2006_v24 = vmul.f32 %v6747_v55, %v6711_v8  ;;  %4119 = vrsqrt.f32 %v6754_v2  ;;  %v1986_v54 = vmul.f32 %v6684_v58, %v1985_v38  ;;  %v1996_v62 = vmul.f32 0.5, %v1995_v43 }
 0x31b   : > { %vm1846_vm9 = vcmp.eq.f32.partialorder %v6609_v16, 0.0  ;;  %v1847_v42 = vand.u32 2147483648, %v6609_v16  ;;  %v1874_v21 = vmul.f32 %v6760_v23, %v6713_v12  ;;  %4121 = vrsqrt.f32 %v6756_v14 }
 0x31c   : > { %v1236_v11 = vadd.f32 %v1235_v49, %v1170_v32  ;;  %v1845_v63 = vsel %vm1844_vm7, %v6609_v16, %v1843_v15  ;;  %v1854_v20 = vmul.f32 %v6694_v36, %v1853_v61  ;;  %v1864_v44 = vmul.f32 0.5, %v1863_v29  ;;  %v1238_v16 = vpop.f32.mrf.mxu1 }
 0x31d   : > { %2353 = vmatmul.f32.gmra.mxu0 %v6717_v52  ;;  %v2007_v58 = vmul.f32 %v6747_v55, %v2006_v24  ;;  %v6781_v38 = vsel %vm1978_vm8, %v1979_v3, %v1977_v7  ;;  %v1987_v43 = vmul.f32 %v1986_v54, %v6649_v40  ;;  %v1997_v33 = vsub.f32 1.5, %v1996_v62  ;;  %v1173_v3 = vpop.f32.mrf.mxu3 }
 0x31e   : > { %8217 = vst [vmem:[#allocation103_spill] sm:$0xff] %v6781_v38  ;;  %v6784_v25 = vsel %vm1846_vm9, %v1847_v42, %v1845_v63  ;;  %v1875_v49 = vmul.f32 %v6760_v23, %v1874_v21  ;;  %v6789_v32 = vmax.f32 %v1236_v11, 1e-16  ;;  %vm1988_vm10 = vcmp.eq.f32.partialorder %v6649_v40, inf }
 0x31f   : > { %v1855_v29 = vmul.f32 %v1854_v20, %v6654_v26  ;;  %v1865_v36 = vsub.f32 1.5, %v1864_v44  ;;  %v1991_v61 = vand.u32 2147483648, %v6649_v40  ;;  %v2008_v7 = vmul.f32 0.5, %v2007_v58 }
 0x320   : > { %v6786_v60 = vpop.eup %4119  ;;  %4123 = vrsqrt.f32 %v6784_v25  ;;  %vm1856_vm11 = vcmp.eq.f32.partialorder %v6654_v26, inf  ;;  %v1989_v24 = vsel %vm1988_vm10, %v6649_v40, %v1987_v43  ;;  %vm1990_vm12 = vcmp.eq.f32.partialorder %v6649_v40, 0.0 }
 0x321   : > { %v6794_v15 = vpop.eup %4121  ;;  %v1998_v54 = vmul.f32 %v6721_v19, %v1997_v33  ;;  %v2018_v62 = vmul.f32 %v6786_v60, %v6754_v2  ;;  %4125 = vrsqrt.f32 %v6789_v32  ;;  %v1239_v42 = vadd.f32 %v1238_v16, %v1173_v3 }
 0x322   : > { %v6743_v48 = vpop.f32.mrf.mxu0  ;;  %v1859_v21 = vand.u32 2147483648, %v6654_v26  ;;  %v1876_v11 = vmul.f32 0.5, %v1875_v49  ;;  %v1886_v63 = vmul.f32 %v6794_v15, %v6756_v14  ;;  %v1857_v44 = vsel %vm1856_vm11, %v6654_v26, %v1855_v29 }
 0x323   : > { %vm1858_vm13 = vcmp.eq.f32.partialorder %v6654_v26, 0.0  ;;  %v1866_v33 = vmul.f32 %v6728_v47, %v1865_v36  ;;  %v2009_v40 = vsub.f32 1.5, %v2008_v7  ;;  %v6813_v19 = vsel %vm1990_vm12, %v1991_v61, %v1989_v24 }
 0x324   : > { %8218 = vst [vmem:[#allocation104_spill] sm:$0xff] %v6813_v19  ;;  %v1999_v58 = vmul.f32 %v1998_v54, %v6681_v5  ;;  %v2019_v43 = vmul.f32 %v6786_v60, %v2018_v62  ;;  %v6819_v49 = vmax.f32 %v1239_v42, 1e-16  ;;  %vm2000_vm14 = vcmp.eq.f32.partialorder %v6681_v5, inf  ;;  %v1241_v61 = vpop.f32.mrf.mxu1 }
 0x325   : > { %2356 = vmatmul.f32.gmra.mxu0 %v6751_v46  ;;  %v6823_v29 = vsel %vm1858_vm13, %v1859_v21, %v1857_v44  ;;  %v1877_v26 = vsub.f32 1.5, %v1876_v11  ;;  %v1887_v47 = vmul.f32 %v6794_v15, %v1886_v63  ;;  %v1867_v36 = vmul.f32 %v1866_v33, %v6687_v10  ;;  %v1176_v21 = vpop.f32.mrf.mxu3 }
 0x326   : > { %v6817_v16 = vpop.eup %4123  ;;  %vm2002_vm15 = vcmp.eq.f32.partialorder %v6681_v5, 0.0  ;;  %v2003_v7 = vand.u32 2147483648, %v6681_v5  ;;  %v2010_v24 = vmul.f32 %v6747_v55, %v2009_v40  ;;  %vm1868_vm0 = vcmp.eq.f32.partialorder %v6687_v10, inf }
 0x327   : > { %v6827_v3 = vpop.eup %4125  ;;  %v2001_v54 = vsel %vm2000_vm14, %v6681_v5, %v1999_v58  ;;  %v2020_v62 = vmul.f32 0.5, %v2019_v43  ;;  %v2030_v42 = vmul.f32 %v6817_v16, %v6784_v25  ;;  %4127 = vrsqrt.f32 %v6823_v29 }
 0x328   : > { %4129 = vrsqrt.f32 %v6819_v49  ;;  %vm1870_vm1 = vcmp.eq.f32.partialorder %v6687_v10, 0.0  ;;  %v1871_v11 = vand.u32 2147483648, %v6687_v10  ;;  %v1878_v63 = vmul.f32 %v6760_v23, %v1877_v26 }
 0x329   : > { %v1898_v55 = vmul.f32 %v6827_v3, %v6789_v32  ;;  %v1242_v44 = vadd.f32 %v1241_v61, %v1176_v21  ;;  %v1869_v40 = vsel %vm1868_vm0, %v6687_v10, %v1867_v36  ;;  %v1888_v58 = vmul.f32 0.5, %v1887_v47 }
 0x32a   : > { %v6777_v59 = vpop.f32.mrf.mxu0  ;;  %v6848_v43 = vsel %vm2002_vm15, %v2003_v7, %v2001_v54  ;;  %v2011_v53 = vmul.f32 %v2010_v24, %v6711_v8  ;;  %v2021_v31 = vsub.f32 1.5, %v2020_v62  ;;  %vm2012_vm2 = vcmp.eq.f32.partialorder %v6711_v8, inf }
 0x32b   : > { %8219 = vst [vmem:[#allocation105_spill] sm:$0xff] %v6848_v43  ;;  %v2031_v23 = vmul.f32 %v6817_v16, %v2030_v42  ;;  %v6854_v26 = vsel %vm1870_vm1, %v1871_v11, %v1869_v40  ;;  %v1879_v61 = vmul.f32 %v1878_v63, %v6713_v12  ;;  %v1899_v10 = vmul.f32 %v6827_v3, %v1898_v55 }
 0x32c   : > { %v6860_v5 = vmax.f32 %v1242_v44, 1e-16  ;;  %vm1880_vm3 = vcmp.eq.f32.partialorder %v6713_v12, inf  ;;  %v1889_v47 = vsub.f32 1.5, %v1888_v58  ;;  %vm2014_vm4 = vcmp.eq.f32.partialorder %v6711_v8, 0.0 }
 0x32d   : > { %2359 = vmatmul.f32.gmra.mxu0 %v6781_v38  ;;  %v6857_v21 = vpop.eup %4127  ;;  %v2015_v7 = vand.u32 2147483648, %v6711_v8  ;;  %v2013_v24 = vsel %vm2012_vm2, %v6711_v8, %v2011_v53  ;;  %v2022_v54 = vmul.f32 %v6786_v60, %v2021_v31  ;;  %4131 = vrsqrt.f32 %v6854_v26 }
 0x32e   : > { %v6863_v36 = vpop.eup %4129  ;;  %v1883_v62 = vand.u32 2147483648, %v6713_v12  ;;  %v2032_v42 = vmul.f32 0.5, %v2031_v23  ;;  %v2042_v11 = vmul.f32 %v6857_v21, %v6823_v29  ;;  %v1881_v63 = vsel %vm1880_vm3, %v6713_v12, %v1879_v61 }
 0x32f   : > { %vm1882_vm5 = vcmp.eq.f32.partialorder %v6713_v12, 0.0  ;;  %v1910_v55 = vmul.f32 %v6863_v36, %v6819_v49  ;;  %4133 = vrsqrt.f32 %v6860_v5  ;;  %v1890_v31 = vmul.f32 %v6794_v15, %v1889_v47 }
 0x330   : > { %v1900_v60 = vmul.f32 0.5, %v1899_v10  ;;  %v6881_v8 = vsel %vm2014_vm4, %v2015_v7, %v2013_v24  ;;  %v2023_v44 = vmul.f32 %v2022_v54, %v6754_v2  ;;  %v6884_v40 = vsel %vm1882_vm5, %v1883_v62, %v1881_v63 }
 0x331   : > { %8220 = vst [vmem:[#allocation106_spill] sm:$0xff] %v6881_v8  ;;  %vm2024_vm6 = vcmp.eq.f32.partialorder %v6754_v2, inf  ;;  %v2033_v12 = vsub.f32 1.5, %v2032_v42  ;;  %v2043_v58 = vmul.f32 %v6857_v21, %v2042_v11  ;;  %v1911_v61 = vmul.f32 %v6863_v36, %v1910_v55 }
 0x332   : > { %v6808_v20 = vpop.f32.mrf.mxu0  ;;  %v1891_v15 = vmul.f32 %v1890_v31, %v6756_v14  ;;  %v1901_v10 = vsub.f32 1.5, %v1900_v60  ;;  %4135 = vrsqrt.f32 %v6884_v40  ;;  %vm1892_vm7 = vcmp.eq.f32.partialorder %v6756_v14, inf }
 0x333   : > { %v6889_v23 = vpop.eup %4131  ;;  %v2025_v7 = vsel %vm2024_vm6, %v6754_v2, %v2023_v44  ;;  %vm2026_vm8 = vcmp.eq.f32.partialorder %v6754_v2, 0.0  ;;  %v2027_v24 = vand.u32 2147483648, %v6754_v2  ;;  %v2034_v54 = vmul.f32 %v6817_v16, %v2033_v12  ;;  %v6911_v44 = vpop.f32.mrf.mxu3 }
 0x334   : > { %v2044_v62 = vmul.f32 0.5, %v2043_v58  ;;  %v2054_v42 = vmul.f32 %v6889_v23, %v6854_v26  ;;  %v1895_v11 = vand.u32 2147483648, %v6756_v14  ;;  %v1893_v55 = vsel %vm1892_vm7, %v6756_v14, %v1891_v15 }
 0x335   : > { %2362 = vmatmul.f32.gmra.mxu0 %v6813_v19  ;;  %v6895_v47 = vpop.eup %4133  ;;  %vm1894_vm9 = vcmp.eq.f32.partialorder %v6756_v14, 0.0  ;;  %v1902_v31 = vmul.f32 %v6827_v3, %v1901_v10  ;;  %v1912_v60 = vmul.f32 0.5, %v1911_v61  ;;  %v6913_v16 = vsel %vm2026_vm8, %v2027_v24, %v2025_v7 }
 0x336   : > { %v1922_v2 = vmul.f32 %v6895_v47, %v6860_v5  ;;  %8221 = vst [vmem:[#allocation107_spill] sm:$0xff] %v6913_v16  ;;  %v2035_v58 = vmul.f32 %v2034_v54, %v6784_v25  ;;  %v2045_v50 = vsub.f32 1.5, %v2044_v62  ;;  %v2055_v15 = vmul.f32 %v6889_v23, %v2054_v42 }
 0x337   : > { %vm2036_vm10 = vcmp.eq.f32.partialorder %v6784_v25, inf  ;;  %v1903_v14 = vmul.f32 %v1902_v31, %v6789_v32  ;;  %v1913_v3 = vsub.f32 1.5, %v1912_v60  ;;  %vm1904_vm11 = vcmp.eq.f32.partialorder %v6789_v32, inf }
 0x338   : > { %v4136_v12 = vpop.eup %4135  ;;  %v1923_v61 = vmul.f32 %v6895_v47, %v1922_v2  ;;  %vm2038_vm12 = vcmp.eq.f32.partialorder %v6784_v25, 0.0  ;;  %v2039_v10 = vand.u32 2147483648, %v6784_v25  ;;  %v2037_v24 = vsel %vm2036_vm10, %v6784_v25, %v2035_v58 }
 0x339   : > { %v2066_v7 = vmul.f32 %v4136_v12, %v6884_v40  ;;  %v2046_v54 = vmul.f32 %v6857_v21, %v2045_v50  ;;  %v2056_v62 = vmul.f32 0.5, %v2055_v15  ;;  %v1907_v42 = vand.u32 2147483648, %v6789_v32 }
 0x33a   : > { %v6843_v33 = vpop.f32.mrf.mxu0  ;;  %vm1906_vm13 = vcmp.eq.f32.partialorder %v6789_v32, 0.0  ;;  %v1914_v31 = vmul.f32 %v6863_v36, %v1913_v3  ;;  %v1924_v60 = vmul.f32 0.5, %v1923_v61  ;;  %v6936_v2 = vsel %vm2038_vm12, %v2039_v10, %v2037_v24 }
 0x33b   : > { %8222 = vst [vmem:[#allocation108_spill] sm:$0xff] %v6936_v2  ;;  %v2047_v25 = vmul.f32 %v2046_v54, %v6823_v29  ;;  %v2057_v50 = vsub.f32 1.5, %v2056_v62  ;;  %v6942_v15 = vpop.f32.mrf.mxu3  ;;  %vm2048_vm14 = vcmp.eq.f32.partialorder %v6823_v29, inf  ;;  %vm1916_vm15 = vcmp.eq.f32.partialorder %v6819_v49, inf }
 0x33c   : > { %v1925_v36 = vsub.f32 1.5, %v1924_v60  ;;  %vm2050_vm0 = vcmp.eq.f32.partialorder %v6823_v29, 0.0  ;;  %v1919_v24 = vand.u32 2147483648, %v6819_v49  ;;  %vm1918_vm1 = vcmp.eq.f32.partialorder %v6819_v49, 0.0 }
 0x33d   : > { %2365 = vmatmul.f32.gmra.mxu0 %v6848_v43  ;;  %v2049_v61 = vsel %vm2048_vm14, %v6823_v29, %v2047_v25  ;;  %v2058_v10 = vmul.f32 %v6889_v23, %v2057_v50  ;;  %vm2060_vm2 = vcmp.eq.f32.partialorder %v6854_v26, inf  ;;  %vm1928_vm3 = vcmp.eq.f32.partialorder %v6860_v5, inf }
 0x33e   : > { %vm2062_vm4 = vcmp.eq.f32.partialorder %v6854_v26, 0.0  ;;  %vm1930_vm5 = vcmp.eq.f32.partialorder %v6860_v5, 0.0  ;;  %vm2072_vm6 = vcmp.eq.f32.partialorder %v6884_v40, inf  ;;  %vm2074_vm7 = vcmp.eq.f32.partialorder %v6884_v40, 0.0 }
 0x342   : > { %v6878_v53 = vpop.f32.mrf.mxu0 }
 0x343   : > { %v6967_v50 = vpop.f32.mrf.mxu3 }
 0x345   : > { %2368 = vmatmul.f32.gmra.mxu0 %v6881_v8  ;;  %v6918_v8 = vsel %vm1894_vm9, %v1895_v11, %v1893_v55  ;;  %v1905_v55 = vsel %vm1904_vm11, %v6789_v32, %v1903_v14  ;;  %v1915_v32 = vmul.f32 %v1914_v31, %v6819_v49  ;;  %v2051_v14 = vand.u32 2147483648, %v6823_v29 }
 0x346   : > { %4137 = vrsqrt.f32 %v6918_v8  ;;  %v6940_v21 = vsel %vm1906_vm13, %v1907_v42, %v1905_v55  ;;  %v1926_v42 = vmul.f32 %v6895_v47, %v1925_v36  ;;  %v2059_v29 = vmul.f32 %v2058_v10, %v6854_v26 }
 0x347   : > { %4139 = vrsqrt.f32 %v6940_v21  ;;  %v1917_v62 = vsel %vm1916_vm15, %v6819_v49, %v1915_v32  ;;  %v6959_v55 = vsel %vm2050_vm0, %v2051_v14, %v2049_v61  ;;  %v2063_v49 = vand.u32 2147483648, %v6854_v26 }
 0x348   : > { %8223 = vst [vmem:[#allocation109_spill] sm:$0xff] %v6959_v55  ;;  %v6963_v31 = vsel %vm1918_vm1, %v1919_v24, %v1917_v62  ;;  %v1927_v25 = vmul.f32 %v1926_v42, %v6860_v5  ;;  %v2061_v32 = vsel %vm2060_vm2, %v6854_v26, %v2059_v29  ;;  %v1931_v61 = vand.u32 2147483648, %v6860_v5 }
 0x349   : > { %4141 = vrsqrt.f32 %v6963_v31  ;;  %v2075_v29 = vand.u32 2147483648, %v6884_v40  ;;  %vm2084_vm8 = vcmp.eq.f32.partialorder %v6918_v8, inf  ;;  %vm2086_vm9 = vcmp.eq.f32.partialorder %v6918_v8, 0.0 }
 0x34a   : > { %v6904_v63 = vpop.f32.mrf.mxu0  ;;  %v1929_v10 = vsel %vm1928_vm3, %v6860_v5, %v1927_v25  ;;  %vm2096_vm10 = vcmp.eq.f32.partialorder %v6940_v21, inf  ;;  %vm2098_vm11 = vcmp.eq.f32.partialorder %v6940_v21, 0.0  ;;  %vm2108_vm12 = vcmp.eq.f32.partialorder %v6963_v31, inf }
 0x34b   : > { %v6985_v42 = vsel %vm1930_vm5, %v1931_v61, %v1929_v10  ;;  %vm2110_vm13 = vcmp.eq.f32.partialorder %v6963_v31, 0.0 }
 0x34c   : > { %v4138_v58 = vpop.eup %4137  ;;  %4143 = vrsqrt.f32 %v6985_v42  ;;  %vm2120_vm14 = vcmp.eq.f32.partialorder %v6985_v42, inf  ;;  %vm2122_vm15 = vcmp.eq.f32.partialorder %v6985_v42, 0.0 }
 0x34d   : > { %2371 = vmatmul.f32.gmra.mxu0 %v6913_v16  ;;  %v2067_v16 = vmul.f32 %v4136_v12, %v2066_v7  ;;  %v2078_v7 = vmul.f32 %v4138_v58, %v6918_v8  ;;  %v4140_v60 = vpop.eup %4139 }
 0x34e   : > { %v2090_v14 = vmul.f32 %v4140_v60, %v6940_v21 }
 0x34f   : > { %v2068_v3 = vmul.f32 0.5, %v2067_v16  ;;  %v2079_v23 = vmul.f32 %v4138_v58, %v2078_v7  ;;  %v4142_v62 = vpop.eup %4141 }
 0x350   : > { %v2091_v24 = vmul.f32 %v4140_v60, %v2090_v14  ;;  %v2102_v25 = vmul.f32 %v4142_v62, %v6963_v31 }
 0x351   : > { %v2069_v16 = vsub.f32 1.5, %v2068_v3  ;;  %v2080_v36 = vmul.f32 0.5, %v2079_v23 }
 0x352   : > { %v6931_v11 = vpop.f32.mrf.mxu0  ;;  %v2092_v23 = vmul.f32 0.5, %v2091_v24  ;;  %v2103_v61 = vmul.f32 %v4142_v62, %v2102_v25 }
 0x353   : > { %v2070_v47 = vmul.f32 %v4136_v12, %v2069_v16  ;;  %v6980_v12 = vsel %vm2062_vm4, %v2063_v49, %v2061_v32  ;;  %v2081_v26 = vsub.f32 1.5, %v2080_v36  ;;  %v6992_v49 = vpop.f32.mrf.mxu3 }
 0x354   : > { %8224 = vst [vmem:[#allocation110_spill] sm:$0xff] %v6980_v12  ;;  %v2093_v14 = vsub.f32 1.5, %v2092_v23 }
 0x355   : > { %2374 = vmatmul.f32.gmra.mxu0 %v6936_v2  ;;  %v2071_v7 = vmul.f32 %v2070_v47, %v6884_v40  ;;  %v2082_v5 = vmul.f32 %v4138_v58, %v2081_v26  ;;  %v2087_v58 = vand.u32 2147483648, %v6918_v8  ;;  %v2104_v26 = vmul.f32 0.5, %v2103_v61  ;;  %v8251_v2 = vld [vmem:[#allocation88_spill] sm:$0xff] }
 0x357   : > { %v2073_v16 = vsel %vm2072_vm6, %v6884_v40, %v2071_v7  ;;  %v2083_v36 = vmul.f32 %v2082_v5, %v6918_v8  ;;  %v4144_v40 = vpop.eup %4143  ;;  %v2094_v7 = vmul.f32 %v4140_v60, %v2093_v14  ;;  %v2105_v25 = vsub.f32 1.5, %v2104_v26 }
 0x358   : > { %v6996_v32 = vsel %vm2074_vm7, %v2075_v29, %v2073_v16  ;;  %v2114_v24 = vmul.f32 %v4144_v40, %v6985_v42 }
 0x359   : > { %8225 = vst [vmem:[#allocation111_spill] sm:$0xff] %v6996_v32  ;;  %v2085_v10 = vsel %vm2084_vm8, %v6918_v8, %v2083_v36  ;;  %v2095_v23 = vmul.f32 %v2094_v7, %v6940_v21  ;;  %v2099_v8 = vand.u32 2147483648, %v6940_v21  ;;  %v2106_v36 = vmul.f32 %v4142_v62, %v2105_v25 }
 0x35a   : > { %v6954_v54 = vpop.f32.mrf.mxu0  ;;  %v7009_v5 = vsel %vm2086_vm9, %v2087_v58, %v2085_v10 }
 0x35b   : > { %v7007_v29 = vpop.f32.mrf.mxu3  ;;  %8227 = vst [vmem:[#allocation113_spill] sm:$0xff] %v7009_v5  ;;  %v2097_v60 = vsel %vm2096_vm10, %v6940_v21, %v2095_v23  ;;  %v2107_v10 = vmul.f32 %v2106_v36, %v6963_v31  ;;  %v7042_v36 = vadd.f32 %v5932_v35, %v6911_v44  ;;  %v7058_v35 = vadd.f32 %v6673_v41, %v6911_v44 }
 0x35c   : > { %8226 = vst [vmem:[#allocation112_spill] sm:$0xff] %v7007_v29  ;;  %v7019_v58 = vsel %vm2098_vm11, %v2099_v8, %v2097_v60  ;;  %v8233_v8 = vld [vmem:[#allocation40_spill] sm:$0xff]  ;;  %v7072_v41 = vmul.f32 0.1, %v5852_v1  ;;  %v7091_v1 = vmul.f32 0.1, %v5989_v9 }
 0x35d   : > { %2377 = vmatmul.f32.gmra.mxu0 %v6959_v55  ;;  %8229 = vst [vmem:[#allocation115_spill] sm:$0xff] %v7019_v58  ;;  %v2109_v23 = vsel %vm2108_vm12, %v6963_v31, %v2107_v10  ;;  %v7038_v60 = vadd.f32 %v8233_v8, %v6911_v44  ;;  %v8235_v10 = vld [vmem:[#allocation41_spill] sm:$0xff]  ;;  %v7063_v8 = vadd.f32 %v5978_v27, %v6942_v15  ;;  %v7079_v27 = vmul.f32 0.1, %v5889_v17 }
 0x35e   : > { %8241 = vst [vmem:[#allocation121_spill] sm:$0xff] %v7091_v1  ;;  %vm2511_vm1 = vcmp.gt.f32.partialorder %v7042_v36, 0.0  ;;  %vm2607_vm4 = vcmp.gt.f32.partialorder %v7058_v35, 0.0 }
 0x35f   : > { %vm2415_vm0 = vcmp.gt.f32.partialorder %v7038_v60, 0.0  ;;  %vm2512_vm3 = vcmp.gt.f32.partialorder %v7063_v8, 0.0 }
 0x362   : > { %v6975_v3 = vpop.f32.mrf.mxu0 }
 0x363   : > { %v7023_v26 = vpop.f32.mrf.mxu3 }
 0x364   : > { %8230 = vst [vmem:[#allocation116_spill] sm:$0xff] %v7023_v26 }
 0x365   : > { %2380 = vmatmul.f32.gmra.mxu0 %v6980_v12 }
 0x36a   : > { %v6994_v47 = vpop.f32.mrf.mxu0 }
 0x36d   : > { %2383 = vmatmul.f32.gmra.mxu0 %v6996_v32  ;;  %v2115_v32 = vmul.f32 %v4144_v40, %v2114_v24  ;;  %v2111_v24 = vand.u32 2147483648, %v6963_v31  ;;  %v7044_v31 = vpop.f32.mrf.mxu3 }
 0x36e   : > { %8234 = vst [vmem:[#allocation40_spill] sm:$0xff] %v7044_v31 }
 0x36f   : > { %v2116_v14 = vmul.f32 0.5, %v2115_v32  ;;  %v7031_v32 = vsel %vm2110_vm13, %v2111_v24, %v2109_v23  ;;  %v2431_v23 = vmul.f32 1.442695, %v7038_v60 }
 0x370   : > { %8232 = vst [vmem:[#allocation118_spill] sm:$0xff] %v7031_v32 }
 0x371   : > { %v2117_v7 = vsub.f32 1.5, %v2116_v14  ;;  %4145 = vpow2.f32 %v2431_v23 }
 0x372   : > { %v7005_v16 = vpop.f32.mrf.mxu0 }
 0x373   : > { %v2118_v21 = vmul.f32 %v4144_v40, %v2117_v7  ;;  %v2123_v40 = vand.u32 2147483648, %v6985_v42  ;;  %v7051_v7 = vadd.f32 %v8235_v10, %v6942_v15  ;;  %v2623_v10 = vmul.f32 1.442695, %v7058_v35 }
 0x375   : > { %2386 = vmatmul.f32.gmra.mxu0 %v7009_v5  ;;  %v2119_v25 = vmul.f32 %v2118_v21, %v6985_v42  ;;  %v2527_v21 = vmul.f32 1.442695, %v7042_v36  ;;  %v7088_v23 = vpop.f32.mrf.mxu3  ;;  %vm2416_vm2 = vcmp.gt.f32.partialorder %v7051_v7, 0.0 }
 0x376   : > { %8240 = vst [vmem:[#allocation120_spill] sm:$0xff] %v7088_v23 }
 0x377   : > { %v2121_v14 = vsel %vm2120_vm14, %v6985_v42, %v2119_v25  ;;  %v2433_v42 = vmul.f32 1.442695, %v7051_v7  ;;  %4147 = vpow2.f32 %v2527_v21  ;;  %v4146_v9 = vpop.eup %4145 }
 0x378   : > { %v7065_v25 = vsel %vm2122_vm15, %v2123_v40, %v2121_v14  ;;  %v7082_v40 = vmul.f32 0.1, %v5940_v56  ;;  %v7086_v14 = vadd.f32 %v6020_v0, %v6967_v50  ;;  %v7101_v56 = vmul.f32 0.1, %v6034_v45  ;;  %v8248_v45 = vld [vmem:[#allocation87_spill] sm:$0xff] }
 0x379   : > { %8237 = vst [vmem:[#allocation119_spill] sm:$0xff] %v7065_v25  ;;  %4149 = vpow2.f32 %v2433_v42  ;;  %v7104_v0 = vmul.f32 0.1, %v6074_v30  ;;  %v8244_v42 = vld [vmem:[#allocation82_spill] sm:$0xff]  ;;  %v7118_v55 = vmul.f32 0.1, %v8248_v45 }
 0x37a   : > { %v7017_v61 = vpop.f32.mrf.mxu0  ;;  %4151 = vpow2.f32 %v2623_v10  ;;  %8242 = vst [vmem:[#allocation122_spill] sm:$0xff] %v7101_v56  ;;  %v7110_v10 = vmul.f32 0.1, %v6160_v51  ;;  %v2531_v30 = vmul.f32 1.442695, %v7086_v14  ;;  %vm2513_vm6 = vcmp.gt.f32.partialorder %v7086_v14, 0.0 }
 0x37b   : > { %8228 = vst [vmem:[#allocation114_spill] sm:$0xff] %v7017_v61  ;;  %v7126_v51 = vmul.f32 0.1, %v8251_v2  ;;  %v7134_v45 = vmul.f32 0.1, %v6367_v57 }
 0x37c   : > { %8243 = vst [vmem:[#allocation123_spill] sm:$0xff] %v7104_v0 }
 0x37d   : > { %2389 = vmatmul.f32.gmra.mxu0 %v7019_v58  ;;  %v8238_v58 = vld [vmem:[#allocation42_spill] sm:$0xff]  ;;  %8246 = vst [vmem:[#allocation124_spill] sm:$0xff] %v7110_v10 }
 0x37e   : > { %v7076_v5 = vadd.f32 %v8238_v58, %v6967_v50  ;;  %8239 = vst [vmem:[#allocation42_spill] sm:$0xff] %v7082_v40  ;;  %v7095_v58 = vadd.f32 %v6708_v22, %v6942_v15 }
 0x37f   : > { %8249 = vst [vmem:[#allocation87_spill] sm:$0xff] %v7118_v55  ;;  %v3437_v55 = vadd.f32 -1.0, %v4146_v9  ;;  %v8256_v9 = vld [vmem:[#allocation80_spill] sm:$0xff] }
 0x380   : > { %v2435_v22 = vmul.f32 1.442695, %v7076_v5  ;;  %v2625_v10 = vmul.f32 1.442695, %v7095_v58  ;;  %8254 = vst [vmem:[#allocation88_spill] sm:$0xff] %v7134_v45  ;;  %v7150_v45 = vadd.f32 %v8256_v9, %v7007_v29  ;;  %v7163_v9 = vpop.f32.mrf.mxu3  ;;  %vm2417_vm5 = vcmp.gt.f32.partialorder %v7076_v5, 0.0 }
 0x381   : > { %vm2608_vm8 = vcmp.gt.f32.partialorder %v7095_v58, 0.0 }
 0x382   : > { %v7029_v62 = vpop.f32.mrf.mxu0  ;;  %vm2515_vm13 = vcmp.gt.f32.partialorder %v7150_v45, 0.0 }
 0x383   : > { %8231 = vst [vmem:[#allocation117_spill] sm:$0xff] %v7029_v62 }
 0x385   : > { %2392 = vmatmul.f32.gmra.mxu0 %v7031_v32  ;;  %v2529_v32 = vmul.f32 1.442695, %v7063_v8 }
 0x387   : > { %4153 = vpow2.f32 %v2529_v32 }
 0x38a   : > { %v7053_v24 = vpop.f32.mrf.mxu0 }
 0x38b   : > { %8236 = vst [vmem:[#allocation41_spill] sm:$0xff] %v7053_v24 }
 0x38d   : > { %2395 = vmatmul.f32.gmra.mxu0 %v7065_v25  ;;  %v7107_v25 = vmul.f32 0.1, %v8244_v42  ;;  %v8250_v42 = vld [vmem:[#allocation43_spill] sm:$0xff] }
 0x38e   : > { %v7123_v32 = vadd.f32 %v8250_v42, %v6992_v49  ;;  %8252 = vst [vmem:[#allocation43_spill] sm:$0xff] %v7126_v51  ;;  %v7139_v42 = vadd.f32 %v6743_v48, %v6967_v50 }
 0x38f   : > { %8245 = vst [vmem:[#allocation82_spill] sm:$0xff] %v7107_v25  ;;  %v8253_v25 = vld [vmem:[#allocation78_spill] sm:$0xff] }
 0x390   : > { %v7131_v0 = vadd.f32 %v8253_v25, %v6992_v49  ;;  %v8255_v25 = vld [vmem:[#allocation45_spill] sm:$0xff]  ;;  %v2437_v57 = vmul.f32 1.442695, %v7123_v32  ;;  %vm2418_vm9 = vcmp.gt.f32.partialorder %v7123_v32, 0.0  ;;  %vm2609_vm11 = vcmp.gt.f32.partialorder %v7139_v42, 0.0 }
 0x392   : > { %v2351_v21 = vpop.f32.mrf.mxu0  ;;  %v2533_v48 = vmul.f32 1.442695, %v7131_v0  ;;  %vm2514_vm10 = vcmp.gt.f32.partialorder %v7131_v0, 0.0 }
 0x393   : > { %v7098_v17 = vadd.f32 %v2351_v21, %v6911_v44  ;;  %v4148_v44 = vpop.eup %4147  ;;  %v7115_v21 = vmul.f32 0.1, %v6212_v37 }
 0x394   : > { %v4150_v37 = vpop.eup %4149  ;;  %v3453_v51 = vadd.f32 -1.0, %v4148_v44  ;;  %v2479_v44 = vsel %vm2415_vm0, %v7038_v60, %v3437_v55  ;;  %v2535_v55 = vmul.f32 1.442695, %v7150_v45  ;;  %v8257_v60 = vld [vmem:[#allocation48_spill] sm:$0xff] }
 0x395   : > { %v2719_v12 = vmul.f32 1.442695, %v7098_v17  ;;  %8247 = vst [vmem:[#allocation125_spill] sm:$0xff] %v7115_v21  ;;  %v4152_v2 = vpop.eup %4151  ;;  %v7144_v21 = vadd.f32 %v8255_v25, %v7007_v29  ;;  %v2627_v25 = vmul.f32 1.442695, %v7139_v42  ;;  %v3438_v56 = vadd.f32 -1.0, %v4150_v37 }
 0x396   : > { %vm2703_vm7 = vcmp.gt.f32.partialorder %v7098_v17, 0.0 }
 0x397   : > { %4155 = vpow2.f32 %v2719_v12  ;;  %v4154_v12 = vpop.eup %4153  ;;  %v7194_v40 = vsel %vm2416_vm2, %v7051_v7, %v3438_v56  ;;  %vm2419_vm12 = vcmp.gt.f32.partialorder %v7144_v21, 0.0 }
 0x398   : > { %4157 = vpow2.f32 %v2435_v22  ;;  %v7156_v22 = vadd.f32 %v6777_v59, %v6992_v49  ;;  %v3454_v43 = vadd.f32 -1.0, %v4154_v12  ;;  %v2439_v59 = vmul.f32 1.442695, %v7144_v21 }
 0x399   : > { %4159 = vpow2.f32 %v2531_v30  ;;  %v3469_v30 = vadd.f32 -1.0, %v4152_v2  ;;  %v7173_v2 = vadd.f32 %v8257_v60, %v7023_v26 }
 0x39a   : > { %4161 = vpow2.f32 %v2625_v10  ;;  %v2575_v10 = vsel %vm2511_vm1, %v7042_v36, %v3453_v51  ;;  %v2629_v36 = vmul.f32 1.442695, %v7156_v22  ;;  %v8258_v51 = vld [vmem:[#allocation83_spill] sm:$0xff]  ;;  %v2354_v56 = vpop.f32.mrf.mxu0  ;;  %vm2610_vm14 = vcmp.gt.f32.partialorder %v7156_v22, 0.0 }
 0x39b   : > { %4163 = vpow2.f32 %v2437_v57  ;;  %v7179_v37 = vadd.f32 %v8258_v51, %v7023_v26  ;;  %v2671_v57 = vsel %vm2607_vm4, %v7058_v35, %v3469_v30  ;;  %v2783_v51 = vmax.f32 %v2479_v44, %v2575_v10 }
 0x39c   : > { %4165 = vpow2.f32 %v2533_v48  ;;  %v7199_v35 = vsel %vm2512_vm3, %v7063_v8, %v3454_v43  ;;  %vm2420_vm15 = vcmp.gt.f32.partialorder %v7173_v2, 0.0 }
 0x39d   : > { %v4156_v24 = vpop.eup %4155  ;;  %4167 = vpow2.f32 %v2627_v25  ;;  %vm2516_vm0 = vcmp.gt.f32.partialorder %v7179_v37, 0.0 }
 0x39e   : > { %v3485_v1 = vadd.f32 -1.0, %v4156_v24  ;;  %v4158_v19 = vpop.eup %4157  ;;  %v7187_v24 = vadd.f32 %v6808_v20, %v7007_v29  ;;  %4169 = vpow2.f32 %v2439_v59  ;;  %v2441_v20 = vmul.f32 1.442695, %v7173_v2 }
 0x39f   : > { %v4160_v12 = vpop.eup %4159  ;;  %4171 = vpow2.f32 %v2535_v55 }
 0x3a0   : > { %v2767_v48 = vsel %vm2703_vm7, %v7098_v17, %v3485_v1  ;;  %v4162_v60 = vpop.eup %4161  ;;  %v3439_v1 = vadd.f32 -1.0, %v4158_v19  ;;  %4173 = vpow2.f32 %v2629_v36  ;;  %v2537_v17 = vmul.f32 1.442695, %v7179_v37  ;;  %v7207_v19 = vpop.f32.mrf.mxu3 }
 0x3a1   : > { %v2799_v38 = vmax.f32 %v2671_v57, %v2767_v48  ;;  %v4164_v25 = vpop.eup %4163  ;;  %v3455_v59 = vadd.f32 -1.0, %v4160_v12  ;;  %v3470_v62 = vadd.f32 -1.0, %v4162_v60  ;;  %v2631_v7 = vmul.f32 1.442695, %v7187_v24 }
 0x3a2   : > { %v4166_v13 = vpop.eup %4165  ;;  %4175 = vpow2.f32 %v2441_v20  ;;  %v7210_v36 = vadd.f32 %v2354_v56, %v6942_v15  ;;  %v7215_v60 = vsel %vm2417_vm5, %v7076_v5, %v3439_v1  ;;  %v8259_v5 = vld [vmem:[#allocation50_spill] sm:$0xff]  ;;  %vm2611_vm1 = vcmp.gt.f32.partialorder %v7187_v24, 0.0 }
 0x3a3   : > { %v2815_v30 = vmax.f32 %v2783_v51, %v2799_v38  ;;  %v4168_v46 = vpop.eup %4167  ;;  %4177 = vpow2.f32 %v2537_v17  ;;  %v7220_v51 = vsel %vm2513_vm6, %v7086_v14, %v3455_v59  ;;  %v7225_v15 = vsel %vm2608_vm8, %v7095_v58, %v3470_v62  ;;  %v8260_v14 = vld [vmem:[#allocation85_spill] sm:$0xff] }
 0x3a4   : > { %v4170_v12 = vpop.eup %4169  ;;  %4179 = vpow2.f32 %v2631_v7  ;;  %v7229_v1 = vadd.f32 %v8259_v5, %v7044_v31  ;;  %v2721_v17 = vmul.f32 1.442695, %v7210_v36  ;;  %v3456_v56 = vadd.f32 -1.0, %v4166_v13 }
 0x3a5   : > { %v2831_v43 = vsub.f32 %v2479_v44, %v2815_v30  ;;  %v2879_v8 = vsub.f32 %v2575_v10, %v2815_v30  ;;  %v2927_v55 = vsub.f32 %v2671_v57, %v2815_v30  ;;  %v2975_v38 = vsub.f32 %v2767_v48, %v2815_v30  ;;  %v4172_v57 = vpop.eup %4171 }
 0x3a6   : > { %v4174_v20 = vpop.eup %4173  ;;  %v3440_v30 = vadd.f32 -1.0, %v4164_v25  ;;  %v7234_v59 = vadd.f32 %v8260_v14, %v7044_v31  ;;  %v3471_v62 = vadd.f32 -1.0, %v4168_v46  ;;  %v3441_v58 = vadd.f32 -1.0, %v4170_v12 }
 0x3a7   : > { %v2847_v44 = vmul.f32 1.442695, %v2831_v43  ;;  %v2895_v10 = vmul.f32 1.442695, %v2879_v8  ;;  %v2943_v48 = vmul.f32 1.442695, %v2927_v55  ;;  %v7239_v25 = vadd.f32 %v6843_v33, %v7023_v26 }
 0x3a8   : > { %v2991_v43 = vmul.f32 1.442695, %v2975_v38  ;;  %v4176_v7 = vpop.eup %4175  ;;  %v3457_v8 = vadd.f32 -1.0, %v4172_v57  ;;  %v3472_v55 = vadd.f32 -1.0, %v4174_v20  ;;  %v2443_v46 = vmul.f32 1.442695, %v7229_v1  ;;  %v7283_v14 = vpop.f32.mrf.mxu3 }
 0x3a9   : > { %4181 = vpow2.f32 %v2847_v44  ;;  %v4178_v13 = vpop.eup %4177  ;;  %v7245_v44 = vsel %vm2418_vm9, %v7123_v32, %v3440_v30  ;;  %v7252_v33 = vsel %vm2514_vm10, %v7131_v0, %v3456_v56  ;;  %v2539_v12 = vmul.f32 1.442695, %v7234_v59 }
 0x3aa   : > { %4183 = vpow2.f32 %v2895_v10  ;;  %v4180_v38 = vpop.eup %4179  ;;  %v8261_v10 = vld [vmem:[#allocation52_spill] sm:$0xff]  ;;  %v7267_v20 = vsel %vm2419_vm12, %v7144_v21, %v3441_v58  ;;  %v2633_v0 = vmul.f32 1.442695, %v7239_v25  ;;  %v7274_v5 = vsel %vm2515_vm13, %v7150_v45, %v3457_v8  ;;  %v8264_v21 = vld [vmem:[#allocation22_spill] sm:$0xff] }
 0x3ab   : > { %4185 = vpow2.f32 %v2943_v48  ;;  %v7257_v57 = vadd.f32 %v8261_v10, %v7088_v23  ;;  %v7262_v48 = vsel %vm2609_vm11, %v7139_v42, %v3471_v62  ;;  %v8263_v42 = vld [vmem:[#allocation60_spill] sm:$0xff]  ;;  %v7290_v45 = vadd.f32 %v6878_v53, %v7044_v31 }
 0x3ac   : > { %4187 = vpow2.f32 %v2721_v17  ;;  %v7277_v17 = vsel %vm2610_vm14, %v7156_v22, %v3472_v55  ;;  %v7281_v56 = vadd.f32 %v8263_v42, %v7088_v23  ;;  %v8265_v22 = vld [vmem:[#allocation44_spill] sm:$0xff]  ;;  %v3442_v55 = vadd.f32 -1.0, %v4176_v7 }
 0x3ad   : > { %4189 = vpow2.f32 %v2991_v43  ;;  %8262 = vst [vmem:[#allocation78_spill] sm:$0xff] %v7277_v17  ;;  %v3458_v10 = vadd.f32 -1.0, %v4178_v13  ;;  %v2445_v42 = vmul.f32 1.442695, %v7257_v57  ;;  %v8266_v17 = vld [vmem:[#allocation23_spill] sm:$0xff]  ;;  %vm2704_vm2 = vcmp.gt.f32.partialorder %v7210_v36, 0.0 }
 0x3ae   : > { %4191 = vpow2.f32 %v2443_v46  ;;  %v7296_v61 = vadd.f32 %v8266_v17, %v7163_v9  ;;  %v2541_v53 = vmul.f32 1.442695, %v7281_v56  ;;  %v8268_v17 = vld [vmem:[#allocation55_spill] sm:$0xff]  ;;  %vm2421_vm3 = vcmp.gt.f32.partialorder %v7229_v1, 0.0 }
 0x3af   : > { %v4182_v32 = vpop.eup %4181  ;;  %4193 = vpow2.f32 %v2539_v12  ;;  %v2635_v12 = vmul.f32 1.442695, %v7290_v45  ;;  %v7333_v29 = vsel %vm2516_vm0, %v7179_v37, %v3458_v10  ;;  %vm2517_vm4 = vcmp.gt.f32.partialorder %v7234_v59, 0.0 }
 0x3b0   : > { %v4184_v30 = vpop.eup %4183  ;;  %v3087_v43 = vmul.f32 %v4182_v32, %v8264_v21  ;;  %v3473_v21 = vadd.f32 -1.0, %v4180_v38  ;;  %4195 = vpow2.f32 %v2633_v0  ;;  %v7306_v38 = vadd.f32 %v6904_v63, %v7088_v23  ;;  %8272 = vst [vmem:[#allocation80_spill] sm:$0xff] %v7333_v29 }
 0x3b1   : > { %v3023_v62 = vadd.f32 %v4184_v30, %v4182_v32  ;;  %v3103_v58 = vmul.f32 %v4184_v30, %v8265_v22  ;;  %v4186_v8 = vpop.eup %4185  ;;  %v8267_v32 = vld [vmem:[#allocation62_spill] sm:$0xff]  ;;  %4197 = vpow2.f32 %v2445_v42  ;;  %v8269_v22 = vld [vmem:[#allocation75_spill] sm:$0xff]  ;;  %v2784_v63 = vmax.f32 %v7194_v40, %v7199_v35 }
 0x3b2   : > { %v4188_v26 = vpop.eup %4187  ;;  %v7301_v30 = vadd.f32 %v8267_v32, %v7163_v9  ;;  %v3135_v31 = vmul.f32 %v4186_v8, %v8269_v22  ;;  %v7322_v42 = vsel %vm2420_vm15, %v7173_v2, %v3442_v55  ;;  %v7338_v2 = vsel %vm2611_vm1, %v7187_v24, %v3473_v21  ;;  %v7342_v55 = vpop.f32.mrf.mxu3 }
 0x3b3   : > { %v3039_v46 = vadd.f32 %v4186_v8, %v3023_v62  ;;  %v4190_v28 = vpop.eup %4189  ;;  %v3119_v7 = vadd.f32 %v3103_v58, %v3087_v43  ;;  %v3486_v13 = vadd.f32 -1.0, %v4188_v26  ;;  %v7311_v62 = vadd.f32 %v8268_v17, %v7207_v19  ;;  %8270 = vst [vmem:[#allocation45_spill] sm:$0xff] %v7322_v42 }
 0x3b4   : > { %v4192_v43 = vpop.eup %4191  ;;  %v2447_v26 = vmul.f32 1.442695, %v7296_v61  ;;  %v2543_v8 = vmul.f32 1.442695, %v7301_v30  ;;  %8273 = vst [vmem:[#allocation48_spill] sm:$0xff] %v7338_v2  ;;  %vm2612_vm5 = vcmp.gt.f32.partialorder %v7239_v25, 0.0 }
 0x3b5   : > { %v3055_v0 = vadd.f32 %v4190_v28, %v3039_v46  ;;  %v2768_v32 = vsel %vm2704_vm2, %v7210_v36, %v3486_v13  ;;  %v4194_v46 = vpop.eup %4193  ;;  %v3151_v17 = vadd.f32 %v3135_v31, %v3119_v7  ;;  %v2637_v13 = vmul.f32 1.442695, %v7306_v38  ;;  %v2357_v7 = vpop.f32.mrf.mxu0 }
 0x3b6   : > { %v2800_v58 = vmax.f32 %v7225_v15, %v2768_v32  ;;  %v4196_v36 = vpop.eup %4195  ;;  %v2449_v31 = vmul.f32 1.442695, %v7311_v62  ;;  %vm2422_vm6 = vcmp.gt.f32.partialorder %v7257_v57, 0.0  ;;  %vm2518_vm7 = vcmp.gt.f32.partialorder %v7281_v56, 0.0 }
 0x3b7   : > { %4199 = vrcp.f32 %v3055_v0  ;;  %v8271_v0 = vld [vmem:[#allocation89_spill] sm:$0xff]  ;;  %v4198_v21 = vpop.eup %4197  ;;  %v3459_v29 = vadd.f32 -1.0, %v4194_v46  ;;  %vm2613_vm8 = vcmp.gt.f32.partialorder %v7290_v45, 0.0  ;;  %vm2423_vm9 = vcmp.gt.f32.partialorder %v7296_v61, 0.0 }
 0x3b8   : > { %4201 = vpow2.f32 %v2541_v53  ;;  %v7328_v22 = vadd.f32 %v8271_v0, %v7207_v19  ;;  %v2816_v23 = vmax.f32 %v2784_v63, %v2800_v58  ;;  %v3167_v53 = vmul.f32 %v4190_v28, %v6678_v18 }
 0x3b9   : > { %4203 = vpow2.f32 %v2635_v12  ;;  %v7353_v18 = vadd.f32 %v2357_v7, %v6967_v50  ;;  %v3443_v0 = vadd.f32 -1.0, %v4192_v43  ;;  %vm2519_vm10 = vcmp.gt.f32.partialorder %v7301_v30, 0.0 }
 0x3ba   : > { %4205 = vpow2.f32 %v2447_v26  ;;  %v2832_v37 = vsub.f32 %v7194_v40, %v2816_v23  ;;  %v2880_v10 = vsub.f32 %v7199_v35, %v2816_v23  ;;  %v2928_v24 = vsub.f32 %v7225_v15, %v2816_v23 }
 0x3bb   : > { %4207 = vpow2.f32 %v2543_v8  ;;  %v3183_v12 = vadd.f32 %v3167_v53, %v3151_v17  ;;  %v2976_v28 = vsub.f32 %v2768_v32, %v2816_v23  ;;  %v2545_v26 = vmul.f32 1.442695, %v7328_v22 }
 0x3bc   : > { %4209 = vpow2.f32 %v2637_v13  ;;  %v2849_v40 = vmul.f32 1.442695, %v2832_v37  ;;  %v2897_v58 = vmul.f32 1.442695, %v2880_v10  ;;  %v2945_v2 = vmul.f32 1.442695, %v2928_v24 }
 0x3bd   : > { %v4200_v63 = vpop.eup %4199  ;;  %4211 = vpow2.f32 %v2449_v31  ;;  %v7358_v8 = vadd.f32 %v6931_v11, %v7163_v9  ;;  %v2723_v50 = vmul.f32 1.442695, %v7353_v18  ;;  %v3474_v23 = vadd.f32 -1.0, %v4196_v36  ;;  %v8274_v31 = vld [vmem:[#allocation58_spill] sm:$0xff] }
 0x3be   : > { %v4202_v35 = vpop.eup %4201  ;;  %v3199_v15 = vmul.f32 %v4200_v63, %v3183_v12  ;;  %4213 = vpow2.f32 %v2849_v40  ;;  %v2993_v17 = vmul.f32 1.442695, %v2976_v28  ;;  %v3444_v53 = vadd.f32 -1.0, %v4198_v21  ;;  %v8276_v28 = vld [vmem:[#allocation24_spill] sm:$0xff] }
 0x3bf   : > { %v4204_v42 = vpop.eup %4203  ;;  %4215 = vpow2.f32 %v2897_v58  ;;  %v3460_v7 = vadd.f32 -1.0, %v4202_v35  ;;  %v7364_v11 = vadd.f32 %v8274_v31, %v7283_v14  ;;  %v7370_v10 = vsel %vm2421_vm3, %v7229_v1, %v3443_v0  ;;  %v8277_v58 = vld [vmem:[#allocation46_spill] sm:$0xff] }
 0x3c0   : > { %v3231_v32 = vmul.f32 0.9, %v3199_v15  ;;  %v4206_v13 = vpop.eup %4205  ;;  %4217 = vpow2.f32 %v2545_v26  ;;  %v3475_v46 = vadd.f32 -1.0, %v4204_v42  ;;  %v2639_v24 = vmul.f32 1.442695, %v7358_v8 }
 0x3c1   : > { %v4208_v43 = vpop.eup %4207  ;;  %4219 = vpow2.f32 %v2945_v2  ;;  %v7375_v21 = vadd.f32 %v6408_v4, %v7283_v14  ;;  %v7380_v12 = vsel %vm2517_vm4, %v7234_v59, %v3459_v29  ;;  %v7389_v1 = vadd.f32 %v6954_v54, %v7207_v19  ;;  %v7391_v2 = vpop.f32.mrf.mxu3 }
 0x3c2   : > { %v3247_v37 = vadd.f32 %v3231_v32, %v7072_v41  ;;  %v4210_v36 = vpop.eup %4209  ;;  %4221 = vpow2.f32 %v2723_v50  ;;  %v7385_v41 = vsel %vm2612_vm5, %v7239_v25, %v3474_v23  ;;  %8275 = vst [vmem:[#allocation83_spill] sm:$0xff] %v7391_v2  ;;  %v7401_v29 = vsel %vm2422_vm6, %v7257_v57, %v3444_v53  ;;  %v8278_v53 = vld [vmem:[#allocation61_spill] sm:$0xff] }
 0x3c3   : > { %v4212_v42 = vpop.eup %4211  ;;  %4223 = vpow2.f32 %v2993_v17  ;;  %v7406_v59 = vsel %vm2518_vm7, %v7281_v56, %v3460_v7  ;;  %v7413_v25 = vsel %vm2613_vm8, %v7290_v45, %v3475_v46  ;;  %vm2614_vm11 = vcmp.gt.f32.partialorder %v7306_v38, 0.0 }
 0x3c4   : > { %3263 = vst [vmem:[%s7395_s24] sm:$0xff] %v3247_v37  ;;  %v4214_v4 = vpop.eup %4213  ;;  %vm2424_vm12 = vcmp.gt.f32.partialorder %v7311_v62, 0.0  ;;  %v2451_v57 = vmul.f32 1.442695, %v7364_v11  ;;  %4225 = vpow2.f32 %v2639_v24  ;;  %v2547_v26 = vmul.f32 1.442695, %v7375_v21 }
 0x3c5   : > { %v4216_v54 = vpop.eup %4215  ;;  %v3088_v63 = vmul.f32 %v4214_v4, %v8276_v28  ;;  %v3445_v15 = vadd.f32 -1.0, %v4206_v13  ;;  %v3461_v50 = vadd.f32 -1.0, %v4208_v43  ;;  %vm2520_vm13 = vcmp.gt.f32.partialorder %v7328_v22, 0.0 }
 0x3c6   : > { %v4218_v56 = vpop.eup %4217  ;;  %v3024_v40 = vadd.f32 %v4216_v54, %v4214_v4  ;;  %v3104_v35 = vmul.f32 %v4216_v54, %v8277_v58  ;;  %v2641_v45 = vmul.f32 1.442695, %v7389_v1  ;;  %v3476_v32 = vadd.f32 -1.0, %v4210_v36 }
 0x3c7   : > { %v4220_v0 = vpop.eup %4219  ;;  %v3446_v17 = vadd.f32 -1.0, %v4212_v42  ;;  %v7425_v7 = vadd.f32 %v8278_v53, %v7342_v55  ;;  %4227 = vpow2.f32 %v2451_v57  ;;  %v7429_v37 = vadd.f32 %v6455_v34, %v7342_v55  ;;  %v8279_v42 = vld [vmem:[#allocation76_spill] sm:$0xff] }
 0x3c8   : > { %v4222_v23 = vpop.eup %4221  ;;  %v3040_v46 = vadd.f32 %v4220_v0, %v3024_v40  ;;  %v3120_v13 = vadd.f32 %v3104_v35, %v3088_v63  ;;  %v3462_v24 = vadd.f32 -1.0, %v4218_v56  ;;  %4229 = vpow2.f32 %v2547_v26 }
 0x3c9   : > { %v4224_v31 = vpop.eup %4223  ;;  %v3487_v43 = vadd.f32 -1.0, %v4222_v23  ;;  %vm2705_vm14 = vcmp.gt.f32.partialorder %v7353_v18, 0.0  ;;  %4231 = vpow2.f32 %v2641_v45  ;;  %v7434_v36 = vadd.f32 %v6975_v3, %v7283_v14  ;;  %v7454_v40 = vpop.f32.mrf.mxu3 }
 0x3ca   : > { %v3056_v4 = vadd.f32 %v4224_v31, %v3040_v46  ;;  %v3136_v54 = vmul.f32 %v4220_v0, %v8279_v42  ;;  %v4226_v28 = vpop.eup %4225  ;;  %v2453_v34 = vmul.f32 1.442695, %v7425_v7  ;;  %v2785_v63 = vmax.f32 %v7215_v60, %v7220_v51  ;;  %8280 = vst [vmem:[#allocation50_spill] sm:$0xff] %v7454_v40 }
 0x3cb   : > { %v2769_v57 = vsel %vm2705_vm14, %v7353_v18, %v3487_v43  ;;  %v7445_v26 = vsel %vm2423_vm9, %v7296_v61, %v3445_v15  ;;  %v7450_v3 = vsel %vm2519_vm10, %v7301_v30, %v3461_v50  ;;  %vm2615_vm15 = vcmp.gt.f32.partialorder %v7358_v8, 0.0  ;;  %v8281_v30 = vld [vmem:[#allocation65_spill] sm:$0xff] }
 0x3cc   : > { %4233 = vrcp.f32 %v3056_v4  ;;  %v2801_v56 = vmax.f32 %v7262_v48, %v2769_v57  ;;  %v2549_v18 = vmul.f32 1.442695, %v7429_v37  ;;  %v3152_v58 = vadd.f32 %v3136_v54, %v3120_v13 }
 0x3cd   : > { %v7459_v35 = vsel %vm2614_vm11, %v7306_v38, %v3476_v32  ;;  %v7464_v61 = vsel %vm2424_vm12, %v7311_v62, %v3446_v17  ;;  %v7468_v0 = vadd.f32 %v8281_v30, %v7391_v2  ;;  %v4228_v50 = vpop.eup %4227  ;;  %v7473_v45 = vsel %vm2520_vm13, %v7328_v22, %v3462_v24  ;;  %v2360_v62 = vpop.f32.mrf.mxu0  ;;  %v8282_v30 = vld [vmem:[#allocation69_spill] sm:$0xff] }
 0x3ce   : > { %v2817_v15 = vmax.f32 %v2785_v63, %v2801_v56  ;;  %v3477_v23 = vadd.f32 -1.0, %v4226_v28  ;;  %vm2425_vm0 = vcmp.gt.f32.partialorder %v7364_v11, 0.0  ;;  %v2643_v38 = vmul.f32 1.442695, %v7434_v36  ;;  %v4230_v17 = vpop.eup %4229 }
 0x3cf   : > { %v3168_v32 = vmul.f32 %v4224_v31, %v6717_v52  ;;  %vm2521_vm1 = vcmp.gt.f32.partialorder %v7375_v21, 0.0  ;;  %vm2616_vm2 = vcmp.gt.f32.partialorder %v7389_v1, 0.0  ;;  %4235 = vpow2.f32 %v2453_v34  ;;  %v4232_v13 = vpop.eup %4231 }
 0x3d0   : > { %v2833_v53 = vsub.f32 %v7215_v60, %v2817_v15  ;;  %v2881_v46 = vsub.f32 %v7220_v51, %v2817_v15  ;;  %v2929_v22 = vsub.f32 %v7262_v48, %v2817_v15  ;;  %4237 = vpow2.f32 %v2549_v18 }
 0x3d1   : > { %v3184_v43 = vadd.f32 %v3168_v32, %v3152_v58  ;;  %v2977_v24 = vsub.f32 %v2769_v57, %v2817_v15  ;;  %v7484_v4 = vadd.f32 %v2360_v62, %v6992_v49  ;;  %v2455_v31 = vmul.f32 1.442695, %v7468_v0  ;;  %v7508_v32 = vpop.f32.mrf.mxu3 }
 0x3d2   : > { %v4234_v52 = vpop.eup %4233  ;;  %v7489_v42 = vadd.f32 %v6505_v6, %v7391_v2  ;;  %v2851_v54 = vmul.f32 1.442695, %v2833_v53  ;;  %v2899_v60 = vmul.f32 1.442695, %v2881_v46  ;;  %4239 = vpow2.f32 %v2643_v38 }
 0x3d3   : > { %v7493_v51 = vadd.f32 %v6994_v47, %v7342_v55  ;;  %v3200_v48 = vmul.f32 %v4234_v52, %v3184_v43  ;;  %v2947_v28 = vmul.f32 1.442695, %v2929_v22  ;;  %v3447_v57 = vadd.f32 -1.0, %v4228_v50  ;;  %v8285_v43 = vld [vmem:[#allocation26_spill] sm:$0xff] }
 0x3d4   : > { %v3463_v34 = vadd.f32 -1.0, %v4230_v17  ;;  %4241 = vpow2.f32 %v2851_v54  ;;  %v2725_v49 = vmul.f32 1.442695, %v7484_v4  ;;  %v3478_v63 = vadd.f32 -1.0, %v4232_v13 }
 0x3d5   : > { %v3232_v56 = vmul.f32 0.9, %v3200_v48  ;;  %4243 = vpow2.f32 %v2899_v60  ;;  %v2995_v18 = vmul.f32 1.442695, %v2977_v24  ;;  %v4236_v6 = vpop.eup %4235  ;;  %v7499_v58 = vsel %vm2615_vm15, %v7358_v8, %v3477_v23  ;;  %v2363_v52 = vpop.f32.mrf.mxu0 }
 0x3d6   : > { %4245 = vpow2.f32 %v2455_v31  ;;  %v2551_v47 = vmul.f32 1.442695, %v7489_v42  ;;  %v7504_v15 = vadd.f32 %v8282_v30, %v7454_v40  ;;  %v4238_v50 = vpop.eup %4237  ;;  %vm2426_vm3 = vcmp.gt.f32.partialorder %v7425_v7, 0.0  ;;  %v8291_v30 = vld [vmem:[#allocation45_spill] sm:$0xff] }
 0x3d7   : > { %v2645_v38 = vmul.f32 1.442695, %v7493_v51  ;;  %v3248_v62 = vadd.f32 %v3232_v56, %v7079_v27  ;;  %4247 = vpow2.f32 %v2947_v28  ;;  %v7514_v8 = vsel %vm2425_vm0, %v7364_v11, %v3447_v57  ;;  %v8286_v28 = vld [vmem:[#allocation47_spill] sm:$0xff] }
 0x3d8   : > { %8283 = vst [vmem:[#allocation85_spill] sm:$0xff] %v7514_v8  ;;  %vm2522_vm4 = vcmp.gt.f32.partialorder %v7429_v37, 0.0  ;;  %v7519_v23 = vadd.f32 %v6556_v39, %v7454_v40  ;;  %4249 = vpow2.f32 %v2725_v49  ;;  %v4240_v17 = vpop.eup %4239  ;;  %v7524_v53 = vsel %vm2521_vm1, %v7375_v21, %v3463_v34  ;;  %v8287_v34 = vld [vmem:[#allocation112_spill] sm:$0xff] }
 0x3d9   : > { %8284 = vst [vmem:[#allocation52_spill] sm:$0xff] %v7524_v53  ;;  %v7529_v27 = vsel %vm2616_vm2, %v7389_v1, %v3478_v63  ;;  %v3448_v11 = vadd.f32 -1.0, %v4236_v6  ;;  %vm2617_vm5 = vcmp.gt.f32.partialorder %v7434_v36, 0.0  ;;  %4251 = vpow2.f32 %v2995_v18  ;;  %v8289_v18 = vld [vmem:[#allocation71_spill] sm:$0xff] }
 0x3da   : > { %3264 = vst [vmem:[%s7395_s24 + $0x8] sm:$0xff] %v3248_v62  ;;  %v4242_v46 = vpop.eup %4241  ;;  %v3464_v39 = vadd.f32 -1.0, %v4238_v50  ;;  %4253 = vpow2.f32 %v2551_v47  ;;  %v2457_v22 = vmul.f32 1.442695, %v7504_v15  ;;  %v7536_v13 = vadd.f32 %v7005_v16, %v7391_v2  ;;  %v8290_v47 = vld [vmem:[#allocation80_spill] sm:$0xff] }
 0x3db   : > { %v4244_v21 = vpop.eup %4243  ;;  %4255 = vpow2.f32 %v2645_v38  ;;  %v3089_v24 = vmul.f32 %v4242_v46, %v8285_v43  ;;  %v2786_v1 = vmax.f32 %v7245_v44, %v7252_v33  ;;  %v2553_v60 = vmul.f32 1.442695, %v7519_v23 }
 0x3dc   : > { %v4246_v54 = vpop.eup %4245  ;;  %v3025_v48 = vadd.f32 %v4244_v21, %v4242_v46  ;;  %v3105_v57 = vmul.f32 %v4244_v21, %v8286_v28  ;;  %v7546_v16 = vadd.f32 %v2363_v52, %v8287_v34  ;;  %v7551_v63 = vsel %vm2426_vm3, %v7425_v7, %v3448_v11 }
 0x3dd   : > { %v4248_v49 = vpop.eup %4247  ;;  %8288 = vst [vmem:[#allocation60_spill] sm:$0xff] %v7551_v63  ;;  %v3479_v56 = vadd.f32 -1.0, %v4240_v17  ;;  %v7555_v6 = vadd.f32 %v8289_v18, %v7508_v32  ;;  %v7562_v62 = vsel %vm2522_vm4, %v7429_v37, %v3464_v39  ;;  %4257 = vpow2.f32 %v2457_v22  ;;  %v8293_v17 = vld [vmem:[#allocation98_spill] sm:$0xff] }
 0x3de   : > { %v4250_v38 = vpop.eup %4249  ;;  %8292 = vst [vmem:[#allocation22_spill] sm:$0xff] %v7562_v62  ;;  %v2647_v46 = vmul.f32 1.442695, %v7536_v13  ;;  %v3041_v21 = vadd.f32 %v4248_v49, %v3025_v48  ;;  %v7567_v11 = vadd.f32 %v8293_v17, %v7508_v32  ;;  %v3121_v43 = vadd.f32 %v3105_v57, %v3089_v24  ;;  %v8294_v18 = vld [vmem:[#allocation114_spill] sm:$0xff]  ;;  %v7576_v48 = vpop.f32.mrf.mxu3  ;;  %v8295_v17 = vld [vmem:[#allocation77_spill] sm:$0xff] }
 0x3df   : > { %v4252_v7 = vpop.eup %4251  ;;  %v3488_v52 = vadd.f32 -1.0, %v4250_v38  ;;  %v2727_v28 = vmul.f32 1.442695, %v7546_v16  ;;  %4259 = vpow2.f32 %v2553_v60  ;;  %v7572_v50 = vadd.f32 %v8294_v18, %v7454_v40  ;;  %v8297_v57 = vld [vmem:[#allocation78_spill] sm:$0xff] }
 0x3e0   : > { %v4254_v34 = vpop.eup %4253  ;;  %v3057_v37 = vadd.f32 %v4252_v7, %v3041_v21  ;;  %vm2706_vm6 = vcmp.gt.f32.partialorder %v7484_v4, 0.0  ;;  %v2459_v22 = vmul.f32 1.442695, %v7555_v6  ;;  %v3137_v31 = vmul.f32 %v4248_v49, %v8295_v17  ;;  %v8300_v21 = vld [vmem:[#allocation116_spill] sm:$0xff] }
 0x3e1   : > { %v4256_v39 = vpop.eup %4255  ;;  %v2770_v24 = vsel %vm2706_vm6, %v7484_v4, %v3488_v52  ;;  %4261 = vpow2.f32 %v2727_v28  ;;  %v7583_v60 = vsel %vm2617_vm5, %v7434_v36, %v3479_v56  ;;  %vm2427_vm7 = vcmp.gt.f32.partialorder %v7468_v0, 0.0  ;;  %v2366_v4 = vpop.f32.mrf.mxu0  ;;  %v8298_v56 = vld [vmem:[#allocation73_spill] sm:$0xff] }
 0x3e2   : > { %8296 = vst [vmem:[#allocation44_spill] sm:$0xff] %v7583_v60  ;;  %4263 = vrcp.f32 %v3057_v37  ;;  %v2802_v38 = vmax.f32 %v8297_v57, %v2770_v24  ;;  %v3449_v18 = vadd.f32 -1.0, %v4246_v54  ;;  %v2555_v49 = vmul.f32 1.442695, %v7567_v11  ;;  %v8302_v60 = vld [vmem:[#allocation100_spill] sm:$0xff] }
 0x3e3   : > { %4265 = vpow2.f32 %v2647_v46  ;;  %v3153_v17 = vadd.f32 %v3137_v31, %v3121_v43  ;;  %v4258_v52 = vpop.eup %4257  ;;  %vm2523_vm8 = vcmp.gt.f32.partialorder %v7489_v42, 0.0  ;;  %vm2618_vm9 = vcmp.gt.f32.partialorder %v7493_v51, 0.0  ;;  %v8301_v31 = vld [vmem:[#allocation102_spill] sm:$0xff] }
 0x3e4   : > { %v2649_v36 = vmul.f32 1.442695, %v7572_v50  ;;  %v7595_v28 = vadd.f32 %v8298_v56, %v7576_v48  ;;  %v2818_v37 = vmax.f32 %v2786_v1, %v2802_v38  ;;  %v7598_v40 = vadd.f32 %v2366_v4, %v8300_v21 }
 0x3e5   : > { %v3465_v54 = vadd.f32 -1.0, %v4254_v34  ;;  %v3480_v46 = vadd.f32 -1.0, %v4256_v39  ;;  %4267 = vpow2.f32 %v2459_v22  ;;  %v3169_v43 = vmul.f32 %v4252_v7, %v8301_v31  ;;  %v4260_v2 = vpop.eup %4259 }
 0x3e6   : > { %8299 = vst [vmem:[#allocation23_spill] sm:$0xff] %v7595_v28  ;;  %v7603_v63 = vadd.f32 %v8302_v60, %v7576_v48  ;;  %v2834_v62 = vsub.f32 %v7245_v44, %v2818_v37  ;;  %v2882_v8 = vsub.f32 %v7252_v33, %v2818_v37  ;;  %v2930_v56 = vsub.f32 %v8297_v57, %v2818_v37  ;;  %v8304_v57 = vld [vmem:[#allocation117_spill] sm:$0xff] }
 0x3e7   : > { %v4262_v1 = vpop.eup %4261  ;;  %4269 = vpow2.f32 %v2555_v49  ;;  %v3185_v38 = vadd.f32 %v3169_v43, %v3153_v17  ;;  %v2978_v21 = vsub.f32 %v2770_v24, %v2818_v37  ;;  %v2729_v34 = vmul.f32 1.442695, %v7598_v40  ;;  %v8305_v43 = vld [vmem:[#allocation48_spill] sm:$0xff] }
 0x3e8   : > { %8303 = vst [vmem:[#allocation62_spill] sm:$0xff] %v7603_v63  ;;  %v4264_v39 = vpop.eup %4263  ;;  %4271 = vpow2.f32 %v2649_v36  ;;  %v2461_v7 = vmul.f32 1.442695, %v7595_v28  ;;  %v2853_v22 = vmul.f32 1.442695, %v2834_v62  ;;  %v3489_v44 = vadd.f32 -1.0, %v4262_v1 }
 0x3e9   : > { %v2901_v4 = vmul.f32 1.442695, %v2882_v8  ;;  %v4266_v60 = vpop.eup %4265  ;;  %v3201_v31 = vmul.f32 %v4264_v39, %v3185_v38  ;;  %v2949_v53 = vmul.f32 1.442695, %v2930_v56  ;;  %4273 = vpow2.f32 %v2729_v34  ;;  %v2369_v36 = vpop.f32.mrf.mxu0  ;;  %v8306_v1 = vld [vmem:[#allocation40_spill] sm:$0xff] }
 0x3ea   : > { %v2557_v33 = vmul.f32 1.442695, %v7603_v63  ;;  %v7613_v49 = vadd.f32 %v8304_v57, %v7508_v32  ;;  %4275 = vpow2.f32 %v2853_v22  ;;  %vm2707_vm10 = vcmp.gt.f32.partialorder %v7546_v16, 0.0 }
 0x3eb   : > { %v7616_v24 = vpop.eup %4267  ;;  %v3233_v17 = vmul.f32 0.9, %v3201_v31  ;;  %4277 = vpow2.f32 %v2901_v4  ;;  %v2997_v62 = vmul.f32 1.442695, %v2978_v21  ;;  %v2771_v8 = vsel %vm2707_vm10, %v7546_v16, %v3489_v44 }
 0x3ec   : > { %v7622_v37 = vsel %vm2427_vm7, %v7468_v0, %v3449_v18  ;;  %vm2428_vm11 = vcmp.gt.f32.partialorder %v7504_v15, 0.0  ;;  %4279 = vpow2.f32 %v2461_v7  ;;  %v2803_v56 = vmax.f32 %v8305_v43, %v2771_v8  ;;  %v8307_v18 = vld [vmem:[#allocation42_spill] sm:$0xff] }
 0x3ed   : > { %v7627_v38 = vadd.f32 %v2369_v36, %v8306_v1  ;;  %v7629_v34 = vpop.eup %4269  ;;  %v7634_v16 = vsel %vm2523_vm8, %v7489_v42, %v3465_v54  ;;  %v7639_v0 = vsel %vm2618_vm9, %v7493_v51, %v3480_v46  ;;  %vm2524_vm12 = vcmp.gt.f32.partialorder %v7519_v23, 0.0  ;;  %v8309_v36 = vld [vmem:[#allocation27_spill] sm:$0xff] }
 0x3ee   : > { %v3249_v21 = vadd.f32 %v3233_v17, %v8307_v18  ;;  %4281 = vpow2.f32 %v2949_v53  ;;  %v7643_v39 = vpop.eup %4271  ;;  %v3450_v7 = vadd.f32 -1.0, %v4258_v52  ;;  %vm2619_vm13 = vcmp.gt.f32.partialorder %v7536_v13, 0.0  ;;  %v8310_v18 = vld [vmem:[#allocation49_spill] sm:$0xff] }
 0x3ef   : > { %4283 = vpow2.f32 %v2557_v33  ;;  %v8308_v42 = vmax.f32 %v7267_v20, %v7274_v5  ;;  %v2731_v22 = vmul.f32 1.442695, %v7627_v38  ;;  %v4274_v4 = vpop.eup %4273  ;;  %v3466_v51 = vadd.f32 -1.0, %v4260_v2 }
 0x3f0   : > { %v3481_v46 = vadd.f32 -1.0, %v4266_v60  ;;  %v2651_v31 = vmul.f32 1.442695, %v7613_v49  ;;  %3265 = vst [vmem:[%s7395_s24 + $0x10] sm:$0xff] %v3249_v21  ;;  %4285 = vpow2.f32 %v2997_v62  ;;  %v4276_v53 = vpop.eup %4275  ;;  %vm2708_vm14 = vcmp.gt.f32.partialorder %v7598_v40, 0.0 }
 0x3f1   : > { %v2819_v54 = vmax.f32 %v8308_v42, %v2803_v56  ;;  %v4278_v17 = vpop.eup %4277  ;;  %v3090_v56 = vmul.f32 %v4276_v53, %v8309_v36  ;;  %v3490_v1 = vadd.f32 -1.0, %v4274_v4  ;;  %4287 = vpow2.f32 %v2731_v22 }
 0x3f2   : > { %v7657_v2 = vpop.eup %4279  ;;  %v3026_v60 = vadd.f32 %v4278_v17, %v4276_v53  ;;  %v3106_v62 = vmul.f32 %v4278_v17, %v8310_v18  ;;  %4289 = vpow2.f32 %v2651_v31  ;;  %v2790_v22 = vmax.f32 %v7401_v29, %v7406_v59 }
 0x3f3   : > { %v2835_v44 = vsub.f32 %v7267_v20, %v2819_v54  ;;  %v2883_v52 = vsub.f32 %v7274_v5, %v2819_v54  ;;  %v2931_v33 = vsub.f32 %v8305_v43, %v2819_v54  ;;  %v2979_v57 = vsub.f32 %v2771_v8, %v2819_v54  ;;  %v2372_v43 = vpop.f32.mrf.mxu0 }
 0x3f4   : > { %v4282_v20 = vpop.eup %4281  ;;  %v2772_v8 = vsel %vm2708_vm14, %v7598_v40, %v3490_v1  ;;  %v3122_v28 = vadd.f32 %v3106_v62, %v3090_v56  ;;  %v7668_v53 = vsel %vm2428_vm11, %v7504_v15, %v3450_v7  ;;  %v7683_v15 = vsel %vm2619_vm13, %v7536_v13, %v3481_v46 }
 0x3f5   : > { %v2855_v21 = vmul.f32 1.442695, %v2835_v44  ;;  %v2903_v42 = vmul.f32 1.442695, %v2883_v52  ;;  %v2951_v5 = vmul.f32 1.442695, %v2931_v33  ;;  %v7661_v54 = vpop.eup %4283  ;;  %v3042_v36 = vadd.f32 %v4282_v20, %v3026_v60 }
 0x3f6   : > { %v2999_v63 = vmul.f32 1.442695, %v2979_v57  ;;  %v4286_v4 = vpop.eup %4285  ;;  %v2804_v31 = vmax.f32 %v7385_v41, %v2772_v8  ;;  %v8311_v44 = vld [vmem:[#allocation120_spill] sm:$0xff]  ;;  %v7677_v52 = vsel %vm2524_vm12, %v7519_v23, %v3466_v51  ;;  %v8312_v57 = vld [vmem:[#allocation79_spill] sm:$0xff]  ;;  %v8313_v7 = vmax.f32 %v8291_v30, %v8290_v47 }
 0x3f7   : > { %4291 = vpow2.f32 %v2855_v21  ;;  %v7672_v40 = vadd.f32 %v2372_v43, %v8311_v44  ;;  %v3058_v33 = vadd.f32 %v4286_v4, %v3042_v36  ;;  %v3138_v17 = vmul.f32 %v4282_v20, %v8312_v57  ;;  %v4288_v56 = vpop.eup %4287  ;;  %v8315_v36 = vld [vmem:[#allocation28_spill] sm:$0xff] }
 0x3f8   : > { %4293 = vpow2.f32 %v2903_v42  ;;  %v2820_v1 = vmax.f32 %v8313_v7, %v2804_v31  ;;  %vm2709_vm15 = vcmp.gt.f32.partialorder %v7627_v38, 0.0  ;;  %v3491_v51 = vadd.f32 -1.0, %v4288_v56  ;;  %v7690_v18 = vpop.eup %4289  ;;  %v8314_v42 = vld [vmem:[#allocation103_spill] sm:$0xff] }
 0x3f9   : > { %4295 = vpow2.f32 %v2951_v5  ;;  %v2733_v60 = vmul.f32 1.442695, %v7672_v40  ;;  %v3154_v23 = vadd.f32 %v3138_v17, %v3122_v28  ;;  %v3170_v20 = vmul.f32 %v4286_v4, %v8314_v42 }
 0x3fa   : > { %4297 = vpow2.f32 %v2999_v63  ;;  %v2836_v62 = vsub.f32 %v8291_v30, %v2820_v1  ;;  %v2884_v21 = vsub.f32 %v8290_v47, %v2820_v1  ;;  %v2932_v13 = vsub.f32 %v7385_v41, %v2820_v1  ;;  %v8316_v41 = vld [vmem:[#allocation51_spill] sm:$0xff] }
 0x3fb   : > { %4299 = vrcp.f32 %v3058_v33  ;;  %v2980_v63 = vsub.f32 %v2772_v8, %v2820_v1  ;;  %v2773_v5 = vsel %vm2709_vm15, %v7627_v38, %v3491_v51  ;;  %v2791_v28 = vmax.f32 %v7445_v26, %v7450_v3  ;;  %v2375_v57 = vpop.f32.mrf.mxu0 }
 0x3fc   : > { %4301 = vpow2.f32 %v2733_v60  ;;  %v2857_v44 = vmul.f32 1.442695, %v2836_v62  ;;  %v2905_v33 = vmul.f32 1.442695, %v2884_v21  ;;  %v2953_v30 = vmul.f32 1.442695, %v2932_v13 }
 0x3fd   : > { %v4292_v46 = vpop.eup %4291  ;;  %v3001_v56 = vmul.f32 1.442695, %v2980_v63  ;;  %v2805_v4 = vmax.f32 %v7413_v25, %v2773_v5  ;;  %vm2429_vm0 = vcmp.gt.f32.partialorder %v7555_v6, 0.0  ;;  %v3451_v38 = vadd.f32 -1.0, %v7616_v24  ;;  %v8317_v63 = vld [vmem:[#allocation81_spill] sm:$0xff] }
 0x3fe   : > { %v4294_v43 = vpop.eup %4293  ;;  %v3091_v31 = vmul.f32 %v4292_v46, %v8315_v36  ;;  %v3186_v1 = vadd.f32 %v3170_v20, %v3154_v23  ;;  %4303 = vpow2.f32 %v2857_v44  ;;  %v7705_v60 = vadd.f32 %v2375_v57, %v7163_v9  ;;  %v8319_v20 = vld [vmem:[#allocation104_spill] sm:$0xff] }
 0x3ff   : > { %v4296_v47 = vpop.eup %4295  ;;  %v3027_v17 = vadd.f32 %v4294_v43, %v4292_v46  ;;  %v3107_v8 = vmul.f32 %v4294_v43, %v8316_v41  ;;  %4305 = vpow2.f32 %v2905_v33  ;;  %vm2710_vm1 = vcmp.gt.f32.partialorder %v7672_v40, 0.0 }
 0x400   : > { %v4298_v7 = vpop.eup %4297  ;;  %v3139_v46 = vmul.f32 %v4296_v47, %v8317_v63  ;;  %4307 = vpow2.f32 %v2953_v30  ;;  %v8318_v42 = vmax.f32 %v7370_v10, %v7380_v12  ;;  %v2735_v9 = vmul.f32 1.442695, %v7705_v60 }
 0x401   : > { %v4300_v51 = vpop.eup %4299  ;;  %v3043_v62 = vadd.f32 %v4296_v47, %v3027_v17  ;;  %v3123_v21 = vadd.f32 %v3107_v8, %v3091_v31  ;;  %v3171_v36 = vmul.f32 %v4298_v7, %v8319_v20  ;;  %4309 = vpow2.f32 %v3001_v56  ;;  %v8320_v8 = vld [vmem:[#allocation121_spill] sm:$0xff] }
 0x402   : > { %v3202_v13 = vmul.f32 %v4300_v51, %v3186_v1  ;;  %v2821_v43 = vmax.f32 %v8318_v42, %v2805_v4  ;;  %v4302_v24 = vpop.eup %4301  ;;  %v3482_v20 = vadd.f32 -1.0, %v7643_v39  ;;  %vm2525_vm2 = vcmp.gt.f32.partialorder %v7567_v11, 0.0 }
 0x403   : > { %v3059_v23 = vadd.f32 %v4298_v7, %v3043_v62  ;;  %v3155_v30 = vadd.f32 %v3139_v46, %v3123_v21  ;;  %v3492_v17 = vadd.f32 -1.0, %v4302_v24  ;;  %v2378_v51 = vpop.f32.mrf.mxu0  ;;  %v8322_v21 = vld [vmem:[#allocation53_spill] sm:$0xff]  ;;  %v7728_v24 = vsel %vm2429_vm0, %v7555_v6, %v3451_v38 }
 0x404   : > { %v3234_v44 = vmul.f32 0.9, %v3202_v13  ;;  %v2837_v31 = vsub.f32 %v7370_v10, %v2821_v43  ;;  %v2885_v33 = vsub.f32 %v7380_v12, %v2821_v43  ;;  %v2933_v57 = vsub.f32 %v7413_v25, %v2821_v43  ;;  %v4304_v41 = vpop.eup %4303  ;;  %v8321_v13 = vld [vmem:[#allocation29_spill] sm:$0xff] }
 0x405   : > { %4311 = vrcp.f32 %v3059_v23  ;;  %v2981_v47 = vsub.f32 %v2773_v5, %v2821_v43  ;;  %v4306_v62 = vpop.eup %4305  ;;  %v3092_v63 = vmul.f32 %v4304_v41, %v8321_v13  ;;  %v2774_v12 = vsel %vm2710_vm1, %v7672_v40, %v3492_v17 }
 0x406   : > { %v3250_v4 = vadd.f32 %v3234_v44, %v8320_v8  ;;  %v2859_v1 = vmul.f32 1.442695, %v2837_v31  ;;  %v2907_v7 = vmul.f32 1.442695, %v2885_v33  ;;  %v2955_v56 = vmul.f32 1.442695, %v2933_v57  ;;  %v4308_v25 = vpop.eup %4307 }
 0x407   : > { %v3003_v10 = vmul.f32 1.442695, %v2981_v47  ;;  %4313 = vpow2.f32 %v2735_v9  ;;  %v3028_v5 = vadd.f32 %v4306_v62, %v4304_v41  ;;  %v3108_v46 = vmul.f32 %v4306_v62, %v8322_v21  ;;  %v4310_v43 = vpop.eup %4309  ;;  %v8323_v33 = vld [vmem:[#allocation84_spill] sm:$0xff]  ;;  %v8325_v62 = vld [vmem:[#allocation30_spill] sm:$0xff] }
 0x408   : > { %3266 = vst [vmem:[%s7395_s24 + $0x18] sm:$0xff] %v3250_v4  ;;  %4315 = vpow2.f32 %v2859_v1  ;;  %v2806_v42 = vmax.f32 %v7459_v35, %v2774_v12  ;;  %v3467_v23 = vadd.f32 -1.0, %v7629_v34  ;;  %v3187_v40 = vadd.f32 %v3171_v36, %v3155_v30  ;;  %v8324_v36 = vld [vmem:[#allocation105_spill] sm:$0xff] }
 0x409   : > { %4317 = vpow2.f32 %v2907_v7  ;;  %v3044_v9 = vadd.f32 %v4308_v25, %v3028_v5  ;;  %v3124_v44 = vadd.f32 %v3108_v46, %v3092_v63  ;;  %vm2711_vm3 = vcmp.gt.f32.partialorder %v7705_v60, 0.0  ;;  %v8326_v5 = vld [vmem:[#allocation122_spill] sm:$0xff] }
 0x40a   : > { %v3140_v57 = vmul.f32 %v4308_v25, %v8323_v33  ;;  %4319 = vpow2.f32 %v2955_v56  ;;  %v2822_v6 = vmax.f32 %v2790_v22, %v2806_v42  ;;  %v7739_v34 = vadd.f32 %v2378_v51, %v7207_v19 }
 0x40b   : > { %v4312_v31 = vpop.eup %4311  ;;  %vm2620_vm4 = vcmp.gt.f32.partialorder %v7572_v50, 0.0  ;;  %v3060_v38 = vadd.f32 %v4310_v43, %v3044_v9  ;;  %v3172_v30 = vmul.f32 %v4310_v43, %v8324_v36  ;;  %4321 = vpow2.f32 %v3003_v10  ;;  %v2381_v56 = vpop.f32.mrf.mxu0  ;;  %v8329_v36 = vld [vmem:[#allocation86_spill] sm:$0xff] }
 0x40c   : > { %v3203_v39 = vmul.f32 %v4312_v31, %v3187_v40  ;;  %v2838_v17 = vsub.f32 %v7401_v29, %v2822_v6  ;;  %v2886_v41 = vsub.f32 %v7406_v59, %v2822_v6  ;;  %v2934_v8 = vsub.f32 %v7459_v35, %v2822_v6  ;;  %v8327_v59 = vld [vmem:[#allocation54_spill] sm:$0xff] }
 0x40d   : > { %v4314_v47 = vpop.eup %4313  ;;  %v2982_v4 = vsub.f32 %v2774_v12, %v2822_v6  ;;  %4323 = vrcp.f32 %v3060_v38  ;;  %v3156_v19 = vadd.f32 %v3140_v57, %v3124_v44  ;;  %v2737_v43 = vmul.f32 1.442695, %v7739_v34  ;;  %v8328_v44 = vld [vmem:[#allocation41_spill] sm:$0xff] }
 0x40e   : > { %v4316_v1 = vpop.eup %4315  ;;  %v3235_v22 = vmul.f32 0.9, %v3203_v39  ;;  %v3493_v7 = vadd.f32 -1.0, %v4314_v47  ;;  %v2861_v63 = vmul.f32 1.442695, %v2838_v17  ;;  %v7754_v40 = vadd.f32 %v2381_v56, %v7283_v14 }
 0x40f   : > { %v4318_v51 = vpop.eup %4317  ;;  %v3093_v13 = vmul.f32 %v4316_v1, %v8325_v62  ;;  %v2909_v10 = vmul.f32 1.442695, %v2886_v41  ;;  %v2957_v25 = vmul.f32 1.442695, %v2934_v8  ;;  %v3005_v35 = vmul.f32 1.442695, %v2982_v4 }
 0x410   : > { %v3251_v29 = vadd.f32 %v3235_v22, %v8326_v5  ;;  %v3029_v21 = vadd.f32 %v4318_v51, %v4316_v1  ;;  %v3109_v46 = vmul.f32 %v4318_v51, %v8327_v59  ;;  %v4320_v12 = vpop.eup %4319  ;;  %4325 = vpow2.f32 %v2861_v63  ;;  %v8330_v4 = vld [vmem:[#allocation106_spill] sm:$0xff]  ;;  %v8331_v62 = vld [vmem:[#allocation31_spill] sm:$0xff] }
 0x411   : > { %v2775_v42 = vsel %vm2711_vm3, %v7705_v60, %v3493_v7  ;;  %v4322_v9 = vpop.eup %4321  ;;  %v7758_v31 = vadd.f32 %v8328_v44, %v7576_v48  ;;  %4327 = vpow2.f32 %v2909_v10  ;;  %v7764_v6 = vsel %vm2525_vm2, %v7567_v11, %v3467_v23  ;;  %v8334_v44 = vld [vmem:[#allocation57_spill] sm:$0xff] }
 0x412   : > { %3267 = vst [vmem:[%s7395_s24 + $0x20] sm:$0xff] %v3251_v29  ;;  %v3045_v33 = vadd.f32 %v4320_v12, %v3029_v21  ;;  %v3125_v57 = vadd.f32 %v3109_v46, %v3093_v13  ;;  %v3188_v60 = vadd.f32 %v3172_v30, %v3156_v19  ;;  %4329 = vpow2.f32 %v2957_v25  ;;  %v8332_v25 = vld [vmem:[#allocation123_spill] sm:$0xff]  ;;  %v8333_v21 = vld [vmem:[#allocation25_spill] sm:$0xff] }
 0x413   : > { %v2807_v39 = vmax.f32 %v7499_v58, %v2775_v42  ;;  %v4324_v14 = vpop.eup %4323  ;;  %v3141_v47 = vmul.f32 %v4320_v12, %v8329_v36  ;;  %4331 = vpow2.f32 %v3005_v35  ;;  %v2739_v17 = vmul.f32 1.442695, %v7754_v40  ;;  %v2384_v22 = vpop.f32.mrf.mxu0 }
 0x414   : > { %v3061_v38 = vadd.f32 %v4322_v9, %v3045_v33  ;;  %v7772_v41 = vsel %vm2620_vm4, %v7572_v50, %v3482_v20  ;;  %v3204_v8 = vmul.f32 %v4324_v14, %v3188_v60  ;;  %4333 = vpow2.f32 %v2737_v43 }
 0x415   : > { %v2823_v11 = vmax.f32 %v2791_v28, %v2807_v39  ;;  %v2653_v23 = vmul.f32 1.442695, %v7758_v31  ;;  %v3157_v30 = vadd.f32 %v3141_v47, %v3125_v57  ;;  %v3173_v1 = vmul.f32 %v4322_v9, %v8330_v4 }
 0x416   : > { %4335 = vrcp.f32 %v3061_v38  ;;  %v4326_v19 = vpop.eup %4325  ;;  %v3236_v7 = vmul.f32 0.9, %v3204_v8  ;;  %v7784_v63 = vadd.f32 %v2384_v22, %v7342_v55  ;;  %vm2712_vm5 = vcmp.gt.f32.partialorder %v7739_v34, 0.0  ;;  %v8335_v22 = vld [vmem:[#allocation107_spill] sm:$0xff] }
 0x417   : > { %v2839_v56 = vsub.f32 %v7445_v26, %v2823_v11  ;;  %v2887_v50 = vsub.f32 %v7450_v3, %v2823_v11  ;;  %v2935_v20 = vsub.f32 %v7499_v58, %v2823_v11  ;;  %v4328_v51 = vpop.eup %4327  ;;  %v3094_v28 = vmul.f32 %v4326_v19, %v8331_v62 }
 0x418   : > { %v2983_v13 = vsub.f32 %v2775_v42, %v2823_v11  ;;  %4337 = vpow2.f32 %v2739_v17  ;;  %v4330_v10 = vpop.eup %4329  ;;  %v3252_v5 = vadd.f32 %v3236_v7, %v8332_v25  ;;  %v3030_v29 = vadd.f32 %v4328_v51, %v4326_v19 }
 0x419   : > { %v3110_v59 = vmul.f32 %v4328_v51, %v8333_v21  ;;  %v2863_v26 = vmul.f32 1.442695, %v2839_v56  ;;  %v4332_v46 = vpop.eup %4331  ;;  %4339 = vpow2.f32 %v2653_v23  ;;  %v2911_v3 = vmul.f32 1.442695, %v2887_v50  ;;  %v8336_v56 = vld [vmem:[#allocation82_spill] sm:$0xff]  ;;  %v8338_v51 = vld [vmem:[#allocation85_spill] sm:$0xff] }
 0x41a   : > { %v2959_v58 = vmul.f32 1.442695, %v2935_v20  ;;  %v3007_v35 = vmul.f32 1.442695, %v2983_v13  ;;  %v4334_v12 = vpop.eup %4333  ;;  %3268 = vst [vmem:[%s7395_s24 + $0x28] sm:$0xff] %v3252_v5  ;;  %v3189_v43 = vadd.f32 %v3173_v1, %v3157_v30  ;;  %v3046_v42 = vadd.f32 %v4330_v10, %v3030_v29  ;;  %v8340_v5 = vld [vmem:[#allocation22_spill] sm:$0xff] }
 0x41b   : > { %v3126_v9 = vadd.f32 %v3110_v59, %v3094_v28  ;;  %4341 = vpow2.f32 %v2863_v26  ;;  %v3142_v33 = vmul.f32 %v4330_v10, %v8334_v44  ;;  %v3494_v57 = vadd.f32 -1.0, %v4334_v12  ;;  %v2387_v8 = vpop.f32.mrf.mxu0  ;;  %v8339_v10 = vld [vmem:[#allocation32_spill] sm:$0xff] }
 0x41c   : > { %v4336_v55 = vpop.eup %4335  ;;  %4343 = vpow2.f32 %v2911_v3  ;;  %v2741_v60 = vmul.f32 1.442695, %v7784_v63  ;;  %v3062_v14 = vadd.f32 %v4332_v46, %v3046_v42  ;;  %v2792_v17 = vmax.f32 %v7464_v61, %v7473_v45  ;;  %v8341_v29 = vld [vmem:[#allocation60_spill] sm:$0xff] }
 0x41d   : > { %v3205_v39 = vmul.f32 %v4336_v55, %v3189_v43  ;;  %4345 = vpow2.f32 %v2959_v58  ;;  %v3158_v36 = vadd.f32 %v3142_v33, %v3126_v9  ;;  %v2776_v47 = vsel %vm2712_vm5, %v7739_v34, %v3494_v57  ;;  %v8343_v9 = vld [vmem:[#allocation44_spill] sm:$0xff]  ;;  %v8344_v55 = vld [vmem:[#allocation83_spill] sm:$0xff] }
 0x41e   : > { %v4338_v38 = vpop.eup %4337  ;;  %4347 = vpow2.f32 %v3007_v35  ;;  %v7796_v11 = vadd.f32 -1.0, %v7657_v2  ;;  %v2808_v30 = vmax.f32 %v7529_v27, %v2776_v47  ;;  %v7802_v1 = vadd.f32 -1.0, %v7690_v18  ;;  %v8337_v2 = vld [vmem:[#allocation52_spill] sm:$0xff] }
 0x41f   : > { %v3237_v23 = vmul.f32 0.9, %v3205_v39  ;;  %4349 = vrcp.f32 %v3062_v14  ;;  %v7799_v4 = vpop.eup %4339  ;;  %v3174_v19 = vmul.f32 %v4332_v46, %v8335_v22  ;;  %v3495_v34 = vadd.f32 -1.0, %v4338_v38  ;;  %v8342_v46 = vld [vmem:[#allocation56_spill] sm:$0xff] }
 0x420   : > { %4351 = vpow2.f32 %v2741_v60  ;;  %v2824_v20 = vmax.f32 %v2792_v17, %v2808_v30  ;;  %vm2713_vm6 = vcmp.gt.f32.partialorder %v7754_v40, 0.0  ;;  %v2793_v62 = vmax.f32 %v8338_v51, %v8337_v2 }
 0x421   : > { %v4342_v7 = vpop.eup %4341  ;;  %v3253_v50 = vadd.f32 %v3237_v23, %v8336_v56  ;;  %v3190_v13 = vadd.f32 %v3174_v19, %v3158_v36  ;;  %v2777_v18 = vsel %vm2713_vm6, %v7754_v40, %v3495_v34  ;;  %v2794_v21 = vmax.f32 %v8341_v29, %v8340_v5 }
 0x422   : > { %v4344_v28 = vpop.eup %4343  ;;  %v3095_v25 = vmul.f32 %v4342_v7, %v8339_v10  ;;  %v2840_v58 = vsub.f32 %v7464_v61, %v2824_v20  ;;  %v2888_v35 = vsub.f32 %v7473_v45, %v2824_v20  ;;  %vm2621_vm7 = vcmp.gt.f32.partialorder %v7613_v49, 0.0  ;;  %v8345_v45 = vld [vmem:[#allocation64_spill] sm:$0xff] }
 0x423   : > { %v4346_v59 = vpop.eup %4345  ;;  %3269 = vst [vmem:[%s7395_s24 + $0x30] sm:$0xff] %v3253_v50  ;;  %v3031_v26 = vadd.f32 %v4344_v28, %v4342_v7  ;;  %v3111_v3 = vmul.f32 %v4344_v28, %v8342_v46  ;;  %v2936_v43 = vsub.f32 %v7529_v27, %v2824_v20  ;;  %v2984_v42 = vsub.f32 %v2776_v47, %v2824_v20  ;;  %v2390_v23 = vpop.f32.mrf.mxu0  ;;  %v8346_v50 = vld [vmem:[#allocation124_spill] sm:$0xff] }
 0x424   : > { %v4348_v12 = vpop.eup %4347  ;;  %v2809_v40 = vmax.f32 %v8343_v9, %v2777_v18  ;;  %v7821_v44 = vadd.f32 %v2387_v8, %v8344_v55  ;;  %v2865_v39 = vmul.f32 1.442695, %v2840_v58  ;;  %vm2714_vm8 = vcmp.gt.f32.partialorder %v7784_v63, 0.0 }
 0x425   : > { %v4350_v33 = vpop.eup %4349  ;;  %v3047_v57 = vadd.f32 %v4346_v59, %v3031_v26  ;;  %v3127_v60 = vadd.f32 %v3111_v3, %v3095_v25  ;;  %v3143_v38 = vmul.f32 %v4346_v59, %v8345_v45  ;;  %v2913_v36 = vmul.f32 1.442695, %v2888_v35  ;;  %v8347_v59 = vld [vmem:[#allocation108_spill] sm:$0xff] }
 0x426   : > { %v4352_v61 = vpop.eup %4351  ;;  %v3206_v14 = vmul.f32 %v4350_v33, %v3190_v13  ;;  %v2961_v17 = vmul.f32 1.442695, %v2936_v43  ;;  %4353 = vpow2.f32 %v2865_v39  ;;  %v3009_v47 = vmul.f32 1.442695, %v2984_v42  ;;  %v8348_v43 = vld [vmem:[#allocation33_spill] sm:$0xff]  ;;  %v8349_v33 = vld [vmem:[#allocation59_spill] sm:$0xff] }
 0x427   : > { %v3063_v27 = vadd.f32 %v4348_v12, %v3047_v57  ;;  %v2825_v30 = vmax.f32 %v2793_v62, %v2809_v40  ;;  %4355 = vpow2.f32 %v2913_v36  ;;  %v3496_v8 = vadd.f32 -1.0, %v4352_v61  ;;  %v8350_v61 = vld [vmem:[#allocation50_spill] sm:$0xff] }
 0x428   : > { %v3238_v22 = vmul.f32 0.9, %v3206_v14  ;;  %v2743_v19 = vmul.f32 1.442695, %v7821_v44  ;;  %v3159_v34 = vadd.f32 %v3143_v38, %v3127_v60  ;;  %v3175_v26 = vmul.f32 %v4348_v12, %v8347_v59 }
 0x429   : > { %4357 = vrcp.f32 %v3063_v27  ;;  %v2841_v7 = vsub.f32 %v8338_v51, %v2825_v30  ;;  %v2889_v56 = vsub.f32 %v8337_v2, %v2825_v30  ;;  %v2937_v28 = vsub.f32 %v8343_v9, %v2825_v30 }
 0x42a   : > { %v3254_v20 = vadd.f32 %v3238_v22, %v8346_v50  ;;  %4359 = vpow2.f32 %v2961_v17  ;;  %v2985_v13 = vsub.f32 %v2777_v18, %v2825_v30  ;;  %v2778_v25 = vsel %vm2714_vm8, %v7784_v63, %v3496_v8 }
 0x42b   : > { %4361 = vpow2.f32 %v3009_v47  ;;  %v2867_v62 = vmul.f32 1.442695, %v2841_v7  ;;  %v2915_v10 = vmul.f32 1.442695, %v2889_v56  ;;  %v2963_v46 = vmul.f32 1.442695, %v2937_v28  ;;  %v2393_v9 = vpop.f32.mrf.mxu0 }
 0x42c   : > { %3270 = vst [vmem:[%s7395_s24 + $0x38] sm:$0xff] %v3254_v20  ;;  %v2810_v51 = vmax.f32 %v7639_v0, %v2778_v25  ;;  %4363 = vpow2.f32 %v2743_v19  ;;  %v4354_v2 = vpop.eup %4353  ;;  %v7840_v18 = vsel %vm2621_vm7, %v7613_v49, %v7802_v1  ;;  %v3011_v3 = vmul.f32 1.442695, %v2985_v13  ;;  %v8352_v56 = vld [vmem:[#allocation125_spill] sm:$0xff]  ;;  %v8353_v20 = vld [vmem:[#allocation34_spill] sm:$0xff] }
 0x42d   : > { %4365 = vpow2.f32 %v2867_v62  ;;  %v2795_v58 = vmax.f32 %v7622_v37, %v7634_v16  ;;  %v4356_v63 = vpop.eup %4355  ;;  %v3191_v35 = vadd.f32 %v3175_v26, %v3159_v34  ;;  %v3096_v12 = vmul.f32 %v4354_v2, %v8348_v43  ;;  %v8354_v62 = vld [vmem:[#allocation63_spill] sm:$0xff] }
 0x42e   : > { %4367 = vpow2.f32 %v2915_v10  ;;  %v2826_v42 = vmax.f32 %v2794_v21, %v2810_v51  ;;  %v3032_v55 = vadd.f32 %v4356_v63, %v4354_v2  ;;  %v3112_v57 = vmul.f32 %v4356_v63, %v8349_v33  ;;  %v8355_v2 = vld [vmem:[#allocation109_spill] sm:$0xff]  ;;  %v8356_v43 = vld [vmem:[#allocation67_spill] sm:$0xff] }
 0x42f   : > { %v4358_v40 = vpop.eup %4357  ;;  %4369 = vpow2.f32 %v2963_v46  ;;  %vm2715_vm9 = vcmp.gt.f32.partialorder %v7821_v44, 0.0  ;;  %v7850_v14 = vadd.f32 %v2390_v23, %v8350_v61  ;;  %v7854_v36 = vadd.f32 %v2393_v9, %v7508_v32 }
 0x430   : > { %v4360_v49 = vpop.eup %4359  ;;  %v3207_v1 = vmul.f32 %v4358_v40, %v3191_v35  ;;  %v2842_v60 = vsub.f32 %v8341_v29, %v2826_v42  ;;  %v2890_v39 = vsub.f32 %v8340_v5, %v2826_v42  ;;  %4371 = vpow2.f32 %v3011_v3  ;;  %v8351_v5 = vld [vmem:[#allocation90_spill] sm:$0xff] }
 0x431   : > { %v4362_v45 = vpop.eup %4361  ;;  %v3048_v38 = vadd.f32 %v4360_v49, %v3032_v55  ;;  %v2938_v21 = vsub.f32 %v7639_v0, %v2826_v42  ;;  %v3128_v47 = vadd.f32 %v3112_v57, %v3096_v12  ;;  %v3144_v19 = vmul.f32 %v4360_v49, %v8351_v5 }
 0x432   : > { %v4364_v17 = vpop.eup %4363  ;;  %v3239_v27 = vmul.f32 0.9, %v3207_v1  ;;  %v2869_v30 = vmul.f32 1.442695, %v2842_v60  ;;  %v2917_v22 = vmul.f32 1.442695, %v2890_v39  ;;  %v2986_v34 = vsub.f32 %v2778_v25, %v2826_v42 }
 0x433   : > { %v4366_v29 = vpop.eup %4365  ;;  %v3064_v8 = vadd.f32 %v4362_v45, %v3048_v38  ;;  %v2965_v23 = vmul.f32 1.442695, %v2938_v21  ;;  %v3497_v32 = vadd.f32 -1.0, %v4364_v17  ;;  %v2745_v59 = vmul.f32 1.442695, %v7850_v14  ;;  %v2396_v1 = vpop.f32.mrf.mxu0  ;;  %v8357_v39 = vld [vmem:[#allocation110_spill] sm:$0xff] }
 0x434   : > { %v4368_v7 = vpop.eup %4367  ;;  %v3255_v50 = vadd.f32 %v3239_v27, %v8352_v56  ;;  %v3097_v0 = vmul.f32 %v4366_v29, %v8353_v20  ;;  %4373 = vpow2.f32 %v2869_v30  ;;  %v3160_v26 = vadd.f32 %v3144_v19, %v3128_v47 }
 0x435   : > { %v4370_v28 = vpop.eup %4369  ;;  %4375 = vrcp.f32 %v3064_v8  ;;  %v3033_v13 = vadd.f32 %v4368_v7, %v4366_v29  ;;  %v3113_v10 = vmul.f32 %v4368_v7, %v8354_v62  ;;  %v3013_v46 = vmul.f32 1.442695, %v2986_v34  ;;  %v8360_v8 = vld [vmem:[#allocation66_spill] sm:$0xff]  ;;  %v8362_v62 = vld [vmem:[#allocation87_spill] sm:$0xff] }
 0x436   : > { %3271 = vst [vmem:[%s7395_s24 + $0x40] sm:$0xff] %v3255_v50  ;;  %4377 = vpow2.f32 %v2917_v22  ;;  %v2779_v25 = vsel %vm2715_vm9, %v7821_v44, %v3497_v32  ;;  %v4372_v51 = vpop.eup %4371  ;;  %v3176_v3 = vmul.f32 %v4362_v45, %v8355_v2  ;;  %v3145_v12 = vmul.f32 %v4370_v28, %v8356_v43  ;;  %v8358_v45 = vld [vmem:[#allocation35_spill] sm:$0xff] }
 0x437   : > { %v3049_v63 = vadd.f32 %v4370_v28, %v3033_v13  ;;  %v3129_v35 = vadd.f32 %v3113_v10, %v3097_v0  ;;  %4379 = vpow2.f32 %v2965_v23  ;;  %v2811_v42 = vmax.f32 %v7683_v15, %v2779_v25 }
 0x438   : > { %4381 = vpow2.f32 %v3013_v46  ;;  %v2747_v9 = vmul.f32 1.442695, %v7854_v36  ;;  %vm2716_vm10 = vcmp.gt.f32.partialorder %v7850_v14, 0.0  ;;  %v2796_v44 = vmax.f32 %v7668_v53, %v7677_v52 }
 0x439   : > { %v3065_v40 = vadd.f32 %v4372_v51, %v3049_v63  ;;  %4383 = vpow2.f32 %v2745_v59  ;;  %v3192_v33 = vadd.f32 %v3176_v3, %v3160_v26  ;;  %v3161_v57 = vadd.f32 %v3145_v12, %v3129_v35 }
 0x43a   : > { %v4374_v55 = vpop.eup %4373  ;;  %v2827_v49 = vmax.f32 %v2795_v58, %v2811_v42  ;;  %4385 = vpow2.f32 %v2747_v9  ;;  %v3177_v61 = vmul.f32 %v4372_v51, %v8357_v39  ;;  %vm2717_vm11 = vcmp.gt.f32.partialorder %v7854_v36, 0.0  ;;  %v8359_v58 = vld [vmem:[#allocation23_spill] sm:$0xff] }
 0x43b   : > { %v4376_v60 = vpop.eup %4375  ;;  %4387 = vrcp.f32 %v3065_v40  ;;  %v3098_v38 = vmul.f32 %v4374_v55, %v8358_v45  ;;  %vm2430_vm12 = vcmp.gt.f32.partialorder %v8359_v58, 0.0  ;;  %v7884_v23 = vadd.f32 %v2396_v1, %v7576_v48  ;;  %v8363_v9 = vld [vmem:[#allocation111_spill] sm:$0xff] }
 0x43c   : > { %v4378_v21 = vpop.eup %4377  ;;  %v3208_v17 = vmul.f32 %v4376_v60, %v3192_v33  ;;  %v2843_v27 = vsub.f32 %v7622_v37, %v2827_v49  ;;  %v2891_v47 = vsub.f32 %v7634_v16, %v2827_v49  ;;  %v2939_v30 = vsub.f32 %v7683_v15, %v2827_v49  ;;  %v8361_v15 = vld [vmem:[#allocation92_spill] sm:$0xff]  ;;  %v8364_v33 = vld [vmem:[#allocation62_spill] sm:$0xff]  ;;  %v8365_v1 = vld [vmem:[#allocation43_spill] sm:$0xff] }
 0x43d   : > { %v4380_v22 = vpop.eup %4379  ;;  %v3034_v29 = vadd.f32 %v4378_v21, %v4374_v55  ;;  %v3114_v5 = vmul.f32 %v4378_v21, %v8360_v8  ;;  %v2987_v19 = vsub.f32 %v2779_v25, %v2827_v49  ;;  %v3193_v56 = vadd.f32 %v3177_v61, %v3161_v57 }
 0x43e   : > { %v4382_v34 = vpop.eup %4381  ;;  %v3240_v7 = vmul.f32 0.9, %v3208_v17  ;;  %v2871_v50 = vmul.f32 1.442695, %v2843_v27  ;;  %v2919_v20 = vmul.f32 1.442695, %v2891_v47  ;;  %v3146_v32 = vmul.f32 %v4380_v22, %v8361_v15 }
 0x43f   : > { %v4384_v37 = vpop.eup %4383  ;;  %v3050_v16 = vadd.f32 %v4380_v22, %v3034_v29  ;;  %v3130_v0 = vadd.f32 %v3114_v5, %v3098_v38  ;;  %v2967_v28 = vmul.f32 1.442695, %v2939_v30  ;;  %v3015_v59 = vmul.f32 1.442695, %v2987_v19  ;;  %v8366_v38 = vld [vmem:[#allocation36_spill] sm:$0xff] }
 0x440   : > { %v4386_v13 = vpop.eup %4385  ;;  %v3256_v10 = vadd.f32 %v3240_v7, %v8362_v62  ;;  %4389 = vpow2.f32 %v2871_v50  ;;  %v3498_v26 = vadd.f32 -1.0, %v4384_v37  ;;  %v2749_v51 = vmul.f32 1.442695, %v7884_v23  ;;  %v8367_v30 = vld [vmem:[#allocation68_spill] sm:$0xff] }
 0x441   : > { %v4388_v48 = vpop.eup %4387  ;;  %v3066_v46 = vadd.f32 %v4382_v34, %v3050_v16  ;;  %4391 = vpow2.f32 %v2919_v20  ;;  %v3499_v25 = vadd.f32 -1.0, %v4386_v13  ;;  %v3162_v3 = vadd.f32 %v3146_v32, %v3130_v0  ;;  %v8368_v20 = vld [vmem:[#allocation94_spill] sm:$0xff]  ;;  %v8369_v62 = vld [vmem:[#allocation88_spill] sm:$0xff] }
 0x442   : > { %3272 = vst [vmem:[%s7395_s24 + $0x48] sm:$0xff] %v3256_v10  ;;  %v3209_v2 = vmul.f32 %v4388_v48, %v3193_v56  ;;  %4393 = vpow2.f32 %v2967_v28  ;;  %v2780_v63 = vsel %vm2716_vm10, %v7850_v14, %v3498_v26  ;;  %v2797_v12 = vmax.f32 %v7728_v24, %v7764_v6 }
 0x443   : > { %4395 = vrcp.f32 %v3066_v46  ;;  %v2812_v35 = vmax.f32 %v7772_v41, %v2780_v63  ;;  %v7897_v43 = vsel %vm2717_vm11, %v7854_v36, %v3499_v25  ;;  %v3178_v40 = vmul.f32 %v4382_v34, %v8363_v9  ;;  %v8370_v46 = vld [vmem:[#allocation113_spill] sm:$0xff] }
 0x444   : > { %v3241_v42 = vmul.f32 0.9, %v3209_v2  ;;  %4397 = vpow2.f32 %v3015_v59  ;;  %v2813_v55 = vmax.f32 %v7840_v18, %v7897_v43  ;;  %vm2526_vm13 = vcmp.gt.f32.partialorder %v8364_v33, 0.0 }
 0x445   : > { %v3468_v14 = vadd.f32 -1.0, %v7661_v54  ;;  %v2828_v57 = vmax.f32 %v2796_v44, %v2812_v35  ;;  %4399 = vpow2.f32 %v2749_v51  ;;  %v7910_v36 = vsel %vm2430_vm12, %v8359_v58, %v7796_v11 }
 0x446   : > { %v4390_v49 = vpop.eup %4389  ;;  %v3257_v60 = vadd.f32 %v3241_v42, %v8365_v1  ;;  %v3194_v39 = vadd.f32 %v3178_v40, %v3162_v3  ;;  %v2829_v61 = vmax.f32 %v2797_v12, %v2813_v55  ;;  %vm2622_vm14 = vcmp.gt.f32.partialorder %v7758_v31, 0.0  ;;  %v8371_v12 = vld [vmem:[#allocation37_spill] sm:$0xff] }
 0x447   : > { %v4392_v45 = vpop.eup %4391  ;;  %v3099_v21 = vmul.f32 %v4390_v49, %v8366_v38  ;;  %v2844_v17 = vsub.f32 %v7668_v53, %v2828_v57  ;;  %v2892_v54 = vsub.f32 %v7677_v52, %v2828_v57  ;;  %v2940_v44 = vsub.f32 %v7772_v41, %v2828_v57  ;;  %v8374_v38 = vld [vmem:[#allocation96_spill] sm:$0xff] }
 0x448   : > { %v4394_v27 = vpop.eup %4393  ;;  %3273 = vst [vmem:[%s7395_s24 + $0x50] sm:$0xff] %v3257_v60  ;;  %v3035_v47 = vadd.f32 %v4392_v45, %v4390_v49  ;;  %v3115_v22 = vmul.f32 %v4392_v45, %v8367_v30  ;;  %v2988_v11 = vsub.f32 %v2780_v63, %v2828_v57  ;;  %v2845_v58 = vsub.f32 %v7728_v24, %v2829_v61  ;;  %v8373_v57 = vld [vmem:[#allocation91_spill] sm:$0xff]  ;;  %v8375_v30 = vld [vmem:[#allocation38_spill] sm:$0xff] }
 0x449   : > { %v4396_v29 = vpop.eup %4395  ;;  %v7923_v8 = vsel %vm2526_vm13, %v8364_v33, %v3468_v14  ;;  %v2873_v5 = vmul.f32 1.442695, %v2844_v17  ;;  %v2921_v53 = vmul.f32 1.442695, %v2892_v54  ;;  %v2969_v19 = vmul.f32 1.442695, %v2940_v44 }
 0x44a   : > { %v4398_v52 = vpop.eup %4397  ;;  %v3484_v41 = vadd.f32 -1.0, %v7799_v4  ;;  %v3210_v34 = vmul.f32 %v4396_v29, %v3194_v39  ;;  %v3051_v7 = vadd.f32 %v4394_v27, %v3035_v47  ;;  %v3131_v56 = vadd.f32 %v3115_v22, %v3099_v21  ;;  %v8376_v29 = vld [vmem:[#allocation72_spill] sm:$0xff] }
 0x44b   : > { %v4400_v50 = vpop.eup %4399  ;;  %v3147_v37 = vmul.f32 %v4394_v27, %v8368_v20  ;;  %4401 = vpow2.f32 %v2873_v5  ;;  %v3017_v24 = vmul.f32 1.442695, %v2988_v11  ;;  %v2893_v16 = vsub.f32 %v7764_v6, %v2829_v61  ;;  %v8377_v20 = vld [vmem:[#allocation115_spill] sm:$0xff] }
 0x44c   : > { %v3242_v0 = vmul.f32 0.9, %v3210_v34  ;;  %v3067_v15 = vadd.f32 %v4398_v52, %v3051_v7  ;;  %4403 = vpow2.f32 %v2921_v53  ;;  %v2875_v32 = vmul.f32 1.442695, %v2845_v58 }
 0x44d   : > { %4405 = vpow2.f32 %v2969_v19  ;;  %v2923_v28 = vmul.f32 1.442695, %v2893_v16  ;;  %v2941_v13 = vsub.f32 %v7840_v18, %v2829_v61  ;;  %v2989_v4 = vsub.f32 %v7897_v43, %v2829_v61  ;;  %v8378_v16 = vld [vmem:[#allocation99_spill] sm:$0xff] }
 0x44e   : > { %v3258_v10 = vadd.f32 %v3242_v0, %v8369_v62  ;;  %4407 = vrcp.f32 %v3067_v15  ;;  %v3163_v59 = vadd.f32 %v3147_v37, %v3131_v56  ;;  %v3500_v26 = vadd.f32 -1.0, %v4400_v50 }
 0x44f   : > { %4409 = vpow2.f32 %v3017_v24  ;;  %v2971_v6 = vmul.f32 1.442695, %v2941_v13  ;;  %vm2718_vm15 = vcmp.gt.f32.partialorder %v7884_v23, 0.0  ;;  %v2686_v48 = vsel %vm2622_vm14, %v7758_v31, %v3484_v41  ;;  %v8372_v31 = vld [vmem:[#allocation70_spill] sm:$0xff] }
 0x450   : > { %3274 = vst [vmem:[%s7395_s24 + $0x58] sm:$0xff] %v3258_v10  ;;  %v3179_v25 = vmul.f32 %v4398_v52, %v8370_v46  ;;  %4411 = vpow2.f32 %v2875_v32  ;;  %v2782_v18 = vsel %vm2718_vm15, %v7884_v23, %v3500_v26  ;;  %v2798_v2 = vmax.f32 %v7910_v36, %v7923_v8  ;;  %v8379_v10 = vld [vmem:[#allocation118_spill] sm:$0xff]  ;;  %v8380_v26 = vld [vmem:[#allocation39_spill] sm:$0xff] }
 0x451   : > { %v4402_v51 = vpop.eup %4401  ;;  %4413 = vpow2.f32 %v2923_v28  ;;  %v3019_v3 = vmul.f32 1.442695, %v2989_v4  ;;  %v2814_v63 = vmax.f32 %v2686_v48, %v2782_v18  ;;  %v3227_v23 = vmul.f32 0.1, %v8373_v57  ;;  %v8384_v57 = vld [vmem:[#allocation101_spill] sm:$0xff] }
 0x452   : > { %v4404_v35 = vpop.eup %4403  ;;  %v3195_v43 = vadd.f32 %v3179_v25, %v3163_v59  ;;  %v3100_v42 = vmul.f32 %v4402_v51, %v8371_v12  ;;  %4415 = vpow2.f32 %v2971_v6 }
 0x453   : > { %v4406_v9 = vpop.eup %4405  ;;  %v3036_v40 = vadd.f32 %v4404_v35, %v4402_v51  ;;  %v3116_v55 = vmul.f32 %v4404_v35, %v8372_v31  ;;  %v2830_v33 = vmax.f32 %v2798_v2, %v2814_v63  ;;  %4417 = vpow2.f32 %v3019_v3  ;;  %v8382_v51 = vld [vmem:[#allocation74_spill] sm:$0xff] }
 0x454   : > { %v4408_v14 = vpop.eup %4407  ;;  %v3148_v21 = vmul.f32 %v4406_v9, %v8374_v38 }
 0x455   : > { %v4410_v49 = vpop.eup %4409  ;;  %v3211_v1 = vmul.f32 %v4408_v14, %v3195_v43  ;;  %v3052_v60 = vadd.f32 %v4406_v9, %v3036_v40  ;;  %v2846_v39 = vsub.f32 %v7910_v36, %v2830_v33  ;;  %v3132_v45 = vadd.f32 %v3116_v55, %v3100_v42  ;;  %v8383_v55 = vld [vmem:[#allocation95_spill] sm:$0xff] }
 0x456   : > { %v4412_v61 = vpop.eup %4411  ;;  %v2894_v17 = vsub.f32 %v7923_v8, %v2830_v33  ;;  %v2942_v54 = vsub.f32 %v2686_v48, %v2830_v33  ;;  %v2990_v11 = vsub.f32 %v2782_v18, %v2830_v33  ;;  %v3180_v37 = vmul.f32 %v4410_v49, %v8377_v20  ;;  %v8381_v48 = vld [vmem:[#allocation93_spill] sm:$0xff] }
 0x457   : > { %v4414_v44 = vpop.eup %4413  ;;  %v3243_v27 = vmul.f32 0.9, %v3211_v1  ;;  %v3068_v47 = vadd.f32 %v4410_v49, %v3052_v60  ;;  %v3101_v22 = vmul.f32 %v4412_v61, %v8375_v30  ;;  %v2877_v53 = vmul.f32 1.442695, %v2846_v39  ;;  %v8385_v60 = vld [vmem:[#allocation119_spill] sm:$0xff] }
 0x458   : > { %v3037_v58 = vadd.f32 %v4414_v44, %v4412_v61  ;;  %v3117_v5 = vmul.f32 %v4414_v44, %v8376_v29  ;;  %v2925_v19 = vmul.f32 1.442695, %v2894_v17  ;;  %v4416_v36 = vpop.eup %4415  ;;  %v3164_v41 = vadd.f32 %v3148_v21, %v3132_v45  ;;  %v8386_v21 = vld [vmem:[#allocation97_spill] sm:$0xff] }
 0x459   : > { %v3259_v52 = vadd.f32 %v3243_v27, %v3227_v23  ;;  %4419 = vrcp.f32 %v3068_v47  ;;  %v4418_v8 = vpop.eup %4417  ;;  %v2973_v56 = vmul.f32 1.442695, %v2942_v54  ;;  %v3021_v50 = vmul.f32 1.442695, %v2990_v11 }
 0x45a   : > { %v3053_v34 = vadd.f32 %v4416_v36, %v3037_v58  ;;  %4421 = vpow2.f32 %v2877_v53  ;;  %v3133_v7 = vadd.f32 %v3117_v5, %v3101_v22  ;;  %v3149_v0 = vmul.f32 %v4416_v36, %v8378_v16 }
 0x45b   : > { %3275 = vst [vmem:[%s7395_s24 + $0x60] sm:$0xff] %v3259_v52  ;;  %4423 = vpow2.f32 %v2925_v19  ;;  %v3196_v15 = vadd.f32 %v3180_v37, %v3164_v41  ;;  %v3181_v59 = vmul.f32 %v4418_v8, %v8379_v10  ;;  %v3228_v46 = vmul.f32 0.1, %v8381_v48 }
 0x45c   : > { %v3069_v24 = vadd.f32 %v4418_v8, %v3053_v34  ;;  %4425 = vpow2.f32 %v2973_v56  ;;  %v3165_v28 = vadd.f32 %v3149_v0, %v3133_v7  ;;  %v3229_v33 = vmul.f32 0.1, %v8383_v55 }
 0x45d   : > { %v3230_v17 = vmul.f32 0.1, %v8386_v21 }
 0x45e   : > { %4427 = vrcp.f32 %v3069_v24  ;;  %v3197_v63 = vadd.f32 %v3181_v59, %v3165_v28 }
 0x45f   : > { %v4420_v32 = vpop.eup %4419  ;;  %4429 = vpow2.f32 %v3021_v50 }
 0x460   : > { %v4422_v13 = vpop.eup %4421  ;;  %v3212_v4 = vmul.f32 %v4420_v32, %v3196_v15 }
 0x461   : > { %v4424_v62 = vpop.eup %4423  ;;  %v3102_v6 = vmul.f32 %v4422_v13, %v8380_v26 }
 0x462   : > { %v3244_v25 = vmul.f32 0.9, %v3212_v4  ;;  %v3038_v18 = vadd.f32 %v4424_v62, %v4422_v13  ;;  %v3118_v2 = vmul.f32 %v4424_v62, %v8382_v51  ;;  %v4426_v3 = vpop.eup %4425 }
 0x463   : > { %v3150_v23 = vmul.f32 %v4426_v3, %v8384_v57 }
 0x464   : > { %v4428_v35 = vpop.eup %4427  ;;  %v3260_v43 = vadd.f32 %v3244_v25, %v3228_v46  ;;  %v3054_v12 = vadd.f32 %v4426_v3, %v3038_v18  ;;  %v3134_v40 = vadd.f32 %v3118_v2, %v3102_v6 }
 0x465   : > { %v4430_v42 = vpop.eup %4429  ;;  %v3213_v9 = vmul.f32 %v4428_v35, %v3197_v63 }
 0x466   : > { %3276 = vst [vmem:[%s7395_s24 + $0x68] sm:$0xff] %v3260_v43  ;;  %v3070_v31 = vadd.f32 %v4430_v42, %v3054_v12  ;;  %v3166_v1 = vadd.f32 %v3150_v23, %v3134_v40  ;;  %v3182_v39 = vmul.f32 %v4430_v42, %v8385_v60 }
 0x467   : > { %v3245_v14 = vmul.f32 0.9, %v3213_v9 }
 0x468   : > { %4431 = vrcp.f32 %v3070_v31  ;;  %v3198_v61 = vadd.f32 %v3182_v39, %v3166_v1 }
 0x469   : > { %v3261_v49 = vadd.f32 %v3245_v14, %v3229_v33 }
 0x46b   : > { %3277 = vst [vmem:[%s7395_s24 + $0x70] sm:$0xff] %v3261_v49 }
 0x46e   : > { %v4432_v45 = vpop.eup %4431 }
 0x46f   : > { %v3214_v38 = vmul.f32 %v4432_v45, %v3198_v61 }
 0x471   : > { %v3246_v54 = vmul.f32 0.9, %v3214_v38 }
 0x473   : > { %v3262_v44 = vadd.f32 %v3246_v54, %v3230_v17 }
 0x475   : > { %3278 = vst [vmem:[%s7395_s24 + $0x78] sm:$0xff] %v3262_v44 }
 0x476   : > { %4642 = shalt.err (!%p4639_p9)
}
 0x477   : > { %s4709_s20 = smov 128   ;;  %s4710_s0 = smov 8  }
 0x478   : > { %3910 = dma.vmem_to_hbm [thread:$0]  (%p4814_p7), %s3293_s15, 2048, %s3295_s16, %s3280_s22, %s4709_s20, %s4709_s20, %s4710_s0  }
 0x479 PF: > { %s3309_s6 = sand.u32 1, %s4685_s18   ;;  %p8388_p8 = scmp.ge.s32.totalorder %s4697_s21, 2 }
 0x47a   : > { %s3310_s9 = scalar_lea.sflag [#allocation4], %s3309_s6 }
 0x47b   : > { %p3930_p12 = pnand %p8388_p8, %p4776_p6 }
 0x47d   : > { %p3931_p5 = pneg %p3930_p12 }
 0x47f   : > { %4680 = dma.done.wait (%p3931_p5), %s3310_s9, 2048  }
 0x480   : > { %4682 = vsyncadd (%p3931_p5), %s3310_s9, 4294965248  ;;  %s8389_s21 = sld [smem:[#allocation20_spill]]  ;;  %s8392_s18 = smov %s4689_s19 }
 0x481   : > { %s8390_s11 = sld [smem:[#allocation18_spill]] }
 0x482   : > { %s8391_s20 = sld [smem:[#allocation21_spill]] }
 0x486   : > { %p20_p1 = scmp.ge.s32.totalorder %s8389_s21, 4  }
 0x487   : > { %s8393_s19 = smov %s8390_s11 }
 0x488   :  { %22 = sbr.rel (!%p20_p1) target bundleno = 10 (0xa), region = 108 }
 0x48d   :  { %3316 = vsyncpa [#allocation3], 1 }
 0x48e   :  { %3318 = vsyncpa [#allocation3 + $0x1], 1 }
 0x48f   :  { %3319 = vsyncpa [#allocation6], 1 }
 0x490   :  { %3320 = vsyncpa [#allocation10], 1 }
 0x491   :  { %3321 = vsyncpa [#allocation4], 1 }
 0x492   :  { %3323 = vsyncpa [#allocation4 + $0x1], 1 }

</bundles_post_ra>
